<compile_context>
chip_gen: v7x
topology: tpu7x:2x2x1
jax: 0.10.0
libtpu: 0.0.40
codegen_flags: <defaults>
</compile_context>

<pallas_src>
import jax
import jax.numpy as jnp
from jax.experimental import pallas as pl
from jax.experimental.pallas import tpu as pltpu

FC_SIZES = 512 * 2          # 1024
HIDDEN1 = 8092
NUM_CLASSES = 2

HIDDEN_PAD = 8192           # next multiple of 128
N_SPLIT = 2                 # hidden halves -> dual-TensorCore sharding on v7x
TILE_H = 2048               # hidden chunk per grid step (int8 chunk = 2 MiB)
CHUNKS_PER_SPLIT = HIDDEN_PAD // (N_SPLIT * TILE_H)   # = 2
TILE_B_MAX = 128            # batch tile (MXU-friendly) for large B


def _dense_fc_kernel(x_ref, w1q_ref, s1_ref, b1_ref, w2t_ref, o_ref):
    """One (batch-block, hidden-split, hidden-chunk) grid step.

    Accumulates partial logits for this hidden split into the VMEM-resident
    output block (bias + softmax are applied outside, after the cross-split
    combine).
    """
    k = pl.program_id(2)

    @pl.when(k == 0)
    def _():
        o_ref[...] = jnp.zeros_like(o_ref)

    # fc1 chunk: int8 W1 -> bf16 (VPU), bf16 matmul, f32 accumulate on MXU.
    w1_bf = w1q_ref[...].astype(jnp.bfloat16)
    acc = jnp.dot(x_ref[...], w1_bf, preferred_element_type=jnp.float32)

    # Dequant (per-output-column scale) + bias + relu; all O(tile_b * TILE_H).
    hidden = jnp.maximum(acc * s1_ref[...] + b1_ref[...], 0.0)

    # fc2 partial logits: contract TILE_H of hidden against transposed W2
    # chunk (NUM_CLASSES, TILE_H)  ->  (tile_b, NUM_CLASSES).
    part = jax.lax.dot_general(
        hidden.astype(jnp.bfloat16), w2t_ref[...],
        dimension_numbers=(((1,), (1,)), ((), ())),
        preferred_element_type=jnp.float32)

    o_ref[...] += part


def prepare_params(w1, b1, w2, b2):
    """One-time packing (call once, outside the forward path).

    - W1: symmetric per-output-column int8 quantisation + f32 scale,
      zero-padded 8092 -> 8192.
    - W2: transposed to (NUM_CLASSES, HIDDEN_PAD) bf16 (lane-dense streaming).
    - b1 zero-padded; b2 kept f32 (used in the XLA epilogue).

    Weight layout convention: w1 is (in, out) = (1024, 8092), w2 is (8092, 2),
    i.e. the transpose of torch nn.Linear.weight.
    """
    absmax = jnp.max(jnp.abs(w1), axis=0)                       # (HIDDEN1,)
    scale = (absmax / 127.0).astype(jnp.float32)
    safe = jnp.where(scale > 0.0, scale, 1.0)
    w1q = jnp.clip(jnp.round(w1 / safe), -127.0, 127.0).astype(jnp.int8)

    w1q_p = jnp.zeros((FC_SIZES, HIDDEN_PAD), jnp.int8)
    w1q_p = w1q_p.at[:, :HIDDEN1].set(w1q)
    s1_p = jnp.zeros((1, HIDDEN_PAD), jnp.float32).at[0, :HIDDEN1].set(scale)
    b1_p = jnp.zeros((1, HIDDEN_PAD), jnp.float32).at[0, :HIDDEN1].set(b1)
    w2t_p = jnp.zeros((NUM_CLASSES, HIDDEN_PAD), jnp.bfloat16)
    w2t_p = w2t_p.at[:, :HIDDEN1].set(w2.T.astype(jnp.bfloat16))
    b2_p = b2.reshape(1, NUM_CLASSES).astype(jnp.float32)
    return w1q_p, s1_p, b1_p, w2t_p, b2_p


@jax.jit
def simpler_dense_nn_fc(x, w1q, s1, b1, w2t, b2):
    """Forward pass. x: any shape that flattens to (-1, FC_SIZES)."""
    x2 = x.reshape(-1, FC_SIZES).astype(jnp.bfloat16)
    B = x2.shape[0]

    # Batch tiling: single full-batch block for small B, 128-row parallel
    # blocks (zero-padded) for large B from x.view(-1, 1024).
    if B <= TILE_B_MAX:
        tile_b, b_pad = B, B
    else:
        tile_b = TILE_B_MAX
        b_pad = ((B + tile_b - 1) // tile_b) * tile_b
        x2 = jnp.pad(x2, ((0, b_pad - B), (0, 0)))

    grid = (b_pad // tile_b, N_SPLIT, CHUNKS_PER_SPLIT)

    partials = pl.pallas_call(
        _dense_fc_kernel,
        out_shape=jax.ShapeDtypeStruct((N_SPLIT, b_pad, NUM_CLASSES),
                                       jnp.float32),
        grid_spec=pltpu.PrefetchScalarGridSpec(
            num_scalar_prefetch=0,
            grid=grid,
            in_specs=[
                # x: resident per batch block.
                pl.BlockSpec((tile_b, FC_SIZES), lambda b, c, k: (b, 0)),
                # W1 int8 chunk for this (split, chunk).
                pl.BlockSpec((FC_SIZES, TILE_H),
                             lambda b, c, k: (0, c * CHUNKS_PER_SPLIT + k)),
                # per-column dequant scale chunk.
                pl.BlockSpec((1, TILE_H),
                             lambda b, c, k: (0, c * CHUNKS_PER_SPLIT + k)),
                # b1 chunk.
                pl.BlockSpec((1, TILE_H),
                             lambda b, c, k: (0, c * CHUNKS_PER_SPLIT + k)),
                # W2^T chunk, lane-dense (NUM_CLASSES, TILE_H).
                pl.BlockSpec((NUM_CLASSES, TILE_H),
                             lambda b, c, k: (0, c * CHUNKS_PER_SPLIT + k)),
            ],
            # Per-split partial-logit slab; resident across the chunk axis.
            out_specs=pl.BlockSpec((None, tile_b, NUM_CLASSES),
                                   lambda b, c, k: (c, b, 0)),
        ),
        compiler_params=pltpu.CompilerParams(
            # batch blocks and hidden splits are independent (megacore-shardable
            # on v7x); the chunk axis is the resident-accumulator reduction.
            dimension_semantics=("parallel", "parallel", "arbitrary"),
            # Actual use ~7 MiB (2 MiB int8 W1 chunk double-buffered + misc);
            # 16 MiB leaves headroom and fits v7x's 64 MiB VMEM comfortably.
            vmem_limit_bytes=16 * 1024 * 1024,
        ),
    )(x2, w1q, s1, b1, w2t)

    # Tiny epilogue in plain XLA: combine hidden-split partials, bias, softmax.
    logits = jnp.sum(partials, axis=0)[:B] + b2
    return jax.nn.softmax(logits, axis=1)


def _init_params(key):
    """Deterministic init matching nn.Linear default (U(-1/sqrt(fan_in), +))."""
    k1, k2, k3, k4 = jax.random.split(key, 4)
    bound1 = 1.0 / jnp.sqrt(jnp.float32(FC_SIZES))
    bound2 = 1.0 / jnp.sqrt(jnp.float32(HIDDEN1))
    w1 = jax.random.uniform(k1, (FC_SIZES, HIDDEN1), jnp.float32, -bound1, bound1)
    b1 = jax.random.uniform(k2, (HIDDEN1,), jnp.float32, -bound1, bound1)
    w2 = jax.random.uniform(k3, (HIDDEN1, NUM_CLASSES), jnp.float32, -bound2, bound2)
    b2 = jax.random.uniform(k4, (NUM_CLASSES,), jnp.float32, -bound2, bound2)
    return w1, b1, w2, b2


def _reference(x, w1, b1, w2, b2):
    x2 = x.reshape(-1, FC_SIZES)
    h = jnp.maximum(x2 @ w1 + b1, 0.0)
    logits = h @ w2 + b2
    return jax.nn.softmax(logits, axis=1)


if __name__ == "__main__":
    key = jax.random.PRNGKey(0)
    kx, kp = jax.random.split(key)

    # Small batch; input already flat (B, 1024), consistent with x.view(-1, 1024).
    B = 2
    x = jax.random.normal(kx, (B, FC_SIZES), jnp.float32)
    w1, b1, w2, b2 = _init_params(kp)

    # One-time parameter packing (int8 quant + padding + transpose) outside the
    # forward path.
    params = prepare_params(w1, b1, w2, b2)
    params = jax.block_until_ready(params)

    out = simpler_dense_nn_fc(x, *params)
    out = jax.block_until_ready(out)

    ref = _reference(x, w1, b1, w2, b2)
    assert out.shape == (B, NUM_CLASSES), out.shape
    assert bool(jnp.all(jnp.isfinite(out)))
    assert bool(jnp.allclose(jnp.sum(out, axis=1), 1.0, atol=1e-4))
    # int8 W1 streaming + bf16 activations -> loosened tolerance vs f32 ref.
    max_err = jnp.max(jnp.abs(out - ref))
    assert max_err < 2e-2, f"max err {max_err}"

    print("KERNEL_OK")
</pallas_src>

<mosaic_0001>
module attributes {stable_mosaic.version = 11 : i64} {
  func.func @_dense_fc_kernel(%arg0: i32, %arg1: i32, %arg2: i32, %arg3: memref<2x1024xbf16, #tpu.memory_space<vmem>>, %arg4: memref<1024x2048xi8, #tpu.memory_space<vmem>>, %arg5: memref<1x2048xf32, #tpu.memory_space<vmem>>, %arg6: memref<1x2048xf32, #tpu.memory_space<vmem>>, %arg7: memref<2x2048xbf16, #tpu.memory_space<vmem>>, %arg8: memref<1x2x2xf32, #tpu.memory_space<vmem>>) attributes {dimension_semantics = [#tpu.dimension_semantics<parallel>, #tpu.dimension_semantics<parallel>, #tpu.dimension_semantics<arbitrary>], iteration_bounds = array<i64: 1, 2, 2>, scalar_prefetch = 0 : i64, scratch_operands = 0 : i64, tpu.core_type = #tpu.core_type<tc>, window_params = [{transform_indices = @transform_0, window_bounds = array<i64: 2, 1024>}, {transform_indices = @transform_1, window_bounds = array<i64: 1024, 2048>}, {transform_indices = @transform_2, window_bounds = array<i64: 1, 2048>}, {transform_indices = @transform_3, window_bounds = array<i64: 1, 2048>}, {transform_indices = @transform_4, window_bounds = array<i64: 2, 2048>}, {transform_indices = @transform_5, window_bounds = array<i64: 1, 2, 2>}]} {
    %c0_i32 = arith.constant 0 : i32
    %0 = arith.cmpi eq, %arg2, %c0_i32 : i32
    %1 = arith.extui %0 : i1 to i32
    %c0_i32_0 = arith.constant 0 : i32
    %2 = arith.cmpi ne, %1, %c0_i32_0 : i32
    scf.if %2 {
      %cst_18 = arith.constant 0.000000e+00 : f32
      %24 = vector.broadcast %cst_18 : f32 to vector<2x2xf32>
      %c0_19 = arith.constant 0 : index
      %c0_20 = arith.constant 0 : index
      %c0_21 = arith.constant 0 : index
      %25 = vector.load %arg8[%c0_19, %c0_20, %c0_21] : memref<1x2x2xf32, #tpu.memory_space<vmem>>, vector<1x2x2xf32>
      %26 = vector.shape_cast %25 : vector<1x2x2xf32> to vector<2x2xf32>
      %27 = vector.shape_cast %24 : vector<2x2xf32> to vector<1x2x2xf32>
      tpu.vector_store %arg8[%c0_19, %c0_20, %c0_21], %27 {strides = array<i32>} : memref<1x2x2xf32, #tpu.memory_space<vmem>>, vector<1x2x2xf32>,
    } else {
    }
    %c0 = arith.constant 0 : index
    %c0_1 = arith.constant 0 : index
    %3 = vector.load %arg4[%c0, %c0_1] : memref<1024x2048xi8, #tpu.memory_space<vmem>>, vector<1024x2048xi8>
    %4 = arith.sitofp %3 : vector<1024x2048xi8> to vector<1024x2048xbf16>
    %c0_2 = arith.constant 0 : index
    %c0_3 = arith.constant 0 : index
    %5 = vector.load %arg3[%c0_2, %c0_3] : memref<2x1024xbf16, #tpu.memory_space<vmem>>, vector<2x1024xbf16>
    %cst = arith.constant dense<0.000000e+00> : vector<2x2048xf32>
    %6 = tpu.matmul %5, %4, %cst {dimension_numbers = #tpu.dot_dimension_numbers<[1], [0], [0], [1], [0, 0, 1, 1], [], []>} : vector<2x1024xbf16>, vector<1024x2048xbf16>, vector<2x2048xf32> -> vector<2x2048xf32>
    %c0_4 = arith.constant 0 : index
    %c0_5 = arith.constant 0 : index
    %7 = vector.load %arg5[%c0_4, %c0_5] : memref<1x2048xf32, #tpu.memory_space<vmem>>, vector<1x2048xf32>
    %8 = vector.broadcast %7 : vector<1x2048xf32> to vector<2x2048xf32>
    %9 = arith.mulf %6, %8 : vector<2x2048xf32>
    %c0_6 = arith.constant 0 : index
    %c0_7 = arith.constant 0 : index
    %10 = vector.load %arg6[%c0_6, %c0_7] : memref<1x2048xf32, #tpu.memory_space<vmem>>, vector<1x2048xf32>
    %11 = vector.broadcast %10 : vector<1x2048xf32> to vector<2x2048xf32>
    %12 = arith.addf %9, %11 : vector<2x2048xf32>
    %cst_8 = arith.constant 0.000000e+00 : f32
    %13 = vector.broadcast %cst_8 : f32 to vector<2x2048xf32>
    %14 = arith.maximumf %12, %13 : vector<2x2048xf32>
    %15 = arith.truncf %14 : vector<2x2048xf32> to vector<2x2048xbf16>
    %c0_9 = arith.constant 0 : index
    %c0_10 = arith.constant 0 : index
    %16 = vector.load %arg7[%c0_9, %c0_10] : memref<2x2048xbf16, #tpu.memory_space<vmem>>, vector<2x2048xbf16>
    %cst_11 = arith.constant dense<0.000000e+00> : vector<2x2xf32>
    %17 = tpu.matmul %15, %16, %cst_11 {dimension_numbers = #tpu.dot_dimension_numbers<[1], [1], [0], [0], [0, 0, 1, 0], [], []>} : vector<2x2048xbf16>, vector<2x2048xbf16>, vector<2x2xf32> -> vector<2x2xf32>
    %c0_12 = arith.constant 0 : index
    %c0_13 = arith.constant 0 : index
    %c0_14 = arith.constant 0 : index
    %18 = vector.load %arg8[%c0_12, %c0_13, %c0_14] : memref<1x2x2xf32, #tpu.memory_space<vmem>>, vector<1x2x2xf32>
    %19 = vector.shape_cast %18 : vector<1x2x2xf32> to vector<2x2xf32>
    %20 = arith.addf %19, %17 : vector<2x2xf32>
    %c0_15 = arith.constant 0 : index
    %c0_16 = arith.constant 0 : index
    %c0_17 = arith.constant 0 : index
    %21 = vector.load %arg8[%c0_15, %c0_16, %c0_17] : memref<1x2x2xf32, #tpu.memory_space<vmem>>, vector<1x2x2xf32>
    %22 = vector.shape_cast %21 : vector<1x2x2xf32> to vector<2x2xf32>
    %23 = vector.shape_cast %20 : vector<2x2xf32> to vector<1x2x2xf32>
    tpu.vector_store %arg8[%c0_15, %c0_16, %c0_17], %23 {strides = array<i32>} : memref<1x2x2xf32, #tpu.memory_space<vmem>>, vector<1x2x2xf32>,
    return
  }
  func.func @transform_0(%arg0: i32, %arg1: i32, %arg2: i32) -> (i32, i32) {
    %c0_i32 = arith.constant 0 : i32
    %c0_i32_0 = arith.constant 0 : i32
    return %arg0, %c0_i32 : i32, i32
  }
  func.func @transform_1(%arg0: i32, %arg1: i32, %arg2: i32) -> (i32, i32) {
    %c2_i32 = arith.constant 2 : i32
    %0 = arith.muli %arg1, %c2_i32 : i32
    %1 = arith.addi %0, %arg2 : i32
    %c0_i32 = arith.constant 0 : i32
    %c0_i32_0 = arith.constant 0 : i32
    return %c0_i32, %1 : i32, i32
  }
  func.func @transform_2(%arg0: i32, %arg1: i32, %arg2: i32) -> (i32, i32) {
    %c2_i32 = arith.constant 2 : i32
    %0 = arith.muli %arg1, %c2_i32 : i32
    %1 = arith.addi %0, %arg2 : i32
    %c0_i32 = arith.constant 0 : i32
    %c0_i32_0 = arith.constant 0 : i32
    return %c0_i32, %1 : i32, i32
  }
  func.func @transform_3(%arg0: i32, %arg1: i32, %arg2: i32) -> (i32, i32) {
    %c2_i32 = arith.constant 2 : i32
    %0 = arith.muli %arg1, %c2_i32 : i32
    %1 = arith.addi %0, %arg2 : i32
    %c0_i32 = arith.constant 0 : i32
    %c0_i32_0 = arith.constant 0 : i32
    return %c0_i32, %1 : i32, i32
  }
  func.func @transform_4(%arg0: i32, %arg1: i32, %arg2: i32) -> (i32, i32) {
    %c2_i32 = arith.constant 2 : i32
    %0 = arith.muli %arg1, %c2_i32 : i32
    %1 = arith.addi %0, %arg2 : i32
    %c0_i32 = arith.constant 0 : i32
    %c0_i32_0 = arith.constant 0 : i32
    return %c0_i32, %1 : i32, i32
  }
  func.func @transform_5(%arg0: i32, %arg1: i32, %arg2: i32) -> (i32, i32, i32) {
    %c0_i32 = arith.constant 0 : i32
    %c0_i32_0 = arith.constant 0 : i32
    return %arg1, %arg0, %c0_i32 : i32, i32, i32
  }
}

</mosaic_0001>

<bundles_post_ra>
// kernel: simpler_dense_nn_fc.1
= control target key start
LH: loop header
LB: loop body
LE: loop exit
PB: predicated region body
PF: predicated region fallthrough
CT: control target
= control target key end

     0   :  { %s5723_s0 = inlined_call_operand.vmem [shape: bf16[2,1024], index: 0, kind: input, shape index: {}]   ;;  %s5724_s1 = inlined_call_operand.hbm [shape: s8[1024,8192], index: 1, kind: input, shape index: {}]   ;;  %s5725_s2 = inlined_call_operand.hbm [shape: f32[1,8192], index: 2, kind: input, shape index: {}]   ;;  %s5726_s3 = inlined_call_operand.hbm [shape: f32[1,8192], index: 3, kind: input, shape index: {}]   ;;  %s5727_s4 = inlined_call_operand.hbm [shape: bf16[2,8192], index: 4, kind: input, shape index: {}]   ;;  %s5728_s5 = inlined_call_operand.vmem [shape: f32[2,2,2], index: 5, kind: output, shape index: {}]  }
   0x1   :  { %5737 = sst [smem:[#allocation17_spill]] %s5724_s1 }
   0x2   :  { %5738 = sst [smem:[#allocation18_spill]] %s5725_s2 }
   0x3   :  { %10 = vsyncpa [#allocation3], 0 }
   0x4   :  { %12 = vsyncpa [#allocation3 + $0x1], 0 }
   0x5   :  { %13 = vsyncpa [#allocation5], 0 }
   0x6   :  { %15 = vsyncpa [#allocation5 + $0x1], 0 }
   0x7   :  { %16 = vsyncpa [#allocation8], 0 }
   0x8   :  { %18 = vsyncpa [#allocation8 + $0x1], 0  ;;  %s4667_s18 = smov 0   ;;  %s4669_s19 = smov 0  }
   0x9   :  { %s4671_s20 = smov 0   ;;  %s4673_s21 = smov 0  }
   0xa   :  { %s4675_s22 = smov 0   ;;  %s4677_s23 = smov 0  }
   0xb   :  { %s4679_s24 = smov 0   ;;  %s4681_s25 = smov 0  }
   0xc LB: > { %5739 = sst [smem:[#allocation12_spill]] %s4618_s23  ;;  %s5729_s26 = sadd.s32 4294967295, %s4626_s25   ;;  %s4626_s25 = sphi %s4681_s25, %s24_s25   ;;  %s4622_s24 = sphi %s4679_s24, %s5760_s24   ;;  %s4618_s23 = sphi %s4677_s23, %s5759_s23   ;;  %s4614_s22 = sphi %s4675_s22, %s5758_s22   ;;  %s4610_s21 = sphi %s4673_s21, %s5757_s21   ;;  %s4606_s20 = sphi %s4671_s20, %s5763_s20   ;;  %s4602_s19 = sphi %s4669_s19, %s5762_s19   ;;  %s4598_s18 = sphi %s4667_s18, %s5761_s18  }
   0xd   : > { %5740 = sst [smem:[#allocation13_spill]] %s4622_s24  ;;  %s36_s27 = sadd.s32 1, %s4618_s23 }
   0xe   : > { %p37_p0 = scmp.ge.s32.totalorder %s36_s27, 2  ;;  %s39_s28 = sadd.s32 1, %s4622_s24 }
   0xf   : > { %s4202_s29 = sshll.u32 %s4622_s24, 1  ;;  %s80_s30 = sadd.s32 1, %s4606_s20 }
  0x10   : > { %s5765_s27 = smov (%p37_p0, %s36_s27), 0  ;;  %s5767_s28 = smov (!%p37_p0, %s39_s28), %s4622_s24 }
  0x11   : > { %5741 = sst [smem:[#allocation14_spill]] %s5765_s27  ;;  %s74_s6 = sadd.s32 %s4618_s23, %s4202_s29 }
  0x12   : > { %p87_p1 = scmp.ne.s32.totalorder %s4606_s20, %s4602_s19  ;;  %p41_p2 = scmp.ge.s32.totalorder %s5767_s28, 2 }
  0x13   : > { %p88_p3 = scmp.eq.s32.totalorder %s4626_s25, 0  ;;  %p93_p4 = scmp.ne.s32.totalorder %s4602_s19, %s4598_s18 }
  0x14   : > { %p94_p5 = scmp.eq.s32.totalorder %s5729_s26, 0  ;;  %s5769_s28 = smov (%p41_p2, %s5767_s28), 0 }
  0x15   : > { %5742 = sst [smem:[#allocation15_spill]] %s5769_s28  ;;  %p89_p6 = por %p88_p3, %p87_p1 }
  0x16   : > { %p4722_p7 = por %p94_p5, %p93_p4  ;;  %s4203_s8 = sshll.u32 %s5769_s28, 1 }
  0x17   : > { %s76_s9 = sadd.s32 %s4203_s8, %s5765_s27  ;;  %p4359_p8 = scmp.lt.s32.totalorder %s4626_s25, 4 }
  0x18   : > { %s5743_s7 = scalar_select %p4722_p7, 1, 0 }
  0x19   : > { %s77_s10 = ssub.s32 %s74_s6, %s76_s9  ;;  %s4730_s11 = sand.u32 1, %s4606_s20  }
  0x1a   : > { %p78_p9 = scmp.eq.s32.totalorder %s77_s10, 0  ;;  %s4238_s12 = sshll.u32 %s74_s6, 11 }
  0x1b   : > { %s5744_s1 = sld [smem:[#allocation17_spill]]  ;;  %p4737_p10 = pnand %p4359_p8, %p89_p6 }
  0x1c   : > { %s4742_s17 = scalar_select %p78_p9, %s4606_s20, %s80_s30  }
  0x1d   : > { %s5745_s16 = scalar_select %p4737_p10, 1, 0 }
  0x1e   : > { %5746 = sst [smem:[#allocation16_spill]] %s4742_s17  ;;  %s265_s18 = sand.u32 1, %s4626_s25  }
  0x1f   : > { %s4746_s29 = sshll.u32 %s4730_s11, 4  ;;  %s4748_s8 = sshll.u32 %s74_s6, 8 }
  0x20   : > { %s5747_s2 = sld [smem:[#allocation18_spill]]  ;;  %s4760_s30 = scalar_lea.sflag [#allocation5], %s265_s18 }
  0x21   : > { %s4735_s15 = scalar_lea.hbm %s5744_s1, %s4238_s12  ;;  %s269_s12 = scalar_lea.vmem [#allocation4], %s4746_s29 }
  0x22   : > { %s279_s14 = sshll.u32 %s269_s12, 4  ;;  %p4766_p13 = pneg %p4737_p10  ;;  %s4757_s14 = int_to_ptr.vmem [resolvable:$true] %s279_s14 }
  0x26   : > { %s4754_s13 = scalar_lea.hbm %s5747_s2, %s4748_s8  ;;  %s4437_s12 = scalar_lea.hbm %s5747_s2, 1024 }
  0x27   : > { %s4432_s26 = scalar_lea.hbm %s4754_s13, 256  ;;  %p4438_p2 = scmp.lt.u32.totalorder %s4754_s13, %s5747_s2 }
  0x28   : > { %p4433_p12 = scmp.ne.s32.totalorder %s4754_s13, %s4432_s26  ;;  %p4439_p3 = scmp.lt.u32.totalorder %s4437_s12, %s4432_s26 }
  0x29   : > { %p4441_p5 = scmp.lt.u32.totalorder %s4432_s26, %s4754_s13 }
  0x2a   : > { %p4435_p0 = pnand %p4766_p13, %p4433_p12  ;;  %p4440_p4 = por %p4439_p3, %p4438_p2 }
  0x2c   : > { %p4436_p1 = pneg %p4435_p0  ;;  %p4442_p6 = por %p4441_p5, %p4440_p4 }
  0x2e   : > { %p4443_p8 = pnand %p4442_p6, %p4436_p1 }
  0x30   : > { %4446 = shalt.err (!%p4443_p8)
}
  0x31   : > { %s4447_s18 = scalar_lea.vmem %s4757_s14, 256  ;;  %s4628_s9 = smov [#allocation4]  }
  0x32   : > { %p4448_p9 = scmp.ne.s32.totalorder %s4757_s14, %s4447_s18  ;;  %s4452_s10 = sshll.u32 %s4628_s9, 4  ;;  %s4453_s10 = int_to_ptr.vmem [resolvable:$false] %s4452_s10 }
  0x33   : > { %s4454_s27 = scalar_lea.vmem %s4453_s10, 512  ;;  %p4455_p11 = scmp.lt.s32.totalorder %s4757_s14, %s4453_s10 }
  0x34   : > { %p4450_p12 = pnand %p4448_p9, %p4766_p13  ;;  %p4456_p7 = scmp.lt.s32.totalorder %s4454_s27, %s4447_s18 }
  0x36   : > { %p4451_p0 = pneg %p4450_p12  ;;  %p4457_p2 = por %p4456_p7, %p4455_p11 }
  0x38   : > { %p4458_p3 = pnand %p4457_p2, %p4451_p0 }
  0x3a   : > { %4461 = shalt.err (!%p4458_p3)
}
  0x3b   : > { %4352 = dma.hbm_to_vmem [thread:$0]  (!%p4737_p10), %s4754_s13, 256, %s4757_s14, %s4760_s30  }
  0x3c   : > { %p326_p1 = scmp.lt.s32.totalorder %s4626_s25, 5  ;;  %p5749_p4 = scmp.ge.s32.totalorder %s4626_s25, 1 }
  0x3d   : > { %s4213_s28 = sshll.u32 %s4730_s11, 12  ;;  %s243_s9 = scalar_lea.sflag [#allocation3], %s4730_s11 }
  0x3e   : > { %p4793_p7 = pnand %p5749_p4, %p326_p1  ;;  %s246_s12 = scalar_lea.vmem [#allocation2], %s4213_s28 }
  0x3f   : > { %s255_s18 = sshll.u32 %s246_s12, 4  ;;  %s4462_s10 = scalar_lea.hbm %s4735_s15, 65536  ;;  %s4798_s18 = int_to_ptr.vmem [resolvable:$true] %s255_s18 }
  0x40   : > { %s5750_s26 = scalar_select %p4793_p7, 1, 0 }
  0x41   : > { %p4463_p11 = scmp.ne.s32.totalorder %s4735_s15, %s4462_s10  ;;  %s4467_s14 = scalar_lea.hbm %s5744_s1, 262144 }
  0x42   : > { %p4468_p8 = scmp.lt.u32.totalorder %s4735_s15, %s5744_s1  ;;  %p4469_p9 = scmp.lt.u32.totalorder %s4467_s14, %s4462_s10 }
  0x43   : > { %p4465_p5 = pnand %p4463_p11, %p4766_p13  ;;  %p4471_p0 = scmp.lt.u32.totalorder %s4462_s10, %s4735_s15 }
  0x44   : > { %p4470_p12 = por %p4469_p9, %p4468_p8 }
  0x45   : > { %p4466_p6 = pneg %p4465_p5 }
  0x46   : > { %p4472_p2 = por %p4471_p0, %p4470_p12 }
  0x48   : > { %p4473_p3 = pnand %p4472_p2, %p4466_p6 }
  0x4a   : > { %4476 = shalt.err (!%p4473_p3)
}
  0x4b   : > { %s4477_s28 = scalar_lea.vmem %s4798_s18, 65536  ;;  %s4629_s12 = smov [#allocation2]  }
  0x4c   : > { %p4478_p1 = scmp.ne.s32.totalorder %s4798_s18, %s4477_s28  ;;  %s4482_s27 = sshll.u32 %s4629_s12, 4  ;;  %s4483_s27 = int_to_ptr.vmem [resolvable:$false] %s4482_s27 }
  0x4d   : > { %s4484_s2 = scalar_lea.vmem %s4483_s27, 131072  ;;  %p4485_p5 = scmp.lt.s32.totalorder %s4798_s18, %s4483_s27 }
  0x4e   : > { %p4480_p4 = pnand %p4478_p1, %p4766_p13  ;;  %p4486_p7 = scmp.lt.s32.totalorder %s4484_s2, %s4477_s28 }
  0x50   : > { %p4481_p11 = pneg %p4480_p4  ;;  %p4487_p8 = por %p4486_p7, %p4485_p5 }
  0x52   : > { %p4488_p9 = pnand %p4487_p8, %p4481_p11 }
  0x54   : > { %4491 = shalt.err (!%p4488_p9)
}
  0x55   : > { %s4630_s24 = smov 8192   ;;  %s4631_s10 = smov 2048  }
  0x56   : > { %s4632_s13 = smov 128   ;;  %s4828_s28 = scalar_lea.hbm %s5726_s3, %s4748_s8 }
  0x57   : > { %4349 = dma.hbm_to_vmem [thread:$0]  (!%p4737_p10), %s4735_s15, 65536, %s4798_s18, %s243_s9, %s4630_s24, %s4631_s10, %s4632_s13  }
  0x58   : > { %s290_s27 = scalar_lea.vmem [#allocation6], %s4746_s29  ;;  %s4492_s1 = scalar_lea.hbm %s4828_s28, 256 }
  0x59   : > { %s300_s2 = sshll.u32 %s290_s27, 4  ;;  %p4493_p7 = scmp.ne.s32.totalorder %s4828_s28, %s4492_s1  ;;  %s301_s2 = int_to_ptr.vmem [resolvable:$true] %s300_s2 }
  0x5a   : > { %s4497_s15 = scalar_lea.hbm %s5726_s3, 1024  ;;  %p4498_p0 = scmp.lt.u32.totalorder %s4828_s28, %s5726_s3 }
  0x5b   : > { %p4495_p6 = pnand %p4493_p7, %p4766_p13  ;;  %p4499_p2 = scmp.lt.u32.totalorder %s4497_s15, %s4492_s1 }
  0x5c   : > { %p4501_p1 = scmp.lt.u32.totalorder %s4492_s1, %s4828_s28 }
  0x5d   : > { %p4496_p12 = pneg %p4495_p6  ;;  %p4500_p3 = por %p4499_p2, %p4498_p0 }
  0x5f   : > { %p4502_p4 = por %p4501_p1, %p4500_p3 }
  0x61   : > { %p4503_p11 = pnand %p4502_p4, %p4496_p12 }
  0x63   : > { %4506 = shalt.err (!%p4503_p11)
}
  0x64   : > { %s4507_s24 = scalar_lea.vmem %s301_s2, 256  ;;  %s4633_s10 = smov [#allocation6]  }
  0x65   : > { %p4508_p5 = scmp.ne.s32.totalorder %s301_s2, %s4507_s24  ;;  %s4512_s13 = sshll.u32 %s4633_s10, 4  ;;  %s4513_s13 = int_to_ptr.vmem [resolvable:$false] %s4512_s13 }
  0x66   : > { %s4514_s23 = scalar_lea.vmem %s4513_s13, 512  ;;  %p4515_p7 = scmp.lt.s32.totalorder %s301_s2, %s4513_s13 }
  0x67   : > { %p4510_p8 = pnand %p4508_p5, %p4766_p13  ;;  %p4516_p6 = scmp.lt.s32.totalorder %s4514_s23, %s4507_s24 }
  0x69   : > { %p4511_p9 = pneg %p4510_p8  ;;  %p4517_p10 = por %p4516_p6, %p4515_p7 }
  0x6b   : > { %p4518_p0 = pnand %p4517_p10, %p4511_p9 }
  0x6d   : > { %4521 = shalt.err (!%p4518_p0)
}
  0x6e   : > { %p5751_p2 = scmp.ne.s32.totalorder %s5745_s16, 0  ;;  %s4853_s14 = scalar_lea.hbm %s5727_s4, %s4748_s8 }
  0x6f   : > { %s311_s12 = scalar_lea.vmem [#allocation7], %s4746_s29  ;;  %s308_s15 = scalar_lea.sflag [#allocation8], %s4730_s11 }
  0x70   : > { %4355 = dma.hbm_to_vmem [thread:$0]  (!%p5751_p2), %s4828_s28, 256, %s301_s2, %s4760_s30  }
  0x71   : > { %s321_s27 = sshll.u32 %s311_s12, 4  ;;  %s4522_s18 = scalar_lea.hbm %s4853_s14, 256  ;;  %s322_s27 = int_to_ptr.vmem [resolvable:$true] %s321_s27 }
  0x72   : > { %p4523_p10 = scmp.ne.s32.totalorder %s4853_s14, %s4522_s18  ;;  %s4527_s28 = scalar_lea.hbm %s5727_s4, 1024 }
  0x73   : > { %p4528_p1 = scmp.lt.u32.totalorder %s4853_s14, %s5727_s4  ;;  %p4529_p4 = scmp.lt.u32.totalorder %s4527_s28, %s4522_s18 }
  0x74   : > { %p4525_p12 = pnand %p4523_p10, %p4766_p13  ;;  %p4531_p5 = scmp.lt.u32.totalorder %s4522_s18, %s4853_s14 }
  0x75   : > { %p4530_p11 = por %p4529_p4, %p4528_p1 }
  0x76   : > { %p4526_p3 = pneg %p4525_p12 }
  0x77   : > { %p4532_p8 = por %p4531_p5, %p4530_p11 }
  0x79   : > { %p4533_p9 = pnand %p4532_p8, %p4526_p3 }
  0x7b   : > { %4536 = shalt.err (!%p4533_p9)
}
  0x7c   : > { %s4537_s11 = scalar_lea.vmem %s322_s27, 256  ;;  %s4634_s29 = smov [#allocation7]  }
  0x7d   : > { %p4538_p7 = scmp.ne.s32.totalorder %s322_s27, %s4537_s11  ;;  %s4542_s24 = sshll.u32 %s4634_s29, 4  ;;  %s4543_s24 = int_to_ptr.vmem [resolvable:$false] %s4542_s24 }
  0x7e   : > { %s4544_s10 = scalar_lea.vmem %s4543_s24, 512  ;;  %p4545_p10 = scmp.lt.s32.totalorder %s322_s27, %s4543_s24 }
  0x7f   : > { %p4540_p6 = pnand %p4538_p7, %p4766_p13  ;;  %p4546_p12 = scmp.lt.s32.totalorder %s4544_s10, %s4537_s11 }
  0x81   : > { %p4541_p0 = pneg %p4540_p6  ;;  %p4547_p2 = por %p4546_p12, %p4545_p10 }
  0x83   : > { %p4548_p1 = pnand %p4547_p2, %p4541_p0 }
  0x85   : > { %4551 = shalt.err (!%p4548_p1)
}
  0x86   : > { %p5752_p4 = scmp.ne.s32.totalorder %s5745_s16, 0  ;;  %p5753_p3 = scmp.ne.s32.totalorder %s5750_s26, 0 }
  0x87   : > { %s332_s6 = sand.u32 (!%p5753_p3), 1, %s4602_s19   ;;  %p5754_p13 = scmp.ne.s32.totalorder (!%p5753_p3), %s5743_s7, 0 }
  0x88   : > { %4358 = dma.hbm_to_vmem [thread:$0]  (!%p5752_p4), %s4853_s14, 256, %s322_s27, %s308_s15  }
  0x89   : > { %330 = sbr.rel (%p5753_p3) target bundleno = 1629 (0x65d), region = 40  ;;  %s4230_s13 = sshll.u32 (!%p5753_p3), %s332_s6, 12 }
  0x8a   : > { %s333_s23 = scalar_lea.sflag (!%p5753_p3), [#allocation3], %s332_s6  ;;  %s4877_s1 = scalar_lea.vmem (!%p5753_p3), [#allocation2], %s4230_s13 }
  0x90   : > { %4585 = dma.done.wait (%p5754_p13), %s333_s23, 65536  }
  0x91   : > { %4587 = vsyncadd (%p5754_p13), %s333_s23, 4294901760  ;;  %s5755_s17 = sadd.s32 4294967295, %s4626_s25   ;;  %s4885_s14 = sshll.u32 %s332_s6, 4 }
  0x92   : > { %s341_s16 = sand.u32 1, %s5755_s17   ;;  %s345_s12 = scalar_lea.vmem [#allocation4], %s4885_s14 }
  0x93   : > { %s342_s26 = scalar_lea.sflag [#allocation5], %s341_s16 }
  0x94   : > { %4589 = dma.done.wait (%p5754_p13), %s342_s26, 512  }
  0x95   : > { %4591 = vsyncadd (%p5754_p13), %s342_s26, 4294966784  ;;  %s354_s27 = scalar_lea.vmem [#allocation6], %s4885_s14  ;;  %s360_s15 = scalar_lea.sflag [#allocation8], %s332_s6 }
  0x96   : > { %s363_s18 = scalar_lea.vmem [#allocation7], %s4885_s14 }
  0x97   : > { %4593 = dma.done.wait (%p5754_p13), %s360_s15, 256  }
  0x98   : > { %4595 = vsyncadd (%p5754_p13), %s360_s15, 4294967040  ;;  %p427_p2 = scmp.lt.s32.totalorder %s4614_s22, 1  ;;  %p4235_p11 = scmp.ne.s32.totalorder %s4610_s21, 0 }
  0x99   : > { %vm439_vm0 = vcmask (!%p4235_p11), 9216   ;;  %v4635_v0 = vmov (!%p4235_p11), 0.0  }
  0x9a   : > { %s5771_s22 = smov (!%p427_p2, %s4614_s22), 1  ;;  %438 = sbr.rel (%p4235_p11) target bundleno = 161 (0xa1), region = 60 }
  0x9b   : > { %s4234_s9 = sshll.u32 %s5771_s22, 1 }
  0x9c   : > { %s4903_s2 = scalar_lea.vmem %s5728_s5, %s4234_s9 }
  0x9d   : > { %440 = vst.msk [vmem:[%s4903_s2] sm:$0x3] (!%p4235_p11), %vm439_vm0, %v4635_v0 }
  0xa1 PF: > { %v442_v1 = vld [vmem:[%s4877_s1 + $0x8] sm:$0xff]  ;;  %v444_v2 = vld [vmem:[%s4877_s1 + $0x18] sm:$0xff]  ;;  %v441_v3 = vld [vmem:[%s4877_s1] sm:$0xff]  ;;  %v1983_v31 = vlaneseq  ;;  %v4636_v36 = vmov 1966171168   ;;  %vm4020_vm1 = vcmask 9216  }
  0xa2   : > { %v954_v4 = vunpack.c.l.s8.bf16 %v442_v1  ;;  %v970_v5 = vunpack.c.h.s8.bf16 %v442_v1  ;;  %v956_v6 = vunpack.c.l.s8.bf16 %v444_v2  ;;  %v972_v7 = vunpack.c.h.s8.bf16 %v444_v2  ;;  %v443_v8 = vld [vmem:[%s4877_s1 + $0x10] sm:$0xff]  ;;  %v458_v11 = vld [vmem:[%s4877_s1 + $0x88] sm:$0xff]  ;;  %v460_v12 = vld [vmem:[%s4877_s1 + $0x98] sm:$0xff] }
  0xa3   : > { %v953_v9 = vunpack.c.l.s8.bf16 %v441_v3  ;;  %v955_v10 = vunpack.c.l.s8.bf16 %v443_v8  ;;  %v969_v13 = vunpack.c.h.s8.bf16 %v441_v3  ;;  %v971_v14 = vunpack.c.h.s8.bf16 %v443_v8  ;;  %v457_v17 = vld [vmem:[%s4877_s1 + $0x80] sm:$0xff]  ;;  %v459_v18 = vld [vmem:[%s4877_s1 + $0x90] sm:$0xff]  ;;  %v474_v23 = vld [vmem:[%s4877_s1 + $0x108] sm:$0xff] }
  0xa4   : > { %2036 = vmatprep.subr.bf16.mxu0 %v954_v4  ;;  %2200 = vmatprep.subr.bf16.mxu1 %v956_v6  ;;  %v986_v15 = vunpack.c.l.s8.bf16 %v458_v11  ;;  %v988_v16 = vunpack.c.l.s8.bf16 %v460_v12  ;;  %v985_v19 = vunpack.c.l.s8.bf16 %v457_v17  ;;  %v987_v20 = vunpack.c.l.s8.bf16 %v459_v18  ;;  %v476_v24 = vld [vmem:[%s4877_s1 + $0x118] sm:$0xff]  ;;  %v473_v29 = vld [vmem:[%s4877_s1 + $0x100] sm:$0xff]  ;;  %v475_v30 = vld [vmem:[%s4877_s1 + $0x110] sm:$0xff] }
  0xa5   : > { %2037 = vmatpush1.bf16.msra.mxu0 %v953_v9  ;;  %2201 = vmatpush1.bf16.msra.mxu1 %v955_v10  ;;  %v1002_v21 = vunpack.c.h.s8.bf16 %v458_v11  ;;  %v1004_v22 = vunpack.c.h.s8.bf16 %v460_v12  ;;  %v1001_v25 = vunpack.c.h.s8.bf16 %v457_v17  ;;  %v1003_v26 = vunpack.c.h.s8.bf16 %v459_v18  ;;  %v490_v39 = vld [vmem:[%s4877_s1 + $0x188] sm:$0xff]  ;;  %v492_v40 = vld [vmem:[%s4877_s1 + $0x198] sm:$0xff]  ;;  %v4926_v44 = vld [vmem:[%s5723_s0] sm:$0xff] }
  0xa6   : > { %2038 = vmatprep.subr.bf16.mxu0 %v970_v5  ;;  %2202 = vmatprep.subr.bf16.mxu1 %v972_v7  ;;  %v1018_v27 = vunpack.c.l.s8.bf16 %v474_v23  ;;  %v1020_v28 = vunpack.c.l.s8.bf16 %v476_v24  ;;  %v1017_v32 = vunpack.c.l.s8.bf16 %v473_v29  ;;  %v1019_v33 = vunpack.c.l.s8.bf16 %v475_v30  ;;  %v489_v47 = vld [vmem:[%s4877_s1 + $0x180] sm:$0xff]  ;;  %v491_v48 = vld [vmem:[%s4877_s1 + $0x190] sm:$0xff]  ;;  %v506_v56 = vld [vmem:[%s4877_s1 + $0x208] sm:$0xff] }
  0xa7   : > { %v1034_v34 = vunpack.c.h.s8.bf16 %v474_v23  ;;  %v1036_v35 = vunpack.c.h.s8.bf16 %v476_v24  ;;  %v1981_v37 = vunpack.c.l.s4 %v4636_v36  ;;  %v4919_v38 = vshrl.u32 %v1983_v31, 7  ;;  %v508_v57 = vld [vmem:[%s4877_s1 + $0x218] sm:$0xff]  ;;  %v505_v63 = vld [vmem:[%s4877_s1 + $0x200] sm:$0xff]  ;;  %v507_v0 = vld [vmem:[%s4877_s1 + $0x210] sm:$0xff] }
  0xa8   : > { %v1033_v42 = vunpack.c.h.s8.bf16 %v473_v29  ;;  %v1035_v43 = vunpack.c.h.s8.bf16 %v475_v30  ;;  %v1050_v45 = vunpack.c.l.s8.bf16 %v490_v39  ;;  %v1052_v46 = vunpack.c.l.s8.bf16 %v492_v40  ;;  %v522_v5 = vld [vmem:[%s4877_s1 + $0x288] sm:$0xff]  ;;  %v524_v6 = vld [vmem:[%s4877_s1 + $0x298] sm:$0xff]  ;;  %v521_v11 = vld [vmem:[%s4877_s1 + $0x280] sm:$0xff] }
  0xa9   : > { %2039 = vmatpush1.bf16.msra.mxu0 %v969_v13  ;;  %2203 = vmatpush1.bf16.msra.mxu1 %v971_v14  ;;  %v1982_v41 = vunpack.c.0.s8 %v1981_v37  ;;  %v1049_v51 = vunpack.c.l.s8.bf16 %v489_v47  ;;  %v1051_v52 = vunpack.c.l.s8.bf16 %v491_v48  ;;  %v1066_v53 = vunpack.c.h.s8.bf16 %v490_v39  ;;  %v523_v12 = vld [vmem:[%s4877_s1 + $0x290] sm:$0xff]  ;;  %v538_v17 = vld [vmem:[%s4877_s1 + $0x308] sm:$0xff]  ;;  %v540_v18 = vld [vmem:[%s4877_s1 + $0x318] sm:$0xff] }
  0xaa   : > { %2040 = vmatprep.subr.bf16.mxu0 %v986_v15  ;;  %2204 = vmatprep.subr.bf16.mxu1 %v988_v16  ;;  %v1068_v54 = vunpack.c.h.s8.bf16 %v492_v40  ;;  %v1065_v59 = vunpack.c.h.s8.bf16 %v489_v47  ;;  %v1067_v60 = vunpack.c.h.s8.bf16 %v491_v48  ;;  %v1082_v61 = vunpack.c.l.s8.bf16 %v506_v56  ;;  %v537_v23 = vld [vmem:[%s4877_s1 + $0x300] sm:$0xff]  ;;  %v539_v24 = vld [vmem:[%s4877_s1 + $0x310] sm:$0xff]  ;;  %v554_v29 = vld [vmem:[%s4877_s1 + $0x388] sm:$0xff] }
  0xab   : > { %v4931_v49 = vsub.s32 %v1982_v41, %v4919_v38  ;;  %v1084_v62 = vunpack.c.l.s8.bf16 %v508_v57  ;;  %v1081_v1 = vunpack.c.l.s8.bf16 %v505_v63  ;;  %v1083_v2 = vunpack.c.l.s8.bf16 %v507_v0  ;;  %v556_v30 = vld [vmem:[%s4877_s1 + $0x398] sm:$0xff]  ;;  %v555_v36 = vld [vmem:[%s4877_s1 + $0x390] sm:$0xff] }
  0xac   : > { %v1098_v3 = vunpack.c.h.s8.bf16 %v506_v56  ;;  %v1100_v4 = vunpack.c.h.s8.bf16 %v508_v57  ;;  %v1097_v7 = vunpack.c.h.s8.bf16 %v505_v63  ;;  %v1099_v8 = vunpack.c.h.s8.bf16 %v507_v0 }
  0xad   : > { %2041 = vmatpush1.bf16.msra.mxu0 %v985_v19  ;;  %2205 = vmatpush1.bf16.msra.mxu1 %v987_v20  ;;  %v4935_v50 = vrot.slane %v4926_v44, %v4931_v49  ;;  %v1114_v9 = vunpack.c.l.s8.bf16 %v522_v5  ;;  %v1116_v10 = vunpack.c.l.s8.bf16 %v524_v6  ;;  %v1113_v13 = vunpack.c.l.s8.bf16 %v521_v11 }
  0xae   : > { %2042 = vmatprep.subr.bf16.mxu0 %v1002_v21  ;;  %2206 = vmatprep.subr.bf16.mxu1 %v1004_v22  ;;  %v1115_v14 = vunpack.c.l.s8.bf16 %v523_v12  ;;  %v1130_v15 = vunpack.c.h.s8.bf16 %v522_v5  ;;  %v1132_v16 = vunpack.c.h.s8.bf16 %v524_v6  ;;  %v1129_v19 = vunpack.c.h.s8.bf16 %v521_v11 }
  0xaf   : > { %v1994_v55 = vcombine.high %v4935_v50, %v4935_v50  ;;  %v1131_v20 = vunpack.c.h.s8.bf16 %v523_v12  ;;  %v1146_v21 = vunpack.c.l.s8.bf16 %v538_v17  ;;  %v1148_v22 = vunpack.c.l.s8.bf16 %v540_v18 }
  0xb0   : > { %v1161_v31 = vunpack.c.h.s8.bf16 %v537_v23  ;;  %v1179_v39 = vunpack.c.l.s8.bf16 %v555_v36  ;;  %v1194_v40 = vunpack.c.h.s8.bf16 %v554_v29  ;;  %v1196_v41 = vunpack.c.h.s8.bf16 %v556_v30 }
  0xb1   : > { %2043 = vmatpush1.bf16.msra.mxu0 %v1001_v25  ;;  %2207 = vmatpush1.bf16.msra.mxu1 %v1003_v26  ;;  %v4942_v58 = vrot.slane %v1994_v55, %v4931_v49  ;;  %v1145_v25 = vunpack.c.l.s8.bf16 %v537_v23  ;;  %v1147_v26 = vunpack.c.l.s8.bf16 %v539_v24 }
  0xb2   : > { %2044 = vmatprep.subr.bf16.mxu0 %v1018_v27  ;;  %2208 = vmatprep.subr.bf16.mxu1 %v1020_v28  ;;  %v1162_v27 = vunpack.c.h.s8.bf16 %v538_v17  ;;  %v1164_v28 = vunpack.c.h.s8.bf16 %v540_v18 }
  0xb3   : > { %2068 = vmatprep.mubr.bf16.mxu0 %v4942_v58  ;;  %2232 = vmatprep.mubr.bf16.mxu1 %v4942_v58 }
  0xb5   : > { %2045 = vmatpush1.bf16.msra.mxu0 %v1017_v32  ;;  %2209 = vmatpush1.bf16.msra.mxu1 %v1019_v33  ;;  %v1163_v32 = vunpack.c.h.s8.bf16 %v539_v24  ;;  %v1178_v33 = vunpack.c.l.s8.bf16 %v554_v29 }
  0xb6   : > { %2046 = vmatprep.subr.bf16.mxu0 %v1034_v34  ;;  %2210 = vmatprep.subr.bf16.mxu1 %v1036_v35  ;;  %v1180_v34 = vunpack.c.l.s8.bf16 %v556_v30  ;;  %v553_v35 = vld [vmem:[%s4877_s1 + $0x380] sm:$0xff] }
  0xb7   : > { %v1177_v37 = vunpack.c.l.s8.bf16 %v553_v35 }
  0xb9   : > { %2047 = vmatpush1.bf16.msra.mxu0 %v1033_v42  ;;  %2211 = vmatpush1.bf16.msra.mxu1 %v1035_v43  ;;  %v570_v42 = vld [vmem:[%s4877_s1 + $0x408] sm:$0xff]  ;;  %v572_v43 = vld [vmem:[%s4877_s1 + $0x418] sm:$0xff] }
  0xba   : > { %2048 = vmatprep.subr.bf16.mxu0 %v1050_v45  ;;  %2212 = vmatprep.subr.bf16.mxu1 %v1052_v46  ;;  %v1193_v45 = vunpack.c.h.s8.bf16 %v553_v35  ;;  %v1195_v46 = vunpack.c.h.s8.bf16 %v555_v36  ;;  %v1210_v47 = vunpack.c.l.s8.bf16 %v570_v42  ;;  %v1212_v48 = vunpack.c.l.s8.bf16 %v572_v43 }
  0xbb   : > { %v1226_v56 = vunpack.c.h.s8.bf16 %v570_v42  ;;  %v1228_v57 = vunpack.c.h.s8.bf16 %v572_v43 }
  0xbd   : > { %2049 = vmatpush1.bf16.msra.mxu0 %v1049_v51  ;;  %2213 = vmatpush1.bf16.msra.mxu1 %v1051_v52  ;;  %v569_v51 = vld [vmem:[%s4877_s1 + $0x400] sm:$0xff]  ;;  %v571_v52 = vld [vmem:[%s4877_s1 + $0x410] sm:$0xff] }
  0xbe   : > { %2050 = vmatprep.subr.bf16.mxu0 %v1066_v53  ;;  %2214 = vmatprep.subr.bf16.mxu1 %v1068_v54  ;;  %v4966_v53 = vrot.slane %v4935_v50, %v4931_v49  ;;  %v1209_v54 = vunpack.c.l.s8.bf16 %v569_v51  ;;  %v1211_v55 = vunpack.c.l.s8.bf16 %v571_v52  ;;  %v1225_v50 = vunpack.c.h.s8.bf16 %v569_v51 }
  0xc1   : > { %2051 = vmatpush1.bf16.msra.mxu0 %v1065_v59  ;;  %2215 = vmatpush1.bf16.msra.mxu1 %v1067_v60  ;;  %v586_v59 = vld [vmem:[%s4877_s1 + $0x488] sm:$0xff]  ;;  %v588_v60 = vld [vmem:[%s4877_s1 + $0x498] sm:$0xff] }
  0xc2   : > { %2052 = vmatprep.subr.bf16.mxu0 %v1082_v61  ;;  %2216 = vmatprep.subr.bf16.mxu1 %v1084_v62  ;;  %v4972_v61 = vcombine.high %v4942_v58, %v4942_v58  ;;  %v1227_v62 = vunpack.c.h.s8.bf16 %v571_v52  ;;  %v1242_v63 = vunpack.c.l.s8.bf16 %v586_v59  ;;  %v1244_v0 = vunpack.c.l.s8.bf16 %v588_v60 }
  0xc3   : > { %v1258_v5 = vunpack.c.h.s8.bf16 %v586_v59  ;;  %v1260_v6 = vunpack.c.h.s8.bf16 %v588_v60 }
  0xc5   : > { %2053 = vmatpush1.bf16.msra.mxu0 %v1081_v1  ;;  %2217 = vmatpush1.bf16.msra.mxu1 %v1083_v2  ;;  %v585_v1 = vld [vmem:[%s4877_s1 + $0x480] sm:$0xff]  ;;  %v587_v2 = vld [vmem:[%s4877_s1 + $0x490] sm:$0xff] }
  0xc6   : > { %2054 = vmatprep.subr.bf16.mxu0 %v1098_v3  ;;  %2218 = vmatprep.subr.bf16.mxu1 %v1100_v4  ;;  %v1241_v3 = vunpack.c.l.s8.bf16 %v585_v1  ;;  %v1243_v4 = vunpack.c.l.s8.bf16 %v587_v2 }
  0xc9   : > { %2055 = vmatpush1.bf16.msra.mxu0 %v1097_v7  ;;  %2219 = vmatpush1.bf16.msra.mxu1 %v1099_v8  ;;  %v602_v7 = vld [vmem:[%s4877_s1 + $0x508] sm:$0xff]  ;;  %v604_v8 = vld [vmem:[%s4877_s1 + $0x518] sm:$0xff] }
  0xca   : > { %2056 = vmatprep.subr.bf16.mxu0 %v1114_v9  ;;  %2220 = vmatprep.subr.bf16.mxu1 %v1116_v10  ;;  %v1257_v9 = vunpack.c.h.s8.bf16 %v585_v1  ;;  %v1259_v10 = vunpack.c.h.s8.bf16 %v587_v2  ;;  %v1274_v11 = vunpack.c.l.s8.bf16 %v602_v7  ;;  %v1276_v12 = vunpack.c.l.s8.bf16 %v604_v8 }
  0xcb   : > { %v1290_v17 = vunpack.c.h.s8.bf16 %v602_v7  ;;  %v1292_v18 = vunpack.c.h.s8.bf16 %v604_v8 }
  0xcd   : > { %2057 = vmatpush1.bf16.msra.mxu0 %v1113_v13  ;;  %2221 = vmatpush1.bf16.msra.mxu1 %v1115_v14  ;;  %v601_v13 = vld [vmem:[%s4877_s1 + $0x500] sm:$0xff]  ;;  %v603_v14 = vld [vmem:[%s4877_s1 + $0x510] sm:$0xff] }
  0xce   : > { %2058 = vmatprep.subr.bf16.mxu0 %v1130_v15  ;;  %2222 = vmatprep.subr.bf16.mxu1 %v1132_v16  ;;  %v1273_v15 = vunpack.c.l.s8.bf16 %v601_v13  ;;  %v1275_v16 = vunpack.c.l.s8.bf16 %v603_v14 }
  0xd1   : > { %2059 = vmatpush1.bf16.msra.mxu0 %v1129_v19  ;;  %2223 = vmatpush1.bf16.msra.mxu1 %v1131_v20  ;;  %v618_v19 = vld [vmem:[%s4877_s1 + $0x588] sm:$0xff]  ;;  %v620_v20 = vld [vmem:[%s4877_s1 + $0x598] sm:$0xff] }
  0xd2   : > { %2060 = vmatprep.subr.bf16.mxu0 %v1146_v21  ;;  %2224 = vmatprep.subr.bf16.mxu1 %v1148_v22  ;;  %v1289_v21 = vunpack.c.h.s8.bf16 %v601_v13  ;;  %v1291_v22 = vunpack.c.h.s8.bf16 %v603_v14  ;;  %v1306_v23 = vunpack.c.l.s8.bf16 %v618_v19  ;;  %v1308_v24 = vunpack.c.l.s8.bf16 %v620_v20 }
  0xd3   : > { %v1322_v29 = vunpack.c.h.s8.bf16 %v618_v19  ;;  %v1324_v30 = vunpack.c.h.s8.bf16 %v620_v20 }
  0xd5   : > { %2061 = vmatpush1.bf16.msra.mxu0 %v1145_v25  ;;  %2225 = vmatpush1.bf16.msra.mxu1 %v1147_v26  ;;  %v617_v25 = vld [vmem:[%s4877_s1 + $0x580] sm:$0xff]  ;;  %v619_v26 = vld [vmem:[%s4877_s1 + $0x590] sm:$0xff] }
  0xd6   : > { %2062 = vmatprep.subr.bf16.mxu0 %v1162_v27  ;;  %2226 = vmatprep.subr.bf16.mxu1 %v1164_v28  ;;  %v1305_v27 = vunpack.c.l.s8.bf16 %v617_v25  ;;  %v1307_v28 = vunpack.c.l.s8.bf16 %v619_v26 }
  0xd9   : > { %2063 = vmatpush1.bf16.msra.mxu0 %v1161_v31  ;;  %2227 = vmatpush1.bf16.msra.mxu1 %v1163_v32  ;;  %v634_v31 = vld [vmem:[%s4877_s1 + $0x608] sm:$0xff]  ;;  %v636_v32 = vld [vmem:[%s4877_s1 + $0x618] sm:$0xff] }
  0xda   : > { %2064 = vmatprep.subr.bf16.mxu0 %v1178_v33  ;;  %2228 = vmatprep.subr.bf16.mxu1 %v1180_v34  ;;  %v1321_v33 = vunpack.c.h.s8.bf16 %v617_v25  ;;  %v1323_v34 = vunpack.c.h.s8.bf16 %v619_v26  ;;  %v1338_v35 = vunpack.c.l.s8.bf16 %v634_v31  ;;  %v1340_v36 = vunpack.c.l.s8.bf16 %v636_v32 }
  0xdb   : > { %v1354_v42 = vunpack.c.h.s8.bf16 %v634_v31  ;;  %v1356_v43 = vunpack.c.h.s8.bf16 %v636_v32  ;;  %v5017_v31 = vcombine.high %v4966_v53, %v4966_v53 }
  0xdd   : > { %2065 = vmatpush1.bf16.msra.mxu0 %v1177_v37  ;;  %2229 = vmatpush1.bf16.msra.mxu1 %v1179_v39  ;;  %v633_v37 = vld [vmem:[%s4877_s1 + $0x600] sm:$0xff]  ;;  %v635_v39 = vld [vmem:[%s4877_s1 + $0x610] sm:$0xff] }
  0xde   : > { %2066 = vmatprep.subr.bf16.mxu0 %v1194_v40  ;;  %2230 = vmatprep.subr.bf16.mxu1 %v1196_v41  ;;  %v1337_v40 = vunpack.c.l.s8.bf16 %v633_v37  ;;  %v1339_v41 = vunpack.c.l.s8.bf16 %v635_v39 }
  0xe1   : > { %2067 = vmatpush1.bf16.msra.mxu0 %v1193_v45  ;;  %2231 = vmatpush1.bf16.msra.mxu1 %v1195_v46  ;;  %v650_v45 = vld [vmem:[%s4877_s1 + $0x688] sm:$0xff]  ;;  %v652_v46 = vld [vmem:[%s4877_s1 + $0x698] sm:$0xff] }
  0xe2   : > { %2077 = vmatprep.subr.bf16.mxu0 %v1210_v47  ;;  %2241 = vmatprep.subr.bf16.mxu1 %v1212_v48  ;;  %v1353_v47 = vunpack.c.h.s8.bf16 %v633_v37  ;;  %v1355_v48 = vunpack.c.h.s8.bf16 %v635_v39  ;;  %v1370_v51 = vunpack.c.l.s8.bf16 %v650_v45  ;;  %v1372_v52 = vunpack.c.l.s8.bf16 %v652_v46  ;;  %v716_v37 = vld [vmem:[%s4877_s1 + $0x898] sm:$0xff] }
  0xe3   : > { %v1386_v59 = vunpack.c.h.s8.bf16 %v650_v45  ;;  %v1388_v60 = vunpack.c.h.s8.bf16 %v652_v46  ;;  %v713_v45 = vld [vmem:[%s4877_s1 + $0x880] sm:$0xff]  ;;  %v715_v46 = vld [vmem:[%s4877_s1 + $0x890] sm:$0xff] }
  0xe4   : > { %2069 = vmatmul.mubr.bf16.vlgmr.msra.gmra.mrb[0].mxu0 %v4966_v53  ;;  %2233 = vmatmul.mubr.bf16.vlgmr.msra.gmra.mrb[0].mxu1 %v4966_v53 }
  0xe5   : > { %2078 = vmatpush1.bf16.msra.mxu0 %v1209_v54  ;;  %2242 = vmatpush1.bf16.msra.mxu1 %v1211_v55  ;;  %v649_v54 = vld [vmem:[%s4877_s1 + $0x680] sm:$0xff]  ;;  %v651_v55 = vld [vmem:[%s4877_s1 + $0x690] sm:$0xff] }
  0xe6   : > { %2079 = vmatprep.subr.bf16.mxu0 %v1226_v56  ;;  %2243 = vmatprep.subr.bf16.mxu1 %v1228_v57  ;;  %v1369_v56 = vunpack.c.l.s8.bf16 %v649_v54  ;;  %v1371_v57 = vunpack.c.l.s8.bf16 %v651_v55 }
  0xe7   : > { %2109 = vmatprep.mubr.bf16.mxu0 %v4972_v61  ;;  %2273 = vmatprep.mubr.bf16.mxu1 %v4972_v61 }
  0xe9   : > { %2080 = vmatpush1.bf16.msra.mxu0 %v1225_v50  ;;  %2244 = vmatpush1.bf16.msra.mxu1 %v1227_v62  ;;  %v666_v50 = vld [vmem:[%s4877_s1 + $0x708] sm:$0xff]  ;;  %v668_v62 = vld [vmem:[%s4877_s1 + $0x718] sm:$0xff] }
  0xea   : > { %2081 = vmatprep.subr.bf16.mxu0 %v1242_v63  ;;  %2245 = vmatprep.subr.bf16.mxu1 %v1244_v0  ;;  %v1385_v63 = vunpack.c.h.s8.bf16 %v649_v54  ;;  %v1387_v0 = vunpack.c.h.s8.bf16 %v651_v55  ;;  %v1402_v1 = vunpack.c.l.s8.bf16 %v666_v50  ;;  %v1404_v2 = vunpack.c.l.s8.bf16 %v668_v62  ;;  %v730_v54 = vld [vmem:[%s4877_s1 + $0x908] sm:$0xff]  ;;  %v732_v55 = vld [vmem:[%s4877_s1 + $0x918] sm:$0xff] }
  0xeb   : > { %v1418_v7 = vunpack.c.h.s8.bf16 %v666_v50  ;;  %v1420_v8 = vunpack.c.h.s8.bf16 %v668_v62  ;;  %v729_v50 = vld [vmem:[%s4877_s1 + $0x900] sm:$0xff]  ;;  %v731_v62 = vld [vmem:[%s4877_s1 + $0x910] sm:$0xff] }
  0xed   : > { %2082 = vmatpush1.bf16.msra.mxu0 %v1241_v3  ;;  %2246 = vmatpush1.bf16.msra.mxu1 %v1243_v4  ;;  %v665_v3 = vld [vmem:[%s4877_s1 + $0x700] sm:$0xff]  ;;  %v667_v4 = vld [vmem:[%s4877_s1 + $0x710] sm:$0xff] }
  0xee   : > { %2083 = vmatprep.subr.bf16.mxu0 %v1258_v5  ;;  %2247 = vmatprep.subr.bf16.mxu1 %v1260_v6  ;;  %v1401_v5 = vunpack.c.l.s8.bf16 %v665_v3  ;;  %v1403_v6 = vunpack.c.l.s8.bf16 %v667_v4 }
  0xf1   : > { %2084 = vmatpush1.bf16.msra.mxu0 %v1257_v9  ;;  %2248 = vmatpush1.bf16.msra.mxu1 %v1259_v10  ;;  %v682_v9 = vld [vmem:[%s4877_s1 + $0x788] sm:$0xff]  ;;  %v684_v10 = vld [vmem:[%s4877_s1 + $0x798] sm:$0xff] }
  0xf2   : > { %2085 = vmatprep.subr.bf16.mxu0 %v1274_v11  ;;  %2249 = vmatprep.subr.bf16.mxu1 %v1276_v12  ;;  %v1417_v11 = vunpack.c.h.s8.bf16 %v665_v3  ;;  %v1419_v12 = vunpack.c.h.s8.bf16 %v667_v4  ;;  %v1434_v13 = vunpack.c.l.s8.bf16 %v682_v9  ;;  %v1436_v14 = vunpack.c.l.s8.bf16 %v684_v10  ;;  %v746_v3 = vld [vmem:[%s4877_s1 + $0x988] sm:$0xff]  ;;  %v748_v4 = vld [vmem:[%s4877_s1 + $0x998] sm:$0xff] }
  0xf3   : > { %v1450_v20 = vunpack.c.h.s8.bf16 %v682_v9  ;;  %v745_v9 = vld [vmem:[%s4877_s1 + $0x980] sm:$0xff] }
  0xf5   : > { %2086 = vmatpush1.bf16.msra.mxu0 %v1273_v15  ;;  %2250 = vmatpush1.bf16.msra.mxu1 %v1275_v16  ;;  %v681_v15 = vld [vmem:[%s4877_s1 + $0x780] sm:$0xff]  ;;  %v683_v16 = vld [vmem:[%s4877_s1 + $0x790] sm:$0xff] }
  0xf6   : > { %2087 = vmatprep.subr.bf16.mxu0 %v1290_v17  ;;  %2251 = vmatprep.subr.bf16.mxu1 %v1292_v18  ;;  %v1979_v17 = vcombine.high %v4926_v44, %v4926_v44  ;;  %v1433_v18 = vunpack.c.l.s8.bf16 %v681_v15  ;;  %v1435_v19 = vunpack.c.l.s8.bf16 %v683_v16  ;;  %v1449_v25 = vunpack.c.h.s8.bf16 %v681_v15  ;;  %v762_v15 = vld [vmem:[%s4877_s1 + $0xa08] sm:$0xff] }
  0xf7   : > { %v1451_v26 = vunpack.c.h.s8.bf16 %v683_v16  ;;  %v764_v16 = vld [vmem:[%s4877_s1 + $0xa18] sm:$0xff] }
  0xf9   : > { %2088 = vmatpush1.bf16.msra.mxu0 %v1289_v21  ;;  %2252 = vmatpush1.bf16.msra.mxu1 %v1291_v22  ;;  %v1452_v21 = vunpack.c.h.s8.bf16 %v684_v10  ;;  %v698_v22 = vld [vmem:[%s4877_s1 + $0x808] sm:$0xff]  ;;  %v747_v10 = vld [vmem:[%s4877_s1 + $0x990] sm:$0xff] }
  0xfa   : > { %2089 = vmatprep.subr.bf16.mxu0 %v1306_v23  ;;  %2253 = vmatprep.subr.bf16.mxu1 %v1308_v24  ;;  %v700_v23 = vld [vmem:[%s4877_s1 + $0x818] sm:$0xff]  ;;  %v5009_v24 = vrot.slane %v1979_v17, %v4931_v49  ;;  %v1466_v44 = vunpack.c.l.s8.bf16 %v698_v22  ;;  %v1577_v17 = vunpack.c.h.s8.bf16 %v745_v9 }
  0xfd   : > { %2090 = vmatpush1.bf16.msra.mxu0 %v1305_v27  ;;  %2254 = vmatpush1.bf16.msra.mxu1 %v1307_v28  ;;  %v1468_v27 = vunpack.c.l.s8.bf16 %v700_v23  ;;  %v697_v28 = vld [vmem:[%s4877_s1 + $0x800] sm:$0xff] }
  0xfe   : > { %2091 = vmatprep.subr.bf16.mxu0 %v1322_v29  ;;  %2255 = vmatprep.subr.bf16.mxu1 %v1324_v30  ;;  %v699_v29 = vld [vmem:[%s4877_s1 + $0x810] sm:$0xff]  ;;  %v1995_v30 = vcombine.high %v5009_v24, %v5009_v24  ;;  %v1465_v32 = vunpack.c.l.s8.bf16 %v697_v28 }
 0x100   : > { %v5022_v39 = vrot.slane %v1995_v30, %v4931_v49 }
 0x101   : > { %2092 = vmatpush1.bf16.msra.mxu0 %v1321_v33  ;;  %2256 = vmatpush1.bf16.msra.mxu1 %v1323_v34  ;;  %v1467_v33 = vunpack.c.l.s8.bf16 %v699_v29  ;;  %v1482_v34 = vunpack.c.h.s8.bf16 %v698_v22  ;;  %v763_v22 = vld [vmem:[%s4877_s1 + $0xa10] sm:$0xff] }
 0x102   : > { %2093 = vmatprep.subr.bf16.mxu0 %v1338_v35  ;;  %2257 = vmatprep.subr.bf16.mxu1 %v1340_v36  ;;  %v1484_v35 = vunpack.c.h.s8.bf16 %v700_v23  ;;  %v714_v36 = vld [vmem:[%s4877_s1 + $0x888] sm:$0xff]  ;;  %v1611_v30 = vunpack.c.h.s8.bf16 %v763_v22 }
 0x105   : > { %2094 = vmatpush1.bf16.msra.mxu0 %v1337_v40  ;;  %2258 = vmatpush1.bf16.msra.mxu1 %v1339_v41  ;;  %v1481_v40 = vunpack.c.h.s8.bf16 %v697_v28  ;;  %v1483_v41 = vunpack.c.h.s8.bf16 %v699_v29  ;;  %v780_v28 = vld [vmem:[%s4877_s1 + $0xa98] sm:$0xff] }
 0x106   : > { %2095 = vmatprep.subr.bf16.mxu0 %v1354_v42  ;;  %2259 = vmatprep.subr.bf16.mxu1 %v1356_v43  ;;  %v1498_v42 = vunpack.c.l.s8.bf16 %v714_v36  ;;  %v1500_v43 = vunpack.c.l.s8.bf16 %v716_v37 }
 0x109   : > { %2096 = vmatpush1.bf16.msra.mxu0 %v1353_v47  ;;  %2260 = vmatpush1.bf16.msra.mxu1 %v1355_v48  ;;  %v1497_v47 = vunpack.c.l.s8.bf16 %v713_v45  ;;  %v1499_v48 = vunpack.c.l.s8.bf16 %v715_v46 }
 0x10a   : > { %2097 = vmatprep.subr.bf16.mxu0 %v1370_v51  ;;  %2261 = vmatprep.subr.bf16.mxu1 %v1372_v52  ;;  %v1514_v51 = vunpack.c.h.s8.bf16 %v714_v36  ;;  %v1516_v52 = vunpack.c.h.s8.bf16 %v716_v37 }
 0x10d   : > { %2098 = vmatpush1.bf16.msra.mxu0 %v1369_v56  ;;  %2262 = vmatpush1.bf16.msra.mxu1 %v1371_v57  ;;  %v1513_v56 = vunpack.c.h.s8.bf16 %v713_v45  ;;  %v1515_v57 = vunpack.c.h.s8.bf16 %v715_v46 }
 0x10e   : > { %2099 = vmatprep.subr.bf16.mxu0 %v1386_v59  ;;  %2263 = vmatprep.subr.bf16.mxu1 %v1388_v60  ;;  %v1530_v59 = vunpack.c.l.s8.bf16 %v730_v54  ;;  %v1532_v60 = vunpack.c.l.s8.bf16 %v732_v55 }
 0x111   : > { %2100 = vmatpush1.bf16.msra.mxu0 %v1385_v63  ;;  %2264 = vmatpush1.bf16.msra.mxu1 %v1387_v0  ;;  %v1529_v63 = vunpack.c.l.s8.bf16 %v729_v50  ;;  %v1531_v0 = vunpack.c.l.s8.bf16 %v731_v62 }
 0x112   : > { %2101 = vmatprep.subr.bf16.mxu0 %v1402_v1  ;;  %2265 = vmatprep.subr.bf16.mxu1 %v1404_v2  ;;  %v1546_v1 = vunpack.c.h.s8.bf16 %v730_v54  ;;  %v1548_v2 = vunpack.c.h.s8.bf16 %v732_v55 }
 0x115   : > { %2102 = vmatpush1.bf16.msra.mxu0 %v1401_v5  ;;  %2266 = vmatpush1.bf16.msra.mxu1 %v1403_v6  ;;  %v1545_v5 = vunpack.c.h.s8.bf16 %v729_v50  ;;  %v1547_v6 = vunpack.c.h.s8.bf16 %v731_v62 }
 0x116   : > { %2103 = vmatprep.subr.bf16.mxu0 %v1418_v7  ;;  %2267 = vmatprep.subr.bf16.mxu1 %v1420_v8  ;;  %v1562_v7 = vunpack.c.l.s8.bf16 %v746_v3  ;;  %v1564_v8 = vunpack.c.l.s8.bf16 %v748_v4 }
 0x119   : > { %2104 = vmatpush1.bf16.msra.mxu0 %v1417_v11  ;;  %2268 = vmatpush1.bf16.msra.mxu1 %v1419_v12  ;;  %v1561_v11 = vunpack.c.l.s8.bf16 %v745_v9  ;;  %v1563_v12 = vunpack.c.l.s8.bf16 %v747_v10 }
 0x11a   : > { %2105 = vmatprep.subr.bf16.mxu0 %v1434_v13  ;;  %2269 = vmatprep.subr.bf16.mxu1 %v1436_v14  ;;  %v1578_v13 = vunpack.c.h.s8.bf16 %v746_v3  ;;  %v1580_v14 = vunpack.c.h.s8.bf16 %v748_v4 }
 0x11d   : > { %2106 = vmatpush1.bf16.msra.mxu0 %v1433_v18  ;;  %2270 = vmatpush1.bf16.msra.mxu1 %v1435_v19  ;;  %v1579_v18 = vunpack.c.h.s8.bf16 %v747_v10  ;;  %v1594_v19 = vunpack.c.l.s8.bf16 %v762_v15 }
 0x11e   : > { %2107 = vmatprep.subr.bf16.mxu0 %v1450_v20  ;;  %2271 = vmatprep.subr.bf16.mxu1 %v1452_v21  ;;  %v1596_v20 = vunpack.c.l.s8.bf16 %v764_v16  ;;  %v761_v21 = vld [vmem:[%s4877_s1 + $0xa00] sm:$0xff] }
 0x11f   : > { %v1593_v23 = vunpack.c.l.s8.bf16 %v761_v21  ;;  %v1609_v29 = vunpack.c.h.s8.bf16 %v761_v21  ;;  %v844_v21 = vld [vmem:[%s4877_s1 + $0xc98] sm:$0xff] }
 0x121   : > { %2108 = vmatpush1.bf16.msra.mxu0 %v1449_v25  ;;  %2272 = vmatpush1.bf16.msra.mxu1 %v1451_v26  ;;  %v1595_v25 = vunpack.c.l.s8.bf16 %v763_v22  ;;  %v1610_v26 = vunpack.c.h.s8.bf16 %v762_v15  ;;  %v5060_v15 = vrot.slane %v5009_v24, %v4931_v49  ;;  %v5066_v22 = vcombine.high %v5022_v39, %v5022_v39 }
 0x122   : > { %2118 = vmatprep.subr.bf16.mxu0 %v1466_v44  ;;  %2282 = vmatprep.subr.bf16.mxu1 %v1468_v27  ;;  %v1612_v44 = vunpack.c.h.s8.bf16 %v764_v16  ;;  %v778_v27 = vld [vmem:[%s4877_s1 + $0xa88] sm:$0xff] }
 0x124   : > { %2110 = vmatmul.mubr.bf16.vlgmr.msra.gmra.mrb[0].mxu0 %v5017_v31  ;;  %2274 = vmatmul.mubr.bf16.vlgmr.msra.gmra.mrb[0].mxu1 %v5017_v31 }
 0x125   : > { %2119 = vmatpush1.bf16.msra.mxu0 %v1465_v32  ;;  %2283 = vmatpush1.bf16.msra.mxu1 %v1467_v33  ;;  %v1626_v32 = vunpack.c.l.s8.bf16 %v778_v27  ;;  %v1628_v33 = vunpack.c.l.s8.bf16 %v780_v28 }
 0x126   : > { %2120 = vmatprep.subr.bf16.mxu0 %v1482_v34  ;;  %2284 = vmatprep.subr.bf16.mxu1 %v1484_v35  ;;  %v777_v34 = vld [vmem:[%s4877_s1 + $0xa80] sm:$0xff]  ;;  %v779_v35 = vld [vmem:[%s4877_s1 + $0xa90] sm:$0xff] }
 0x127   : > { %2150 = vmatprep.mubr.bf16.mxu0 %v5022_v39  ;;  %2314 = vmatprep.mubr.bf16.mxu1 %v5022_v39  ;;  %v1625_v36 = vunpack.c.l.s8.bf16 %v777_v34  ;;  %v1627_v37 = vunpack.c.l.s8.bf16 %v779_v35  ;;  %v1641_v45 = vunpack.c.h.s8.bf16 %v777_v34  ;;  %v1643_v46 = vunpack.c.h.s8.bf16 %v779_v35  ;;  %v860_v34 = vld [vmem:[%s4877_s1 + $0xd18] sm:$0xff] }
 0x129   : > { %2121 = vmatpush1.bf16.msra.mxu0 %v1481_v40  ;;  %2285 = vmatpush1.bf16.msra.mxu1 %v1483_v41  ;;  %v1642_v40 = vunpack.c.h.s8.bf16 %v778_v27  ;;  %v1644_v41 = vunpack.c.h.s8.bf16 %v780_v28  ;;  %v843_v27 = vld [vmem:[%s4877_s1 + $0xc90] sm:$0xff] }
 0x12a   : > { %2122 = vmatprep.subr.bf16.mxu0 %v1498_v42  ;;  %2286 = vmatprep.subr.bf16.mxu1 %v1500_v43  ;;  %v794_v42 = vld [vmem:[%s4877_s1 + $0xb08] sm:$0xff]  ;;  %v796_v43 = vld [vmem:[%s4877_s1 + $0xb18] sm:$0xff] }
 0x12d   : > { %2123 = vmatpush1.bf16.msra.mxu0 %v1497_v47  ;;  %2287 = vmatpush1.bf16.msra.mxu1 %v1499_v48  ;;  %v1658_v47 = vunpack.c.l.s8.bf16 %v794_v42  ;;  %v1660_v48 = vunpack.c.l.s8.bf16 %v796_v43 }
 0x12e   : > { %2124 = vmatprep.subr.bf16.mxu0 %v1514_v51  ;;  %2288 = vmatprep.subr.bf16.mxu1 %v1516_v52  ;;  %v793_v51 = vld [vmem:[%s4877_s1 + $0xb00] sm:$0xff]  ;;  %v795_v52 = vld [vmem:[%s4877_s1 + $0xb10] sm:$0xff] }
 0x12f   : > { %v1657_v54 = vunpack.c.l.s8.bf16 %v793_v51  ;;  %v1659_v55 = vunpack.c.l.s8.bf16 %v795_v52  ;;  %v1673_v50 = vunpack.c.h.s8.bf16 %v793_v51  ;;  %v1675_v62 = vunpack.c.h.s8.bf16 %v795_v52  ;;  %v876_v51 = vld [vmem:[%s4877_s1 + $0xd98] sm:$0xff] }
 0x131   : > { %2125 = vmatpush1.bf16.msra.mxu0 %v1513_v56  ;;  %2289 = vmatpush1.bf16.msra.mxu1 %v1515_v57  ;;  %v1674_v56 = vunpack.c.h.s8.bf16 %v794_v42  ;;  %v1676_v57 = vunpack.c.h.s8.bf16 %v796_v43  ;;  %v859_v42 = vld [vmem:[%s4877_s1 + $0xd10] sm:$0xff] }
 0x132   : > { %2126 = vmatprep.subr.bf16.mxu0 %v1530_v59  ;;  %2290 = vmatprep.subr.bf16.mxu1 %v1532_v60  ;;  %v810_v59 = vld [vmem:[%s4877_s1 + $0xb88] sm:$0xff]  ;;  %v812_v60 = vld [vmem:[%s4877_s1 + $0xb98] sm:$0xff] }
 0x135   : > { %2127 = vmatpush1.bf16.msra.mxu0 %v1529_v63  ;;  %2291 = vmatpush1.bf16.msra.mxu1 %v1531_v0  ;;  %v1690_v63 = vunpack.c.l.s8.bf16 %v810_v59  ;;  %v1692_v0 = vunpack.c.l.s8.bf16 %v812_v60 }
 0x136   : > { %2128 = vmatprep.subr.bf16.mxu0 %v1546_v1  ;;  %2292 = vmatprep.subr.bf16.mxu1 %v1548_v2  ;;  %v809_v1 = vld [vmem:[%s4877_s1 + $0xb80] sm:$0xff]  ;;  %v811_v2 = vld [vmem:[%s4877_s1 + $0xb90] sm:$0xff] }
 0x137   : > { %v1689_v3 = vunpack.c.l.s8.bf16 %v809_v1  ;;  %v1691_v4 = vunpack.c.l.s8.bf16 %v811_v2  ;;  %v1705_v9 = vunpack.c.h.s8.bf16 %v809_v1  ;;  %v1707_v10 = vunpack.c.h.s8.bf16 %v811_v2  ;;  %v892_v1 = vld [vmem:[%s4877_s1 + $0xe18] sm:$0xff] }
 0x139   : > { %2129 = vmatpush1.bf16.msra.mxu0 %v1545_v5  ;;  %2293 = vmatpush1.bf16.msra.mxu1 %v1547_v6  ;;  %v1706_v5 = vunpack.c.h.s8.bf16 %v810_v59  ;;  %v1708_v6 = vunpack.c.h.s8.bf16 %v812_v60  ;;  %v875_v59 = vld [vmem:[%s4877_s1 + $0xd90] sm:$0xff] }
 0x13a   : > { %2130 = vmatprep.subr.bf16.mxu0 %v1562_v7  ;;  %2294 = vmatprep.subr.bf16.mxu1 %v1564_v8  ;;  %v826_v7 = vld [vmem:[%s4877_s1 + $0xc08] sm:$0xff]  ;;  %v828_v8 = vld [vmem:[%s4877_s1 + $0xc18] sm:$0xff] }
 0x13d   : > { %2131 = vmatpush1.bf16.msra.mxu0 %v1561_v11  ;;  %2295 = vmatpush1.bf16.msra.mxu1 %v1563_v12  ;;  %v1722_v11 = vunpack.c.l.s8.bf16 %v826_v7  ;;  %v1724_v12 = vunpack.c.l.s8.bf16 %v828_v8 }
 0x13e   : > { %2132 = vmatprep.subr.bf16.mxu0 %v1578_v13  ;;  %2296 = vmatprep.subr.bf16.mxu1 %v1580_v14  ;;  %v825_v13 = vld [vmem:[%s4877_s1 + $0xc00] sm:$0xff]  ;;  %v827_v14 = vld [vmem:[%s4877_s1 + $0xc10] sm:$0xff] }
 0x13f   : > { %v1721_v16 = vunpack.c.l.s8.bf16 %v825_v13  ;;  %v1737_v24 = vunpack.c.h.s8.bf16 %v825_v13  ;;  %v908_v13 = vld [vmem:[%s4877_s1 + $0xe98] sm:$0xff] }
 0x141   : > { %2133 = vmatpush1.bf16.msra.mxu0 %v1577_v17  ;;  %2297 = vmatpush1.bf16.msra.mxu1 %v1579_v18  ;;  %v1723_v17 = vunpack.c.l.s8.bf16 %v827_v14  ;;  %v1738_v18 = vunpack.c.h.s8.bf16 %v826_v7  ;;  %v891_v7 = vld [vmem:[%s4877_s1 + $0xe10] sm:$0xff] }
 0x142   : > { %2134 = vmatprep.subr.bf16.mxu0 %v1594_v19  ;;  %2298 = vmatprep.subr.bf16.mxu1 %v1596_v20  ;;  %v1740_v19 = vunpack.c.h.s8.bf16 %v828_v8  ;;  %v842_v20 = vld [vmem:[%s4877_s1 + $0xc88] sm:$0xff] }
 0x145   : > { %2135 = vmatpush1.bf16.msra.mxu0 %v1593_v23  ;;  %2299 = vmatpush1.bf16.msra.mxu1 %v1595_v25  ;;  %v1739_v23 = vunpack.c.h.s8.bf16 %v827_v14  ;;  %v1754_v25 = vunpack.c.l.s8.bf16 %v842_v20 }
 0x146   : > { %2136 = vmatprep.subr.bf16.mxu0 %v1610_v26  ;;  %2300 = vmatprep.subr.bf16.mxu1 %v1612_v44  ;;  %v1756_v26 = vunpack.c.l.s8.bf16 %v844_v21  ;;  %v841_v44 = vld [vmem:[%s4877_s1 + $0xc80] sm:$0xff] }
 0x147   : > { %v1753_v28 = vunpack.c.l.s8.bf16 %v841_v44  ;;  %v1769_v35 = vunpack.c.h.s8.bf16 %v841_v44  ;;  %v924_v44 = vld [vmem:[%s4877_s1 + $0xf18] sm:$0xff] }
 0x149   : > { %2137 = vmatpush1.bf16.msra.mxu0 %v1609_v29  ;;  %2301 = vmatpush1.bf16.msra.mxu1 %v1611_v30  ;;  %v1755_v29 = vunpack.c.l.s8.bf16 %v843_v27  ;;  %v1770_v30 = vunpack.c.h.s8.bf16 %v842_v20  ;;  %v907_v20 = vld [vmem:[%s4877_s1 + $0xe90] sm:$0xff] }
 0x14a   : > { %2138 = vmatprep.subr.bf16.mxu0 %v1626_v32  ;;  %2302 = vmatprep.subr.bf16.mxu1 %v1628_v33  ;;  %v1772_v32 = vunpack.c.h.s8.bf16 %v844_v21  ;;  %v858_v33 = vld [vmem:[%s4877_s1 + $0xd08] sm:$0xff] }
 0x14d   : > { %2139 = vmatpush1.bf16.msra.mxu0 %v1625_v36  ;;  %2303 = vmatpush1.bf16.msra.mxu1 %v1627_v37  ;;  %v1771_v36 = vunpack.c.h.s8.bf16 %v843_v27  ;;  %v1786_v37 = vunpack.c.l.s8.bf16 %v858_v33 }
 0x14e   : > { %2140 = vmatprep.subr.bf16.mxu0 %v1642_v40  ;;  %2304 = vmatprep.subr.bf16.mxu1 %v1644_v41  ;;  %v1788_v40 = vunpack.c.l.s8.bf16 %v860_v34  ;;  %v857_v41 = vld [vmem:[%s4877_s1 + $0xd00] sm:$0xff] }
 0x14f   : > { %v1785_v43 = vunpack.c.l.s8.bf16 %v857_v41  ;;  %v1801_v52 = vunpack.c.h.s8.bf16 %v857_v41  ;;  %v940_v41 = vld [vmem:[%s4877_s1 + $0xf98] sm:$0xff] }
 0x151   : > { %2141 = vmatpush1.bf16.msra.mxu0 %v1641_v45  ;;  %2305 = vmatpush1.bf16.msra.mxu1 %v1643_v46  ;;  %v1787_v45 = vunpack.c.l.s8.bf16 %v859_v42  ;;  %v1802_v46 = vunpack.c.h.s8.bf16 %v858_v33  ;;  %v923_v33 = vld [vmem:[%s4877_s1 + $0xf10] sm:$0xff] }
 0x152   : > { %2142 = vmatprep.subr.bf16.mxu0 %v1658_v47  ;;  %2306 = vmatprep.subr.bf16.mxu1 %v1660_v48  ;;  %v1804_v47 = vunpack.c.h.s8.bf16 %v860_v34  ;;  %v874_v48 = vld [vmem:[%s4877_s1 + $0xd88] sm:$0xff] }
 0x155   : > { %2143 = vmatpush1.bf16.msra.mxu0 %v1657_v54  ;;  %2307 = vmatpush1.bf16.msra.mxu1 %v1659_v55  ;;  %v1803_v54 = vunpack.c.h.s8.bf16 %v859_v42  ;;  %v1818_v55 = vunpack.c.l.s8.bf16 %v874_v48 }
 0x156   : > { %2144 = vmatprep.subr.bf16.mxu0 %v1674_v56  ;;  %2308 = vmatprep.subr.bf16.mxu1 %v1676_v57  ;;  %v1820_v56 = vunpack.c.l.s8.bf16 %v876_v51  ;;  %v873_v57 = vld [vmem:[%s4877_s1 + $0xd80] sm:$0xff] }
 0x157   : > { %v1817_v60 = vunpack.c.l.s8.bf16 %v873_v57  ;;  %v1833_v2 = vunpack.c.h.s8.bf16 %v873_v57  ;;  %v448_v57 = vld [vmem:[%s4877_s1 + $0x38] sm:$0xff] }
 0x159   : > { %2145 = vmatpush1.bf16.msra.mxu0 %v1673_v50  ;;  %2309 = vmatpush1.bf16.msra.mxu1 %v1675_v62  ;;  %v1819_v50 = vunpack.c.l.s8.bf16 %v875_v59  ;;  %v1834_v62 = vunpack.c.h.s8.bf16 %v874_v48  ;;  %v939_v48 = vld [vmem:[%s4877_s1 + $0xf90] sm:$0xff] }
 0x15a   : > { %2146 = vmatprep.subr.bf16.mxu0 %v1690_v63  ;;  %2310 = vmatprep.subr.bf16.mxu1 %v1692_v0  ;;  %v1836_v63 = vunpack.c.h.s8.bf16 %v876_v51  ;;  %v890_v0 = vld [vmem:[%s4877_s1 + $0xe08] sm:$0xff] }
 0x15d   : > { %2147 = vmatpush1.bf16.msra.mxu0 %v1689_v3  ;;  %2311 = vmatpush1.bf16.msra.mxu1 %v1691_v4  ;;  %v1835_v3 = vunpack.c.h.s8.bf16 %v875_v59  ;;  %v1850_v4 = vunpack.c.l.s8.bf16 %v890_v0 }
 0x15e   : > { %2148 = vmatprep.subr.bf16.mxu0 %v1706_v5  ;;  %2312 = vmatprep.subr.bf16.mxu1 %v1708_v6  ;;  %v1852_v5 = vunpack.c.l.s8.bf16 %v892_v1  ;;  %v889_v6 = vld [vmem:[%s4877_s1 + $0xe00] sm:$0xff] }
 0x15f   : > { %v1849_v8 = vunpack.c.l.s8.bf16 %v889_v6  ;;  %v1865_v14 = vunpack.c.h.s8.bf16 %v889_v6  ;;  %v462_v6 = vld [vmem:[%s4877_s1 + $0xa8] sm:$0xff] }
 0x161   : > { %2149 = vmatpush1.bf16.msra.mxu0 %v1705_v9  ;;  %2313 = vmatpush1.bf16.msra.mxu1 %v1707_v10  ;;  %v1851_v9 = vunpack.c.l.s8.bf16 %v891_v7  ;;  %v1866_v10 = vunpack.c.h.s8.bf16 %v890_v0  ;;  %v447_v0 = vld [vmem:[%s4877_s1 + $0x30] sm:$0xff] }
 0x162   : > { %2159 = vmatprep.subr.bf16.mxu0 %v1722_v11  ;;  %2323 = vmatprep.subr.bf16.mxu1 %v1724_v12  ;;  %v1868_v11 = vunpack.c.h.s8.bf16 %v892_v1  ;;  %v906_v12 = vld [vmem:[%s4877_s1 + $0xe88] sm:$0xff]  ;;  %v5104_v1 = vcombine.high %v5060_v15, %v5060_v15 }
 0x164   : > { %2151 = vmatmul.mubr.bf16.vlgmr.msra.gmra.mrb[0].mxu0 %v5060_v15  ;;  %2315 = vmatmul.mubr.bf16.vlgmr.msra.gmra.mrb[0].mxu1 %v5060_v15 }
 0x165   : > { %2160 = vmatpush1.bf16.msra.mxu0 %v1721_v16  ;;  %2324 = vmatpush1.bf16.msra.mxu1 %v1723_v17  ;;  %v1867_v16 = vunpack.c.h.s8.bf16 %v891_v7  ;;  %v1882_v17 = vunpack.c.l.s8.bf16 %v906_v12  ;;  %v464_v7 = vld [vmem:[%s4877_s1 + $0xb8] sm:$0xff] }
 0x166   : > { %2161 = vmatprep.subr.bf16.mxu0 %v1738_v18  ;;  %2325 = vmatprep.subr.bf16.mxu1 %v1740_v19  ;;  %v1884_v18 = vunpack.c.l.s8.bf16 %v908_v13  ;;  %v905_v19 = vld [vmem:[%s4877_s1 + $0xe80] sm:$0xff] }
 0x167   : > { %2191 = vmatprep.mubr.bf16.mxu0 %v5066_v22  ;;  %2355 = vmatprep.mubr.bf16.mxu1 %v5066_v22  ;;  %v1881_v21 = vunpack.c.l.s8.bf16 %v905_v19  ;;  %v1897_v27 = vunpack.c.h.s8.bf16 %v905_v19  ;;  %v478_v19 = vld [vmem:[%s4877_s1 + $0x128] sm:$0xff] }
 0x169   : > { %2162 = vmatpush1.bf16.msra.mxu0 %v1737_v24  ;;  %2326 = vmatpush1.bf16.msra.mxu1 %v1739_v23  ;;  %v1883_v24 = vunpack.c.l.s8.bf16 %v907_v20  ;;  %v1898_v23 = vunpack.c.h.s8.bf16 %v906_v12  ;;  %v461_v12 = vld [vmem:[%s4877_s1 + $0xa0] sm:$0xff] }
 0x16a   : > { %2163 = vmatprep.subr.bf16.mxu0 %v1754_v25  ;;  %2327 = vmatprep.subr.bf16.mxu1 %v1756_v26  ;;  %v1900_v25 = vunpack.c.h.s8.bf16 %v908_v13  ;;  %v922_v26 = vld [vmem:[%s4877_s1 + $0xf08] sm:$0xff]  ;;  %v463_v13 = vld [vmem:[%s4877_s1 + $0xb0] sm:$0xff] }
 0x16d   : > { %2164 = vmatpush1.bf16.msra.mxu0 %v1753_v28  ;;  %2328 = vmatpush1.bf16.msra.mxu1 %v1755_v29  ;;  %v1899_v28 = vunpack.c.h.s8.bf16 %v907_v20  ;;  %v1914_v29 = vunpack.c.l.s8.bf16 %v922_v26  ;;  %v480_v20 = vld [vmem:[%s4877_s1 + $0x138] sm:$0xff] }
 0x16e   : > { %2165 = vmatprep.subr.bf16.mxu0 %v1770_v30  ;;  %2329 = vmatprep.subr.bf16.mxu1 %v1772_v32  ;;  %v1916_v30 = vunpack.c.l.s8.bf16 %v924_v44  ;;  %v921_v32 = vld [vmem:[%s4877_s1 + $0xf00] sm:$0xff] }
 0x16f   : > { %v1913_v34 = vunpack.c.l.s8.bf16 %v921_v32  ;;  %v1929_v42 = vunpack.c.h.s8.bf16 %v921_v32  ;;  %v494_v32 = vld [vmem:[%s4877_s1 + $0x1a8] sm:$0xff] }
 0x171   : > { %2166 = vmatpush1.bf16.msra.mxu0 %v1769_v35  ;;  %2330 = vmatpush1.bf16.msra.mxu1 %v1771_v36  ;;  %v1915_v35 = vunpack.c.l.s8.bf16 %v923_v33  ;;  %v1930_v36 = vunpack.c.h.s8.bf16 %v922_v26  ;;  %v477_v26 = vld [vmem:[%s4877_s1 + $0x120] sm:$0xff] }
 0x172   : > { %2167 = vmatprep.subr.bf16.mxu0 %v1786_v37  ;;  %2331 = vmatprep.subr.bf16.mxu1 %v1788_v40  ;;  %v1932_v37 = vunpack.c.h.s8.bf16 %v924_v44  ;;  %v938_v40 = vld [vmem:[%s4877_s1 + $0xf88] sm:$0xff]  ;;  %v479_v44 = vld [vmem:[%s4877_s1 + $0x130] sm:$0xff] }
 0x175   : > { %2168 = vmatpush1.bf16.msra.mxu0 %v1785_v43  ;;  %2332 = vmatpush1.bf16.msra.mxu1 %v1787_v45  ;;  %v1931_v43 = vunpack.c.h.s8.bf16 %v923_v33  ;;  %v1946_v45 = vunpack.c.l.s8.bf16 %v938_v40  ;;  %v496_v33 = vld [vmem:[%s4877_s1 + $0x1b8] sm:$0xff] }
 0x176   : > { %2169 = vmatprep.subr.bf16.mxu0 %v1802_v46  ;;  %2333 = vmatprep.subr.bf16.mxu1 %v1804_v47  ;;  %v1948_v46 = vunpack.c.l.s8.bf16 %v940_v41  ;;  %v937_v47 = vld [vmem:[%s4877_s1 + $0xf80] sm:$0xff] }
 0x177   : > { %v1945_v51 = vunpack.c.l.s8.bf16 %v937_v47  ;;  %v1961_v59 = vunpack.c.h.s8.bf16 %v937_v47  ;;  %v510_v47 = vld [vmem:[%s4877_s1 + $0x228] sm:$0xff] }
 0x179   : > { %2170 = vmatpush1.bf16.msra.mxu0 %v1801_v52  ;;  %2334 = vmatpush1.bf16.msra.mxu1 %v1803_v54  ;;  %v1947_v52 = vunpack.c.l.s8.bf16 %v939_v48  ;;  %v1962_v54 = vunpack.c.h.s8.bf16 %v938_v40  ;;  %v493_v40 = vld [vmem:[%s4877_s1 + $0x1a0] sm:$0xff] }
 0x17a   : > { %2171 = vmatprep.subr.bf16.mxu0 %v1818_v55  ;;  %2335 = vmatprep.subr.bf16.mxu1 %v1820_v56  ;;  %v1964_v55 = vunpack.c.h.s8.bf16 %v940_v41  ;;  %v446_v56 = vld [vmem:[%s4877_s1 + $0x28] sm:$0xff]  ;;  %v495_v41 = vld [vmem:[%s4877_s1 + $0x1b0] sm:$0xff] }
 0x17d   : > { %2172 = vmatpush1.bf16.msra.mxu0 %v1817_v60  ;;  %2336 = vmatpush1.bf16.msra.mxu1 %v1819_v50  ;;  %v1963_v60 = vunpack.c.h.s8.bf16 %v939_v48  ;;  %v958_v50 = vunpack.c.l.s8.bf16 %v446_v56  ;;  %v512_v48 = vld [vmem:[%s4877_s1 + $0x238] sm:$0xff] }
 0x17e   : > { %2173 = vmatprep.subr.bf16.mxu0 %v1834_v62  ;;  %2337 = vmatprep.subr.bf16.mxu1 %v1836_v63  ;;  %v960_v62 = vunpack.c.l.s8.bf16 %v448_v57  ;;  %v445_v63 = vld [vmem:[%s4877_s1 + $0x20] sm:$0xff] }
 0x181   : > { %2174 = vmatpush1.bf16.msra.mxu0 %v1833_v2  ;;  %2338 = vmatpush1.bf16.msra.mxu1 %v1835_v3  ;;  %v957_v2 = vunpack.c.l.s8.bf16 %v445_v63  ;;  %v959_v3 = vunpack.c.l.s8.bf16 %v447_v0 }
 0x182   : > { %2175 = vmatprep.subr.bf16.mxu0 %v1850_v4  ;;  %2339 = vmatprep.subr.bf16.mxu1 %v1852_v5  ;;  %v974_v4 = vunpack.c.h.s8.bf16 %v446_v56  ;;  %v976_v5 = vunpack.c.h.s8.bf16 %v448_v57  ;;  %v509_v56 = vld [vmem:[%s4877_s1 + $0x220] sm:$0xff]  ;;  %v511_v57 = vld [vmem:[%s4877_s1 + $0x230] sm:$0xff] }
 0x185   : > { %2176 = vmatpush1.bf16.msra.mxu0 %v1849_v8  ;;  %2340 = vmatpush1.bf16.msra.mxu1 %v1851_v9  ;;  %v973_v8 = vunpack.c.h.s8.bf16 %v445_v63  ;;  %v975_v9 = vunpack.c.h.s8.bf16 %v447_v0  ;;  %v526_v63 = vld [vmem:[%s4877_s1 + $0x2a8] sm:$0xff]  ;;  %v528_v0 = vld [vmem:[%s4877_s1 + $0x2b8] sm:$0xff] }
 0x186   : > { %2177 = vmatprep.subr.bf16.mxu0 %v1866_v10  ;;  %2341 = vmatprep.subr.bf16.mxu1 %v1868_v11  ;;  %v990_v10 = vunpack.c.l.s8.bf16 %v462_v6  ;;  %v992_v11 = vunpack.c.l.s8.bf16 %v464_v7 }
 0x189   : > { %2178 = vmatpush1.bf16.msra.mxu0 %v1865_v14  ;;  %2342 = vmatpush1.bf16.msra.mxu1 %v1867_v16  ;;  %v989_v14 = vunpack.c.l.s8.bf16 %v461_v12  ;;  %v991_v16 = vunpack.c.l.s8.bf16 %v463_v13 }
 0x18a   : > { %2179 = vmatprep.subr.bf16.mxu0 %v1882_v17  ;;  %2343 = vmatprep.subr.bf16.mxu1 %v1884_v18  ;;  %v1006_v17 = vunpack.c.h.s8.bf16 %v462_v6  ;;  %v1008_v18 = vunpack.c.h.s8.bf16 %v464_v7  ;;  %v525_v6 = vld [vmem:[%s4877_s1 + $0x2a0] sm:$0xff]  ;;  %v527_v7 = vld [vmem:[%s4877_s1 + $0x2b0] sm:$0xff] }
 0x18d   : > { %2180 = vmatpush1.bf16.msra.mxu0 %v1881_v21  ;;  %2344 = vmatpush1.bf16.msra.mxu1 %v1883_v24  ;;  %v1005_v21 = vunpack.c.h.s8.bf16 %v461_v12  ;;  %v1007_v24 = vunpack.c.h.s8.bf16 %v463_v13  ;;  %v542_v12 = vld [vmem:[%s4877_s1 + $0x328] sm:$0xff]  ;;  %v544_v13 = vld [vmem:[%s4877_s1 + $0x338] sm:$0xff] }
 0x18e   : > { %2181 = vmatprep.subr.bf16.mxu0 %v1898_v23  ;;  %2345 = vmatprep.subr.bf16.mxu1 %v1900_v25  ;;  %v1022_v23 = vunpack.c.l.s8.bf16 %v478_v19  ;;  %v1024_v25 = vunpack.c.l.s8.bf16 %v480_v20 }
 0x191   : > { %2182 = vmatpush1.bf16.msra.mxu0 %v1897_v27  ;;  %2346 = vmatpush1.bf16.msra.mxu1 %v1899_v28  ;;  %v1021_v27 = vunpack.c.l.s8.bf16 %v477_v26  ;;  %v1023_v28 = vunpack.c.l.s8.bf16 %v479_v44 }
 0x192   : > { %2183 = vmatprep.subr.bf16.mxu0 %v1914_v29  ;;  %2347 = vmatprep.subr.bf16.mxu1 %v1916_v30  ;;  %v1038_v29 = vunpack.c.h.s8.bf16 %v478_v19  ;;  %v1040_v30 = vunpack.c.h.s8.bf16 %v480_v20  ;;  %v541_v19 = vld [vmem:[%s4877_s1 + $0x320] sm:$0xff]  ;;  %v543_v20 = vld [vmem:[%s4877_s1 + $0x330] sm:$0xff] }
 0x195   : > { %2184 = vmatpush1.bf16.msra.mxu0 %v1913_v34  ;;  %2348 = vmatpush1.bf16.msra.mxu1 %v1915_v35  ;;  %v1037_v34 = vunpack.c.h.s8.bf16 %v477_v26  ;;  %v1039_v35 = vunpack.c.h.s8.bf16 %v479_v44  ;;  %v558_v26 = vld [vmem:[%s4877_s1 + $0x3a8] sm:$0xff]  ;;  %v560_v44 = vld [vmem:[%s4877_s1 + $0x3b8] sm:$0xff] }
 0x196   : > { %2185 = vmatprep.subr.bf16.mxu0 %v1930_v36  ;;  %2349 = vmatprep.subr.bf16.mxu1 %v1932_v37  ;;  %v1054_v36 = vunpack.c.l.s8.bf16 %v494_v32  ;;  %v1056_v37 = vunpack.c.l.s8.bf16 %v496_v33 }
 0x199   : > { %2186 = vmatpush1.bf16.msra.mxu0 %v1929_v42  ;;  %2350 = vmatpush1.bf16.msra.mxu1 %v1931_v43  ;;  %v1053_v42 = vunpack.c.l.s8.bf16 %v493_v40  ;;  %v1055_v43 = vunpack.c.l.s8.bf16 %v495_v41 }
 0x19a   : > { %2187 = vmatprep.subr.bf16.mxu0 %v1946_v45  ;;  %2351 = vmatprep.subr.bf16.mxu1 %v1948_v46  ;;  %v1070_v45 = vunpack.c.h.s8.bf16 %v494_v32  ;;  %v1072_v46 = vunpack.c.h.s8.bf16 %v496_v33  ;;  %v557_v32 = vld [vmem:[%s4877_s1 + $0x3a0] sm:$0xff]  ;;  %v559_v33 = vld [vmem:[%s4877_s1 + $0x3b0] sm:$0xff] }
 0x19d   : > { %2188 = vmatpush1.bf16.msra.mxu0 %v1945_v51  ;;  %2352 = vmatpush1.bf16.msra.mxu1 %v1947_v52  ;;  %v1069_v51 = vunpack.c.h.s8.bf16 %v493_v40  ;;  %v1071_v52 = vunpack.c.h.s8.bf16 %v495_v41  ;;  %v574_v40 = vld [vmem:[%s4877_s1 + $0x428] sm:$0xff]  ;;  %v576_v41 = vld [vmem:[%s4877_s1 + $0x438] sm:$0xff] }
 0x19e   : > { %2189 = vmatprep.subr.bf16.mxu0 %v1962_v54  ;;  %2353 = vmatprep.subr.bf16.mxu1 %v1964_v55  ;;  %v1086_v54 = vunpack.c.l.s8.bf16 %v510_v47  ;;  %v1088_v55 = vunpack.c.l.s8.bf16 %v512_v48 }
 0x1a1   : > { %2190 = vmatpush1.bf16.msra.mxu0 %v1961_v59  ;;  %2354 = vmatpush1.bf16.msra.mxu1 %v1963_v60  ;;  %v1085_v59 = vunpack.c.l.s8.bf16 %v509_v56  ;;  %v1087_v60 = vunpack.c.l.s8.bf16 %v511_v57 }
 0x1a2   : > { %2364 = vmatprep.subr.bf16.mxu0 %v958_v50  ;;  %2528 = vmatprep.subr.bf16.mxu1 %v960_v62  ;;  %v1102_v50 = vunpack.c.h.s8.bf16 %v510_v47  ;;  %v1104_v62 = vunpack.c.h.s8.bf16 %v512_v48  ;;  %v573_v47 = vld [vmem:[%s4877_s1 + $0x420] sm:$0xff]  ;;  %v575_v48 = vld [vmem:[%s4877_s1 + $0x430] sm:$0xff] }
 0x1a4   : > { %2192 = vmatmul.mubr.bf16.vlgmr.msra.gmra.mrb[0].mxu0 %v5104_v1  ;;  %2356 = vmatmul.mubr.bf16.vlgmr.msra.gmra.mrb[0].mxu1 %v5104_v1 }
 0x1a5   : > { %2365 = vmatpush1.bf16.msra.mxu0 %v957_v2  ;;  %2529 = vmatpush1.bf16.msra.mxu1 %v959_v3  ;;  %v1101_v2 = vunpack.c.h.s8.bf16 %v509_v56  ;;  %v1103_v3 = vunpack.c.h.s8.bf16 %v511_v57  ;;  %v590_v56 = vld [vmem:[%s4877_s1 + $0x4a8] sm:$0xff]  ;;  %v592_v57 = vld [vmem:[%s4877_s1 + $0x4b8] sm:$0xff] }
 0x1a6   : > { %2366 = vmatprep.subr.bf16.mxu0 %v974_v4  ;;  %2530 = vmatprep.subr.bf16.mxu1 %v976_v5  ;;  %v1118_v4 = vunpack.c.l.s8.bf16 %v526_v63  ;;  %v1120_v5 = vunpack.c.l.s8.bf16 %v528_v0 }
 0x1a7   : > { %2396 = vmatprep.mubr.bf16.mxu0 %v4942_v58  ;;  %2560 = vmatprep.mubr.bf16.mxu1 %v4942_v58 }
 0x1a9   : > { %2367 = vmatpush1.bf16.msra.mxu0 %v973_v8  ;;  %2531 = vmatpush1.bf16.msra.mxu1 %v975_v9  ;;  %v1117_v8 = vunpack.c.l.s8.bf16 %v525_v6  ;;  %v1119_v9 = vunpack.c.l.s8.bf16 %v527_v7 }
 0x1aa   : > { %2368 = vmatprep.subr.bf16.mxu0 %v990_v10  ;;  %2532 = vmatprep.subr.bf16.mxu1 %v992_v11  ;;  %v1134_v10 = vunpack.c.h.s8.bf16 %v526_v63  ;;  %v1136_v11 = vunpack.c.h.s8.bf16 %v528_v0  ;;  %v589_v63 = vld [vmem:[%s4877_s1 + $0x4a0] sm:$0xff]  ;;  %v591_v0 = vld [vmem:[%s4877_s1 + $0x4b0] sm:$0xff] }
 0x1ad   : > { %2369 = vmatpush1.bf16.msra.mxu0 %v989_v14  ;;  %2533 = vmatpush1.bf16.msra.mxu1 %v991_v16  ;;  %v1133_v14 = vunpack.c.h.s8.bf16 %v525_v6  ;;  %v1135_v16 = vunpack.c.h.s8.bf16 %v527_v7  ;;  %v606_v6 = vld [vmem:[%s4877_s1 + $0x528] sm:$0xff]  ;;  %v608_v7 = vld [vmem:[%s4877_s1 + $0x538] sm:$0xff] }
 0x1ae   : > { %2370 = vmatprep.subr.bf16.mxu0 %v1006_v17  ;;  %2534 = vmatprep.subr.bf16.mxu1 %v1008_v18  ;;  %v1150_v17 = vunpack.c.l.s8.bf16 %v542_v12  ;;  %v1152_v18 = vunpack.c.l.s8.bf16 %v544_v13 }
 0x1b1   : > { %2371 = vmatpush1.bf16.msra.mxu0 %v1005_v21  ;;  %2535 = vmatpush1.bf16.msra.mxu1 %v1007_v24  ;;  %v1149_v21 = vunpack.c.l.s8.bf16 %v541_v19  ;;  %v1151_v24 = vunpack.c.l.s8.bf16 %v543_v20 }
 0x1b2   : > { %2372 = vmatprep.subr.bf16.mxu0 %v1022_v23  ;;  %2536 = vmatprep.subr.bf16.mxu1 %v1024_v25  ;;  %v1166_v23 = vunpack.c.h.s8.bf16 %v542_v12  ;;  %v1168_v25 = vunpack.c.h.s8.bf16 %v544_v13  ;;  %v605_v12 = vld [vmem:[%s4877_s1 + $0x520] sm:$0xff]  ;;  %v607_v13 = vld [vmem:[%s4877_s1 + $0x530] sm:$0xff] }
 0x1b5   : > { %2373 = vmatpush1.bf16.msra.mxu0 %v1021_v27  ;;  %2537 = vmatpush1.bf16.msra.mxu1 %v1023_v28  ;;  %v1165_v27 = vunpack.c.h.s8.bf16 %v541_v19  ;;  %v1167_v28 = vunpack.c.h.s8.bf16 %v543_v20  ;;  %v622_v19 = vld [vmem:[%s4877_s1 + $0x5a8] sm:$0xff]  ;;  %v624_v20 = vld [vmem:[%s4877_s1 + $0x5b8] sm:$0xff] }
 0x1b6   : > { %2374 = vmatprep.subr.bf16.mxu0 %v1038_v29  ;;  %2538 = vmatprep.subr.bf16.mxu1 %v1040_v30  ;;  %v1182_v29 = vunpack.c.l.s8.bf16 %v558_v26  ;;  %v1184_v30 = vunpack.c.l.s8.bf16 %v560_v44 }
 0x1b9   : > { %2375 = vmatpush1.bf16.msra.mxu0 %v1037_v34  ;;  %2539 = vmatpush1.bf16.msra.mxu1 %v1039_v35  ;;  %v1181_v34 = vunpack.c.l.s8.bf16 %v557_v32  ;;  %v1183_v35 = vunpack.c.l.s8.bf16 %v559_v33 }
 0x1ba   : > { %2376 = vmatprep.subr.bf16.mxu0 %v1054_v36  ;;  %2540 = vmatprep.subr.bf16.mxu1 %v1056_v37  ;;  %v1198_v36 = vunpack.c.h.s8.bf16 %v558_v26  ;;  %v1200_v37 = vunpack.c.h.s8.bf16 %v560_v44  ;;  %v621_v26 = vld [vmem:[%s4877_s1 + $0x5a0] sm:$0xff]  ;;  %v623_v44 = vld [vmem:[%s4877_s1 + $0x5b0] sm:$0xff] }
 0x1bd   : > { %2377 = vmatpush1.bf16.msra.mxu0 %v1053_v42  ;;  %2541 = vmatpush1.bf16.msra.mxu1 %v1055_v43  ;;  %v1197_v42 = vunpack.c.h.s8.bf16 %v557_v32  ;;  %v1199_v43 = vunpack.c.h.s8.bf16 %v559_v33  ;;  %v638_v32 = vld [vmem:[%s4877_s1 + $0x628] sm:$0xff]  ;;  %v640_v33 = vld [vmem:[%s4877_s1 + $0x638] sm:$0xff] }
 0x1be   : > { %2378 = vmatprep.subr.bf16.mxu0 %v1070_v45  ;;  %2542 = vmatprep.subr.bf16.mxu1 %v1072_v46  ;;  %v1214_v45 = vunpack.c.l.s8.bf16 %v574_v40  ;;  %v1216_v46 = vunpack.c.l.s8.bf16 %v576_v41 }
 0x1c1   : > { %2379 = vmatpush1.bf16.msra.mxu0 %v1069_v51  ;;  %2543 = vmatpush1.bf16.msra.mxu1 %v1071_v52  ;;  %v1213_v51 = vunpack.c.l.s8.bf16 %v573_v47  ;;  %v1215_v52 = vunpack.c.l.s8.bf16 %v575_v48 }
 0x1c2   : > { %2380 = vmatprep.subr.bf16.mxu0 %v1086_v54  ;;  %2544 = vmatprep.subr.bf16.mxu1 %v1088_v55  ;;  %v1230_v54 = vunpack.c.h.s8.bf16 %v574_v40  ;;  %v1232_v55 = vunpack.c.h.s8.bf16 %v576_v41  ;;  %v637_v40 = vld [vmem:[%s4877_s1 + $0x620] sm:$0xff]  ;;  %v639_v41 = vld [vmem:[%s4877_s1 + $0x630] sm:$0xff] }
 0x1c5   : > { %2381 = vmatpush1.bf16.msra.mxu0 %v1085_v59  ;;  %2545 = vmatpush1.bf16.msra.mxu1 %v1087_v60  ;;  %v1229_v59 = vunpack.c.h.s8.bf16 %v573_v47  ;;  %v1231_v60 = vunpack.c.h.s8.bf16 %v575_v48  ;;  %v654_v47 = vld [vmem:[%s4877_s1 + $0x6a8] sm:$0xff]  ;;  %v656_v48 = vld [vmem:[%s4877_s1 + $0x6b8] sm:$0xff] }
 0x1c6   : > { %2382 = vmatprep.subr.bf16.mxu0 %v1102_v50  ;;  %2546 = vmatprep.subr.bf16.mxu1 %v1104_v62  ;;  %v1246_v50 = vunpack.c.l.s8.bf16 %v590_v56  ;;  %v1248_v62 = vunpack.c.l.s8.bf16 %v592_v57 }
 0x1c9   : > { %2383 = vmatpush1.bf16.msra.mxu0 %v1101_v2  ;;  %2547 = vmatpush1.bf16.msra.mxu1 %v1103_v3  ;;  %v1245_v2 = vunpack.c.l.s8.bf16 %v589_v63  ;;  %v1247_v3 = vunpack.c.l.s8.bf16 %v591_v0 }
 0x1ca   : > { %2384 = vmatprep.subr.bf16.mxu0 %v1118_v4  ;;  %2548 = vmatprep.subr.bf16.mxu1 %v1120_v5  ;;  %v1262_v4 = vunpack.c.h.s8.bf16 %v590_v56  ;;  %v1264_v5 = vunpack.c.h.s8.bf16 %v592_v57  ;;  %v653_v56 = vld [vmem:[%s4877_s1 + $0x6a0] sm:$0xff]  ;;  %v655_v57 = vld [vmem:[%s4877_s1 + $0x6b0] sm:$0xff] }
 0x1cd   : > { %2385 = vmatpush1.bf16.msra.mxu0 %v1117_v8  ;;  %2549 = vmatpush1.bf16.msra.mxu1 %v1119_v9  ;;  %v1261_v8 = vunpack.c.h.s8.bf16 %v589_v63  ;;  %v1263_v9 = vunpack.c.h.s8.bf16 %v591_v0  ;;  %v670_v63 = vld [vmem:[%s4877_s1 + $0x728] sm:$0xff]  ;;  %v672_v0 = vld [vmem:[%s4877_s1 + $0x738] sm:$0xff] }
 0x1ce   : > { %2386 = vmatprep.subr.bf16.mxu0 %v1134_v10  ;;  %2550 = vmatprep.subr.bf16.mxu1 %v1136_v11  ;;  %v1278_v10 = vunpack.c.l.s8.bf16 %v606_v6  ;;  %v1280_v11 = vunpack.c.l.s8.bf16 %v608_v7 }
 0x1d1   : > { %2387 = vmatpush1.bf16.msra.mxu0 %v1133_v14  ;;  %2551 = vmatpush1.bf16.msra.mxu1 %v1135_v16  ;;  %v1277_v14 = vunpack.c.l.s8.bf16 %v605_v12  ;;  %v1279_v16 = vunpack.c.l.s8.bf16 %v607_v13 }
 0x1d2   : > { %2388 = vmatprep.subr.bf16.mxu0 %v1150_v17  ;;  %2552 = vmatprep.subr.bf16.mxu1 %v1152_v18  ;;  %v1294_v17 = vunpack.c.h.s8.bf16 %v606_v6  ;;  %v1296_v18 = vunpack.c.h.s8.bf16 %v608_v7  ;;  %v669_v6 = vld [vmem:[%s4877_s1 + $0x720] sm:$0xff]  ;;  %v671_v7 = vld [vmem:[%s4877_s1 + $0x730] sm:$0xff] }
 0x1d5   : > { %2389 = vmatpush1.bf16.msra.mxu0 %v1149_v21  ;;  %2553 = vmatpush1.bf16.msra.mxu1 %v1151_v24  ;;  %v1293_v21 = vunpack.c.h.s8.bf16 %v605_v12  ;;  %v1295_v24 = vunpack.c.h.s8.bf16 %v607_v13  ;;  %v686_v12 = vld [vmem:[%s4877_s1 + $0x7a8] sm:$0xff]  ;;  %v688_v13 = vld [vmem:[%s4877_s1 + $0x7b8] sm:$0xff] }
 0x1d6   : > { %2390 = vmatprep.subr.bf16.mxu0 %v1166_v23  ;;  %2554 = vmatprep.subr.bf16.mxu1 %v1168_v25  ;;  %v1310_v23 = vunpack.c.l.s8.bf16 %v622_v19  ;;  %v1312_v25 = vunpack.c.l.s8.bf16 %v624_v20 }
 0x1d9   : > { %2391 = vmatpush1.bf16.msra.mxu0 %v1165_v27  ;;  %2555 = vmatpush1.bf16.msra.mxu1 %v1167_v28  ;;  %v1309_v27 = vunpack.c.l.s8.bf16 %v621_v26  ;;  %v1311_v28 = vunpack.c.l.s8.bf16 %v623_v44 }
 0x1da   : > { %2392 = vmatprep.subr.bf16.mxu0 %v1182_v29  ;;  %2556 = vmatprep.subr.bf16.mxu1 %v1184_v30  ;;  %v1326_v29 = vunpack.c.h.s8.bf16 %v622_v19  ;;  %v1328_v30 = vunpack.c.h.s8.bf16 %v624_v20  ;;  %v685_v19 = vld [vmem:[%s4877_s1 + $0x7a0] sm:$0xff]  ;;  %v687_v20 = vld [vmem:[%s4877_s1 + $0x7b0] sm:$0xff] }
 0x1dd   : > { %2393 = vmatpush1.bf16.msra.mxu0 %v1181_v34  ;;  %2557 = vmatpush1.bf16.msra.mxu1 %v1183_v35  ;;  %v1325_v34 = vunpack.c.h.s8.bf16 %v621_v26  ;;  %v1327_v35 = vunpack.c.h.s8.bf16 %v623_v44  ;;  %v702_v26 = vld [vmem:[%s4877_s1 + $0x828] sm:$0xff]  ;;  %v704_v44 = vld [vmem:[%s4877_s1 + $0x838] sm:$0xff] }
 0x1de   : > { %2394 = vmatprep.subr.bf16.mxu0 %v1198_v36  ;;  %2558 = vmatprep.subr.bf16.mxu1 %v1200_v37  ;;  %v1342_v36 = vunpack.c.l.s8.bf16 %v638_v32  ;;  %v1344_v37 = vunpack.c.l.s8.bf16 %v640_v33 }
 0x1e1   : > { %2395 = vmatpush1.bf16.msra.mxu0 %v1197_v42  ;;  %2559 = vmatpush1.bf16.msra.mxu1 %v1199_v43  ;;  %v1341_v42 = vunpack.c.l.s8.bf16 %v637_v40  ;;  %v1343_v43 = vunpack.c.l.s8.bf16 %v639_v41 }
 0x1e2   : > { %2405 = vmatprep.subr.bf16.mxu0 %v1214_v45  ;;  %2569 = vmatprep.subr.bf16.mxu1 %v1216_v46  ;;  %v1358_v45 = vunpack.c.h.s8.bf16 %v638_v32  ;;  %v1360_v46 = vunpack.c.h.s8.bf16 %v640_v33  ;;  %v701_v32 = vld [vmem:[%s4877_s1 + $0x820] sm:$0xff]  ;;  %v703_v33 = vld [vmem:[%s4877_s1 + $0x830] sm:$0xff] }
 0x1e4   : > { %2397 = vmatmul.mubr.bf16.vlgmr.msra.gmra.mrb[4].mxu0 %v4966_v53  ;;  %2561 = vmatmul.mubr.bf16.vlgmr.msra.gmra.mrb[4].mxu1 %v4966_v53 }
 0x1e5   : > { %2406 = vmatpush1.bf16.msra.mxu0 %v1213_v51  ;;  %2570 = vmatpush1.bf16.msra.mxu1 %v1215_v52  ;;  %v1357_v51 = vunpack.c.h.s8.bf16 %v637_v40  ;;  %v1359_v52 = vunpack.c.h.s8.bf16 %v639_v41  ;;  %v718_v40 = vld [vmem:[%s4877_s1 + $0x8a8] sm:$0xff]  ;;  %v720_v41 = vld [vmem:[%s4877_s1 + $0x8b8] sm:$0xff] }
 0x1e6   : > { %2407 = vmatprep.subr.bf16.mxu0 %v1230_v54  ;;  %2571 = vmatprep.subr.bf16.mxu1 %v1232_v55  ;;  %v1374_v54 = vunpack.c.l.s8.bf16 %v654_v47  ;;  %v1376_v55 = vunpack.c.l.s8.bf16 %v656_v48 }
 0x1e7   : > { %2437 = vmatprep.mubr.bf16.mxu0 %v4972_v61  ;;  %2601 = vmatprep.mubr.bf16.mxu1 %v4972_v61 }
 0x1e9   : > { %2408 = vmatpush1.bf16.msra.mxu0 %v1229_v59  ;;  %2572 = vmatpush1.bf16.msra.mxu1 %v1231_v60  ;;  %v1373_v59 = vunpack.c.l.s8.bf16 %v653_v56  ;;  %v1375_v60 = vunpack.c.l.s8.bf16 %v655_v57 }
 0x1ea   : > { %2409 = vmatprep.subr.bf16.mxu0 %v1246_v50  ;;  %2573 = vmatprep.subr.bf16.mxu1 %v1248_v62  ;;  %v1390_v50 = vunpack.c.h.s8.bf16 %v654_v47  ;;  %v1392_v62 = vunpack.c.h.s8.bf16 %v656_v48  ;;  %v717_v47 = vld [vmem:[%s4877_s1 + $0x8a0] sm:$0xff]  ;;  %v719_v48 = vld [vmem:[%s4877_s1 + $0x8b0] sm:$0xff] }
 0x1ed   : > { %2410 = vmatpush1.bf16.msra.mxu0 %v1245_v2  ;;  %2574 = vmatpush1.bf16.msra.mxu1 %v1247_v3  ;;  %v1389_v2 = vunpack.c.h.s8.bf16 %v653_v56  ;;  %v1391_v3 = vunpack.c.h.s8.bf16 %v655_v57  ;;  %v734_v56 = vld [vmem:[%s4877_s1 + $0x928] sm:$0xff]  ;;  %v736_v57 = vld [vmem:[%s4877_s1 + $0x938] sm:$0xff] }
 0x1ee   : > { %2411 = vmatprep.subr.bf16.mxu0 %v1262_v4  ;;  %2575 = vmatprep.subr.bf16.mxu1 %v1264_v5  ;;  %v1406_v4 = vunpack.c.l.s8.bf16 %v670_v63  ;;  %v1408_v5 = vunpack.c.l.s8.bf16 %v672_v0 }
 0x1f1   : > { %2412 = vmatpush1.bf16.msra.mxu0 %v1261_v8  ;;  %2576 = vmatpush1.bf16.msra.mxu1 %v1263_v9  ;;  %v1405_v8 = vunpack.c.l.s8.bf16 %v669_v6  ;;  %v1407_v9 = vunpack.c.l.s8.bf16 %v671_v7 }
 0x1f2   : > { %2413 = vmatprep.subr.bf16.mxu0 %v1278_v10  ;;  %2577 = vmatprep.subr.bf16.mxu1 %v1280_v11  ;;  %v1422_v10 = vunpack.c.h.s8.bf16 %v670_v63  ;;  %v1424_v11 = vunpack.c.h.s8.bf16 %v672_v0  ;;  %v733_v63 = vld [vmem:[%s4877_s1 + $0x920] sm:$0xff]  ;;  %v735_v0 = vld [vmem:[%s4877_s1 + $0x930] sm:$0xff] }
 0x1f5   : > { %2414 = vmatpush1.bf16.msra.mxu0 %v1277_v14  ;;  %2578 = vmatpush1.bf16.msra.mxu1 %v1279_v16  ;;  %v1421_v14 = vunpack.c.h.s8.bf16 %v669_v6  ;;  %v1423_v16 = vunpack.c.h.s8.bf16 %v671_v7  ;;  %v750_v6 = vld [vmem:[%s4877_s1 + $0x9a8] sm:$0xff]  ;;  %v752_v7 = vld [vmem:[%s4877_s1 + $0x9b8] sm:$0xff] }
 0x1f6   : > { %2415 = vmatprep.subr.bf16.mxu0 %v1294_v17  ;;  %2579 = vmatprep.subr.bf16.mxu1 %v1296_v18  ;;  %v1438_v17 = vunpack.c.l.s8.bf16 %v686_v12  ;;  %v1440_v18 = vunpack.c.l.s8.bf16 %v688_v13 }
 0x1f9   : > { %2416 = vmatpush1.bf16.msra.mxu0 %v1293_v21  ;;  %2580 = vmatpush1.bf16.msra.mxu1 %v1295_v24  ;;  %v1437_v21 = vunpack.c.l.s8.bf16 %v685_v19  ;;  %v1439_v24 = vunpack.c.l.s8.bf16 %v687_v20 }
 0x1fa   : > { %2417 = vmatprep.subr.bf16.mxu0 %v1310_v23  ;;  %2581 = vmatprep.subr.bf16.mxu1 %v1312_v25  ;;  %v1454_v23 = vunpack.c.h.s8.bf16 %v686_v12  ;;  %v1456_v25 = vunpack.c.h.s8.bf16 %v688_v13  ;;  %v749_v12 = vld [vmem:[%s4877_s1 + $0x9a0] sm:$0xff]  ;;  %v751_v13 = vld [vmem:[%s4877_s1 + $0x9b0] sm:$0xff] }
 0x1fd   : > { %2418 = vmatpush1.bf16.msra.mxu0 %v1309_v27  ;;  %2582 = vmatpush1.bf16.msra.mxu1 %v1311_v28  ;;  %v1453_v27 = vunpack.c.h.s8.bf16 %v685_v19  ;;  %v1455_v28 = vunpack.c.h.s8.bf16 %v687_v20  ;;  %v766_v19 = vld [vmem:[%s4877_s1 + $0xa28] sm:$0xff]  ;;  %v768_v20 = vld [vmem:[%s4877_s1 + $0xa38] sm:$0xff] }
 0x1fe   : > { %2419 = vmatprep.subr.bf16.mxu0 %v1326_v29  ;;  %2583 = vmatprep.subr.bf16.mxu1 %v1328_v30  ;;  %v1470_v29 = vunpack.c.l.s8.bf16 %v702_v26  ;;  %v1472_v30 = vunpack.c.l.s8.bf16 %v704_v44 }
 0x201   : > { %2420 = vmatpush1.bf16.msra.mxu0 %v1325_v34  ;;  %2584 = vmatpush1.bf16.msra.mxu1 %v1327_v35  ;;  %v1469_v34 = vunpack.c.l.s8.bf16 %v701_v32  ;;  %v1471_v35 = vunpack.c.l.s8.bf16 %v703_v33 }
 0x202   : > { %2421 = vmatprep.subr.bf16.mxu0 %v1342_v36  ;;  %2585 = vmatprep.subr.bf16.mxu1 %v1344_v37  ;;  %v1486_v36 = vunpack.c.h.s8.bf16 %v702_v26  ;;  %v1488_v37 = vunpack.c.h.s8.bf16 %v704_v44  ;;  %v765_v26 = vld [vmem:[%s4877_s1 + $0xa20] sm:$0xff]  ;;  %v767_v44 = vld [vmem:[%s4877_s1 + $0xa30] sm:$0xff] }
 0x205   : > { %2422 = vmatpush1.bf16.msra.mxu0 %v1341_v42  ;;  %2586 = vmatpush1.bf16.msra.mxu1 %v1343_v43  ;;  %v1485_v42 = vunpack.c.h.s8.bf16 %v701_v32  ;;  %v1487_v43 = vunpack.c.h.s8.bf16 %v703_v33  ;;  %v782_v32 = vld [vmem:[%s4877_s1 + $0xaa8] sm:$0xff]  ;;  %v784_v33 = vld [vmem:[%s4877_s1 + $0xab8] sm:$0xff] }
 0x206   : > { %2423 = vmatprep.subr.bf16.mxu0 %v1358_v45  ;;  %2587 = vmatprep.subr.bf16.mxu1 %v1360_v46  ;;  %v1502_v45 = vunpack.c.l.s8.bf16 %v718_v40  ;;  %v1504_v46 = vunpack.c.l.s8.bf16 %v720_v41 }
 0x209   : > { %2424 = vmatpush1.bf16.msra.mxu0 %v1357_v51  ;;  %2588 = vmatpush1.bf16.msra.mxu1 %v1359_v52  ;;  %v1501_v51 = vunpack.c.l.s8.bf16 %v717_v47  ;;  %v1503_v52 = vunpack.c.l.s8.bf16 %v719_v48 }
 0x20a   : > { %2425 = vmatprep.subr.bf16.mxu0 %v1374_v54  ;;  %2589 = vmatprep.subr.bf16.mxu1 %v1376_v55  ;;  %v1518_v54 = vunpack.c.h.s8.bf16 %v718_v40  ;;  %v1520_v55 = vunpack.c.h.s8.bf16 %v720_v41  ;;  %v781_v40 = vld [vmem:[%s4877_s1 + $0xaa0] sm:$0xff]  ;;  %v783_v41 = vld [vmem:[%s4877_s1 + $0xab0] sm:$0xff] }
 0x20d   : > { %2426 = vmatpush1.bf16.msra.mxu0 %v1373_v59  ;;  %2590 = vmatpush1.bf16.msra.mxu1 %v1375_v60  ;;  %v1517_v59 = vunpack.c.h.s8.bf16 %v717_v47  ;;  %v1519_v60 = vunpack.c.h.s8.bf16 %v719_v48  ;;  %v798_v47 = vld [vmem:[%s4877_s1 + $0xb28] sm:$0xff]  ;;  %v800_v48 = vld [vmem:[%s4877_s1 + $0xb38] sm:$0xff] }
 0x20e   : > { %2427 = vmatprep.subr.bf16.mxu0 %v1390_v50  ;;  %2591 = vmatprep.subr.bf16.mxu1 %v1392_v62  ;;  %v1534_v50 = vunpack.c.l.s8.bf16 %v734_v56  ;;  %v1536_v62 = vunpack.c.l.s8.bf16 %v736_v57 }
 0x211   : > { %2428 = vmatpush1.bf16.msra.mxu0 %v1389_v2  ;;  %2592 = vmatpush1.bf16.msra.mxu1 %v1391_v3  ;;  %v1533_v2 = vunpack.c.l.s8.bf16 %v733_v63  ;;  %v1535_v3 = vunpack.c.l.s8.bf16 %v735_v0 }
 0x212   : > { %2429 = vmatprep.subr.bf16.mxu0 %v1406_v4  ;;  %2593 = vmatprep.subr.bf16.mxu1 %v1408_v5  ;;  %v1550_v4 = vunpack.c.h.s8.bf16 %v734_v56  ;;  %v1552_v5 = vunpack.c.h.s8.bf16 %v736_v57  ;;  %v797_v56 = vld [vmem:[%s4877_s1 + $0xb20] sm:$0xff]  ;;  %v799_v57 = vld [vmem:[%s4877_s1 + $0xb30] sm:$0xff] }
 0x215   : > { %2430 = vmatpush1.bf16.msra.mxu0 %v1405_v8  ;;  %2594 = vmatpush1.bf16.msra.mxu1 %v1407_v9  ;;  %v1549_v8 = vunpack.c.h.s8.bf16 %v733_v63  ;;  %v1551_v9 = vunpack.c.h.s8.bf16 %v735_v0  ;;  %v814_v63 = vld [vmem:[%s4877_s1 + $0xba8] sm:$0xff]  ;;  %v816_v0 = vld [vmem:[%s4877_s1 + $0xbb8] sm:$0xff] }
 0x216   : > { %2431 = vmatprep.subr.bf16.mxu0 %v1422_v10  ;;  %2595 = vmatprep.subr.bf16.mxu1 %v1424_v11  ;;  %v1566_v10 = vunpack.c.l.s8.bf16 %v750_v6  ;;  %v1568_v11 = vunpack.c.l.s8.bf16 %v752_v7 }
 0x219   : > { %2432 = vmatpush1.bf16.msra.mxu0 %v1421_v14  ;;  %2596 = vmatpush1.bf16.msra.mxu1 %v1423_v16  ;;  %v1565_v14 = vunpack.c.l.s8.bf16 %v749_v12  ;;  %v1567_v16 = vunpack.c.l.s8.bf16 %v751_v13 }
 0x21a   : > { %2433 = vmatprep.subr.bf16.mxu0 %v1438_v17  ;;  %2597 = vmatprep.subr.bf16.mxu1 %v1440_v18  ;;  %v1582_v17 = vunpack.c.h.s8.bf16 %v750_v6  ;;  %v1584_v18 = vunpack.c.h.s8.bf16 %v752_v7  ;;  %v813_v6 = vld [vmem:[%s4877_s1 + $0xba0] sm:$0xff]  ;;  %v815_v7 = vld [vmem:[%s4877_s1 + $0xbb0] sm:$0xff] }
 0x21d   : > { %2434 = vmatpush1.bf16.msra.mxu0 %v1437_v21  ;;  %2598 = vmatpush1.bf16.msra.mxu1 %v1439_v24  ;;  %v1581_v21 = vunpack.c.h.s8.bf16 %v749_v12  ;;  %v1583_v24 = vunpack.c.h.s8.bf16 %v751_v13  ;;  %v830_v12 = vld [vmem:[%s4877_s1 + $0xc28] sm:$0xff]  ;;  %v832_v13 = vld [vmem:[%s4877_s1 + $0xc38] sm:$0xff] }
 0x21e   : > { %2435 = vmatprep.subr.bf16.mxu0 %v1454_v23  ;;  %2599 = vmatprep.subr.bf16.mxu1 %v1456_v25  ;;  %v1598_v23 = vunpack.c.l.s8.bf16 %v766_v19  ;;  %v1600_v25 = vunpack.c.l.s8.bf16 %v768_v20 }
 0x221   : > { %2436 = vmatpush1.bf16.msra.mxu0 %v1453_v27  ;;  %2600 = vmatpush1.bf16.msra.mxu1 %v1455_v28  ;;  %v1597_v27 = vunpack.c.l.s8.bf16 %v765_v26  ;;  %v1599_v28 = vunpack.c.l.s8.bf16 %v767_v44 }
 0x222   : > { %2446 = vmatprep.subr.bf16.mxu0 %v1470_v29  ;;  %2610 = vmatprep.subr.bf16.mxu1 %v1472_v30  ;;  %v1614_v29 = vunpack.c.h.s8.bf16 %v766_v19  ;;  %v1616_v30 = vunpack.c.h.s8.bf16 %v768_v20  ;;  %v829_v19 = vld [vmem:[%s4877_s1 + $0xc20] sm:$0xff]  ;;  %v831_v20 = vld [vmem:[%s4877_s1 + $0xc30] sm:$0xff] }
 0x224   : > { %2438 = vmatmul.mubr.bf16.vlgmr.msra.gmra.mrb[4].mxu0 %v5017_v31  ;;  %2602 = vmatmul.mubr.bf16.vlgmr.msra.gmra.mrb[4].mxu1 %v5017_v31 }
 0x225   : > { %2447 = vmatpush1.bf16.msra.mxu0 %v1469_v34  ;;  %2611 = vmatpush1.bf16.msra.mxu1 %v1471_v35  ;;  %v1613_v34 = vunpack.c.h.s8.bf16 %v765_v26  ;;  %v1615_v35 = vunpack.c.h.s8.bf16 %v767_v44  ;;  %v846_v26 = vld [vmem:[%s4877_s1 + $0xca8] sm:$0xff]  ;;  %v848_v44 = vld [vmem:[%s4877_s1 + $0xcb8] sm:$0xff] }
 0x226   : > { %2448 = vmatprep.subr.bf16.mxu0 %v1486_v36  ;;  %2612 = vmatprep.subr.bf16.mxu1 %v1488_v37  ;;  %v1630_v36 = vunpack.c.l.s8.bf16 %v782_v32  ;;  %v1632_v37 = vunpack.c.l.s8.bf16 %v784_v33 }
 0x227   : > { %2478 = vmatprep.mubr.bf16.mxu0 %v5022_v39  ;;  %2642 = vmatprep.mubr.bf16.mxu1 %v5022_v39 }
 0x229   : > { %2449 = vmatpush1.bf16.msra.mxu0 %v1485_v42  ;;  %2613 = vmatpush1.bf16.msra.mxu1 %v1487_v43  ;;  %v1629_v42 = vunpack.c.l.s8.bf16 %v781_v40  ;;  %v1631_v43 = vunpack.c.l.s8.bf16 %v783_v41 }
 0x22a   : > { %2450 = vmatprep.subr.bf16.mxu0 %v1502_v45  ;;  %2614 = vmatprep.subr.bf16.mxu1 %v1504_v46  ;;  %v1646_v45 = vunpack.c.h.s8.bf16 %v782_v32  ;;  %v1648_v46 = vunpack.c.h.s8.bf16 %v784_v33  ;;  %v845_v32 = vld [vmem:[%s4877_s1 + $0xca0] sm:$0xff]  ;;  %v847_v33 = vld [vmem:[%s4877_s1 + $0xcb0] sm:$0xff] }
 0x22d   : > { %2451 = vmatpush1.bf16.msra.mxu0 %v1501_v51  ;;  %2615 = vmatpush1.bf16.msra.mxu1 %v1503_v52  ;;  %v1645_v51 = vunpack.c.h.s8.bf16 %v781_v40  ;;  %v1647_v52 = vunpack.c.h.s8.bf16 %v783_v41  ;;  %v862_v40 = vld [vmem:[%s4877_s1 + $0xd28] sm:$0xff]  ;;  %v864_v41 = vld [vmem:[%s4877_s1 + $0xd38] sm:$0xff] }
 0x22e   : > { %2452 = vmatprep.subr.bf16.mxu0 %v1518_v54  ;;  %2616 = vmatprep.subr.bf16.mxu1 %v1520_v55  ;;  %v1662_v54 = vunpack.c.l.s8.bf16 %v798_v47  ;;  %v1664_v55 = vunpack.c.l.s8.bf16 %v800_v48 }
 0x231   : > { %2453 = vmatpush1.bf16.msra.mxu0 %v1517_v59  ;;  %2617 = vmatpush1.bf16.msra.mxu1 %v1519_v60  ;;  %v1661_v59 = vunpack.c.l.s8.bf16 %v797_v56  ;;  %v1663_v60 = vunpack.c.l.s8.bf16 %v799_v57 }
 0x232   : > { %2454 = vmatprep.subr.bf16.mxu0 %v1534_v50  ;;  %2618 = vmatprep.subr.bf16.mxu1 %v1536_v62  ;;  %v1678_v50 = vunpack.c.h.s8.bf16 %v798_v47  ;;  %v1680_v62 = vunpack.c.h.s8.bf16 %v800_v48  ;;  %v861_v47 = vld [vmem:[%s4877_s1 + $0xd20] sm:$0xff]  ;;  %v863_v48 = vld [vmem:[%s4877_s1 + $0xd30] sm:$0xff] }
 0x235   : > { %2455 = vmatpush1.bf16.msra.mxu0 %v1533_v2  ;;  %2619 = vmatpush1.bf16.msra.mxu1 %v1535_v3  ;;  %v1677_v2 = vunpack.c.h.s8.bf16 %v797_v56  ;;  %v1679_v3 = vunpack.c.h.s8.bf16 %v799_v57  ;;  %v878_v56 = vld [vmem:[%s4877_s1 + $0xda8] sm:$0xff]  ;;  %v880_v57 = vld [vmem:[%s4877_s1 + $0xdb8] sm:$0xff] }
 0x236   : > { %2456 = vmatprep.subr.bf16.mxu0 %v1550_v4  ;;  %2620 = vmatprep.subr.bf16.mxu1 %v1552_v5  ;;  %v1694_v4 = vunpack.c.l.s8.bf16 %v814_v63  ;;  %v1696_v5 = vunpack.c.l.s8.bf16 %v816_v0 }
 0x239   : > { %2457 = vmatpush1.bf16.msra.mxu0 %v1549_v8  ;;  %2621 = vmatpush1.bf16.msra.mxu1 %v1551_v9  ;;  %v1693_v8 = vunpack.c.l.s8.bf16 %v813_v6  ;;  %v1695_v9 = vunpack.c.l.s8.bf16 %v815_v7 }
 0x23a   : > { %2458 = vmatprep.subr.bf16.mxu0 %v1566_v10  ;;  %2622 = vmatprep.subr.bf16.mxu1 %v1568_v11  ;;  %v1710_v10 = vunpack.c.h.s8.bf16 %v814_v63  ;;  %v1712_v11 = vunpack.c.h.s8.bf16 %v816_v0  ;;  %v877_v63 = vld [vmem:[%s4877_s1 + $0xda0] sm:$0xff]  ;;  %v879_v0 = vld [vmem:[%s4877_s1 + $0xdb0] sm:$0xff] }
 0x23d   : > { %2459 = vmatpush1.bf16.msra.mxu0 %v1565_v14  ;;  %2623 = vmatpush1.bf16.msra.mxu1 %v1567_v16  ;;  %v1709_v14 = vunpack.c.h.s8.bf16 %v813_v6  ;;  %v1711_v16 = vunpack.c.h.s8.bf16 %v815_v7 }
 0x23e   : > { %2460 = vmatprep.subr.bf16.mxu0 %v1582_v17  ;;  %2624 = vmatprep.subr.bf16.mxu1 %v1584_v18  ;;  %v1726_v17 = vunpack.c.l.s8.bf16 %v830_v12  ;;  %v1728_v18 = vunpack.c.l.s8.bf16 %v832_v13 }
 0x241   : > { %2461 = vmatpush1.bf16.msra.mxu0 %v1581_v21  ;;  %2625 = vmatpush1.bf16.msra.mxu1 %v1583_v24  ;;  %v1725_v21 = vunpack.c.l.s8.bf16 %v829_v19  ;;  %v1727_v24 = vunpack.c.l.s8.bf16 %v831_v20 }
 0x242   : > { %2462 = vmatprep.subr.bf16.mxu0 %v1598_v23  ;;  %2626 = vmatprep.subr.bf16.mxu1 %v1600_v25  ;;  %v1742_v23 = vunpack.c.h.s8.bf16 %v830_v12  ;;  %v1744_v25 = vunpack.c.h.s8.bf16 %v832_v13  ;;  %v1838_v12 = vunpack.c.h.s8.bf16 %v878_v56  ;;  %v1840_v13 = vunpack.c.h.s8.bf16 %v880_v57 }
 0x245   : > { %2463 = vmatpush1.bf16.msra.mxu0 %v1597_v27  ;;  %2627 = vmatpush1.bf16.msra.mxu1 %v1599_v28  ;;  %v1741_v27 = vunpack.c.h.s8.bf16 %v829_v19  ;;  %v1743_v28 = vunpack.c.h.s8.bf16 %v831_v20 }
 0x246   : > { %2464 = vmatprep.subr.bf16.mxu0 %v1614_v29  ;;  %2628 = vmatprep.subr.bf16.mxu1 %v1616_v30  ;;  %v1758_v29 = vunpack.c.l.s8.bf16 %v846_v26  ;;  %v1760_v30 = vunpack.c.l.s8.bf16 %v848_v44 }
 0x249   : > { %2465 = vmatpush1.bf16.msra.mxu0 %v1613_v34  ;;  %2629 = vmatpush1.bf16.msra.mxu1 %v1615_v35  ;;  %v1757_v34 = vunpack.c.l.s8.bf16 %v845_v32  ;;  %v1759_v35 = vunpack.c.l.s8.bf16 %v847_v33 }
 0x24a   : > { %2466 = vmatprep.subr.bf16.mxu0 %v1630_v36  ;;  %2630 = vmatprep.subr.bf16.mxu1 %v1632_v37  ;;  %v1774_v36 = vunpack.c.h.s8.bf16 %v846_v26  ;;  %v1776_v37 = vunpack.c.h.s8.bf16 %v848_v44 }
 0x24d   : > { %2467 = vmatpush1.bf16.msra.mxu0 %v1629_v42  ;;  %2631 = vmatpush1.bf16.msra.mxu1 %v1631_v43  ;;  %v1773_v42 = vunpack.c.h.s8.bf16 %v845_v32  ;;  %v1775_v43 = vunpack.c.h.s8.bf16 %v847_v33 }
 0x24e   : > { %2468 = vmatprep.subr.bf16.mxu0 %v1646_v45  ;;  %2632 = vmatprep.subr.bf16.mxu1 %v1648_v46  ;;  %v1790_v45 = vunpack.c.l.s8.bf16 %v862_v40  ;;  %v1792_v46 = vunpack.c.l.s8.bf16 %v864_v41 }
 0x251   : > { %2469 = vmatpush1.bf16.msra.mxu0 %v1645_v51  ;;  %2633 = vmatpush1.bf16.msra.mxu1 %v1647_v52  ;;  %v1789_v51 = vunpack.c.l.s8.bf16 %v861_v47  ;;  %v1791_v52 = vunpack.c.l.s8.bf16 %v863_v48 }
 0x252   : > { %2470 = vmatprep.subr.bf16.mxu0 %v1662_v54  ;;  %2634 = vmatprep.subr.bf16.mxu1 %v1664_v55  ;;  %v1806_v54 = vunpack.c.h.s8.bf16 %v862_v40  ;;  %v1808_v55 = vunpack.c.h.s8.bf16 %v864_v41 }
 0x255   : > { %2471 = vmatpush1.bf16.msra.mxu0 %v1661_v59  ;;  %2635 = vmatpush1.bf16.msra.mxu1 %v1663_v60  ;;  %v1805_v59 = vunpack.c.h.s8.bf16 %v861_v47  ;;  %v1807_v60 = vunpack.c.h.s8.bf16 %v863_v48 }
 0x256   : > { %2472 = vmatprep.subr.bf16.mxu0 %v1678_v50  ;;  %2636 = vmatprep.subr.bf16.mxu1 %v1680_v62  ;;  %v1822_v50 = vunpack.c.l.s8.bf16 %v878_v56  ;;  %v1824_v62 = vunpack.c.l.s8.bf16 %v880_v57 }
 0x259   : > { %2473 = vmatpush1.bf16.msra.mxu0 %v1677_v2  ;;  %2637 = vmatpush1.bf16.msra.mxu1 %v1679_v3 }
 0x25a   : > { %2474 = vmatprep.subr.bf16.mxu0 %v1694_v4  ;;  %2638 = vmatprep.subr.bf16.mxu1 %v1696_v5 }
 0x25d   : > { %2475 = vmatpush1.bf16.msra.mxu0 %v1693_v8  ;;  %2639 = vmatpush1.bf16.msra.mxu1 %v1695_v9  ;;  %v1821_v8 = vunpack.c.l.s8.bf16 %v877_v63  ;;  %v1823_v9 = vunpack.c.l.s8.bf16 %v879_v0 }
 0x25e   : > { %2476 = vmatprep.subr.bf16.mxu0 %v1710_v10  ;;  %2640 = vmatprep.subr.bf16.mxu1 %v1712_v11 }
 0x261   : > { %2477 = vmatpush1.bf16.msra.mxu0 %v1709_v14  ;;  %2641 = vmatpush1.bf16.msra.mxu1 %v1711_v16  ;;  %v894_v14 = vld [vmem:[%s4877_s1 + $0xe28] sm:$0xff]  ;;  %v896_v16 = vld [vmem:[%s4877_s1 + $0xe38] sm:$0xff] }
 0x262   : > { %2487 = vmatprep.subr.bf16.mxu0 %v1726_v17  ;;  %2651 = vmatprep.subr.bf16.mxu1 %v1728_v18  ;;  %v1837_v17 = vunpack.c.h.s8.bf16 %v877_v63  ;;  %v1839_v18 = vunpack.c.h.s8.bf16 %v879_v0  ;;  %v1854_v19 = vunpack.c.l.s8.bf16 %v894_v14  ;;  %v1856_v20 = vunpack.c.l.s8.bf16 %v896_v16 }
 0x263   : > { %v1870_v26 = vunpack.c.h.s8.bf16 %v894_v14  ;;  %v1872_v44 = vunpack.c.h.s8.bf16 %v896_v16 }
 0x264   : > { %2479 = vmatmul.mubr.bf16.vlgmr.msra.gmra.mrb[4].mxu0 %v5060_v15  ;;  %2643 = vmatmul.mubr.bf16.vlgmr.msra.gmra.mrb[4].mxu1 %v5060_v15 }
 0x265   : > { %2488 = vmatpush1.bf16.msra.mxu0 %v1725_v21  ;;  %2652 = vmatpush1.bf16.msra.mxu1 %v1727_v24  ;;  %v893_v21 = vld [vmem:[%s4877_s1 + $0xe20] sm:$0xff]  ;;  %v895_v24 = vld [vmem:[%s4877_s1 + $0xe30] sm:$0xff] }
 0x266   : > { %2489 = vmatprep.subr.bf16.mxu0 %v1742_v23  ;;  %2653 = vmatprep.subr.bf16.mxu1 %v1744_v25  ;;  %v1853_v23 = vunpack.c.l.s8.bf16 %v893_v21  ;;  %v1855_v25 = vunpack.c.l.s8.bf16 %v895_v24 }
 0x267   : > { %2519 = vmatprep.mubr.bf16.mxu0 %v5066_v22  ;;  %2683 = vmatprep.mubr.bf16.mxu1 %v5066_v22 }
 0x269   : > { %2490 = vmatpush1.bf16.msra.mxu0 %v1741_v27  ;;  %2654 = vmatpush1.bf16.msra.mxu1 %v1743_v28  ;;  %v910_v27 = vld [vmem:[%s4877_s1 + $0xea8] sm:$0xff]  ;;  %v912_v28 = vld [vmem:[%s4877_s1 + $0xeb8] sm:$0xff] }
 0x26a   : > { %2491 = vmatprep.subr.bf16.mxu0 %v1758_v29  ;;  %2655 = vmatprep.subr.bf16.mxu1 %v1760_v30  ;;  %v1869_v29 = vunpack.c.h.s8.bf16 %v893_v21  ;;  %v1871_v30 = vunpack.c.h.s8.bf16 %v895_v24  ;;  %v1886_v32 = vunpack.c.l.s8.bf16 %v910_v27  ;;  %v1888_v33 = vunpack.c.l.s8.bf16 %v912_v28 }
 0x26b   : > { %v1902_v40 = vunpack.c.h.s8.bf16 %v910_v27  ;;  %v1904_v41 = vunpack.c.h.s8.bf16 %v912_v28 }
 0x26d   : > { %2492 = vmatpush1.bf16.msra.mxu0 %v1757_v34  ;;  %2656 = vmatpush1.bf16.msra.mxu1 %v1759_v35  ;;  %v909_v34 = vld [vmem:[%s4877_s1 + $0xea0] sm:$0xff]  ;;  %v911_v35 = vld [vmem:[%s4877_s1 + $0xeb0] sm:$0xff] }
 0x26e   : > { %2493 = vmatprep.subr.bf16.mxu0 %v1774_v36  ;;  %2657 = vmatprep.subr.bf16.mxu1 %v1776_v37  ;;  %v1885_v36 = vunpack.c.l.s8.bf16 %v909_v34  ;;  %v1887_v37 = vunpack.c.l.s8.bf16 %v911_v35 }
 0x271   : > { %2494 = vmatpush1.bf16.msra.mxu0 %v1773_v42  ;;  %2658 = vmatpush1.bf16.msra.mxu1 %v1775_v43  ;;  %v926_v42 = vld [vmem:[%s4877_s1 + $0xf28] sm:$0xff]  ;;  %v928_v43 = vld [vmem:[%s4877_s1 + $0xf38] sm:$0xff] }
 0x272   : > { %2495 = vmatprep.subr.bf16.mxu0 %v1790_v45  ;;  %2659 = vmatprep.subr.bf16.mxu1 %v1792_v46  ;;  %v1901_v45 = vunpack.c.h.s8.bf16 %v909_v34  ;;  %v1903_v46 = vunpack.c.h.s8.bf16 %v911_v35  ;;  %v1918_v47 = vunpack.c.l.s8.bf16 %v926_v42  ;;  %v1920_v48 = vunpack.c.l.s8.bf16 %v928_v43 }
 0x273   : > { %v1934_v56 = vunpack.c.h.s8.bf16 %v926_v42  ;;  %v1936_v57 = vunpack.c.h.s8.bf16 %v928_v43 }
 0x275   : > { %2496 = vmatpush1.bf16.msra.mxu0 %v1789_v51  ;;  %2660 = vmatpush1.bf16.msra.mxu1 %v1791_v52  ;;  %v925_v51 = vld [vmem:[%s4877_s1 + $0xf20] sm:$0xff]  ;;  %v927_v52 = vld [vmem:[%s4877_s1 + $0xf30] sm:$0xff] }
 0x276   : > { %2497 = vmatprep.subr.bf16.mxu0 %v1806_v54  ;;  %2661 = vmatprep.subr.bf16.mxu1 %v1808_v55  ;;  %v1917_v54 = vunpack.c.l.s8.bf16 %v925_v51  ;;  %v1919_v55 = vunpack.c.l.s8.bf16 %v927_v52 }
 0x277   : > { %v5230_v2 = vpop.f32.mrb[0].mxu0  ;;  %v5232_v3 = vpop.f32.mrb[0].mxu1 }
 0x278   : > { %v5234_v4 = vpop.f32.mrb[1].mxu0  ;;  %v5236_v5 = vpop.f32.mrb[1].mxu1 }
 0x279   : > { %v2197_v6 = vpop.f32.mrb[2].mxu0  ;;  %v2361_v7 = vpop.f32.mrb[2].mxu1  ;;  %2498 = vmatpush1.bf16.msra.mxu0 %v1805_v59  ;;  %2662 = vmatpush1.bf16.msra.mxu1 %v1807_v60  ;;  %v942_v59 = vld [vmem:[%s4877_s1 + $0xfa8] sm:$0xff]  ;;  %v944_v60 = vld [vmem:[%s4877_s1 + $0xfb8] sm:$0xff] }
 0x27a   : > { %v2198_v10 = vpop.f32.mrb[3].mxu0  ;;  %v2362_v11 = vpop.f32.mrb[3].mxu1  ;;  %2499 = vmatprep.subr.bf16.mxu0 %v1822_v50  ;;  %2663 = vmatprep.subr.bf16.mxu1 %v1824_v62  ;;  %v1933_v50 = vunpack.c.h.s8.bf16 %v925_v51  ;;  %v1935_v62 = vunpack.c.h.s8.bf16 %v927_v52  ;;  %v1950_v63 = vunpack.c.l.s8.bf16 %v942_v59  ;;  %v1952_v0 = vunpack.c.l.s8.bf16 %v944_v60  ;;  %v941_v6 = vld [vmem:[%s4877_s1 + $0xfa0] sm:$0xff]  ;;  %v943_v7 = vld [vmem:[%s4877_s1 + $0xfb0] sm:$0xff] }
 0x27b   : > { %v1966_v10 = vunpack.c.h.s8.bf16 %v942_v59  ;;  %v1968_v11 = vunpack.c.h.s8.bf16 %v944_v60  ;;  %v1965_v14 = vunpack.c.h.s8.bf16 %v941_v6  ;;  %v1967_v16 = vunpack.c.h.s8.bf16 %v943_v7 }
 0x27d   : > { %2500 = vmatpush1.bf16.msra.mxu0 %v1821_v8  ;;  %2664 = vmatpush1.bf16.msra.mxu1 %v1823_v9  ;;  %v1949_v8 = vunpack.c.l.s8.bf16 %v941_v6  ;;  %v1951_v9 = vunpack.c.l.s8.bf16 %v943_v7 }
 0x27e   : > { %2501 = vmatprep.subr.bf16.mxu0 %v1838_v12  ;;  %2665 = vmatprep.subr.bf16.mxu1 %v1840_v13  ;;  %v450_v12 = vld [vmem:[%s4877_s1 + $0x48] sm:$0xff]  ;;  %v452_v13 = vld [vmem:[%s4877_s1 + $0x58] sm:$0xff] }
 0x281   : > { %2502 = vmatpush1.bf16.msra.mxu0 %v1837_v17  ;;  %2666 = vmatpush1.bf16.msra.mxu1 %v1839_v18  ;;  %v962_v17 = vunpack.c.l.s8.bf16 %v450_v12  ;;  %v964_v18 = vunpack.c.l.s8.bf16 %v452_v13 }
 0x282   : > { %2503 = vmatprep.subr.bf16.mxu0 %v1854_v19  ;;  %2667 = vmatprep.subr.bf16.mxu1 %v1856_v20  ;;  %v449_v19 = vld [vmem:[%s4877_s1 + $0x40] sm:$0xff]  ;;  %v451_v20 = vld [vmem:[%s4877_s1 + $0x50] sm:$0xff] }
 0x283   : > { %v961_v21 = vunpack.c.l.s8.bf16 %v449_v19  ;;  %v963_v24 = vunpack.c.l.s8.bf16 %v451_v20  ;;  %v977_v27 = vunpack.c.h.s8.bf16 %v449_v19  ;;  %v979_v28 = vunpack.c.h.s8.bf16 %v451_v20 }
 0x285   : > { %2504 = vmatpush1.bf16.msra.mxu0 %v1853_v23  ;;  %2668 = vmatpush1.bf16.msra.mxu1 %v1855_v25  ;;  %v978_v23 = vunpack.c.h.s8.bf16 %v450_v12  ;;  %v980_v25 = vunpack.c.h.s8.bf16 %v452_v13 }
 0x286   : > { %2505 = vmatprep.subr.bf16.mxu0 %v1870_v26  ;;  %2669 = vmatprep.subr.bf16.mxu1 %v1872_v44  ;;  %v466_v26 = vld [vmem:[%s4877_s1 + $0xc8] sm:$0xff]  ;;  %v468_v44 = vld [vmem:[%s4877_s1 + $0xd8] sm:$0xff] }
 0x289   : > { %2506 = vmatpush1.bf16.msra.mxu0 %v1869_v29  ;;  %2670 = vmatpush1.bf16.msra.mxu1 %v1871_v30  ;;  %v994_v29 = vunpack.c.l.s8.bf16 %v466_v26  ;;  %v996_v30 = vunpack.c.l.s8.bf16 %v468_v44 }
 0x28a   : > { %2507 = vmatprep.subr.bf16.mxu0 %v1886_v32  ;;  %2671 = vmatprep.subr.bf16.mxu1 %v1888_v33  ;;  %v465_v32 = vld [vmem:[%s4877_s1 + $0xc0] sm:$0xff]  ;;  %v467_v33 = vld [vmem:[%s4877_s1 + $0xd0] sm:$0xff] }
 0x28b   : > { %v993_v34 = vunpack.c.l.s8.bf16 %v465_v32  ;;  %v995_v35 = vunpack.c.l.s8.bf16 %v467_v33  ;;  %v1009_v42 = vunpack.c.h.s8.bf16 %v465_v32  ;;  %v1011_v43 = vunpack.c.h.s8.bf16 %v467_v33 }
 0x28d   : > { %2508 = vmatpush1.bf16.msra.mxu0 %v1885_v36  ;;  %2672 = vmatpush1.bf16.msra.mxu1 %v1887_v37  ;;  %v1010_v36 = vunpack.c.h.s8.bf16 %v466_v26  ;;  %v1012_v37 = vunpack.c.h.s8.bf16 %v468_v44 }
 0x28e   : > { %2509 = vmatprep.subr.bf16.mxu0 %v1902_v40  ;;  %2673 = vmatprep.subr.bf16.mxu1 %v1904_v41  ;;  %v482_v40 = vld [vmem:[%s4877_s1 + $0x148] sm:$0xff]  ;;  %v484_v41 = vld [vmem:[%s4877_s1 + $0x158] sm:$0xff] }
 0x291   : > { %2510 = vmatpush1.bf16.msra.mxu0 %v1901_v45  ;;  %2674 = vmatpush1.bf16.msra.mxu1 %v1903_v46  ;;  %v1026_v45 = vunpack.c.l.s8.bf16 %v482_v40  ;;  %v1028_v46 = vunpack.c.l.s8.bf16 %v484_v41 }
 0x292   : > { %2511 = vmatprep.subr.bf16.mxu0 %v1918_v47  ;;  %2675 = vmatprep.subr.bf16.mxu1 %v1920_v48  ;;  %v481_v47 = vld [vmem:[%s4877_s1 + $0x140] sm:$0xff]  ;;  %v483_v48 = vld [vmem:[%s4877_s1 + $0x150] sm:$0xff] }
 0x293   : > { %v1025_v51 = vunpack.c.l.s8.bf16 %v481_v47  ;;  %v1027_v52 = vunpack.c.l.s8.bf16 %v483_v48  ;;  %v1041_v59 = vunpack.c.h.s8.bf16 %v481_v47  ;;  %v1043_v60 = vunpack.c.h.s8.bf16 %v483_v48 }
 0x295   : > { %2512 = vmatpush1.bf16.msra.mxu0 %v1917_v54  ;;  %2676 = vmatpush1.bf16.msra.mxu1 %v1919_v55  ;;  %v1042_v54 = vunpack.c.h.s8.bf16 %v482_v40  ;;  %v1044_v55 = vunpack.c.h.s8.bf16 %v484_v41 }
 0x296   : > { %2513 = vmatprep.subr.bf16.mxu0 %v1934_v56  ;;  %2677 = vmatprep.subr.bf16.mxu1 %v1936_v57  ;;  %v498_v56 = vld [vmem:[%s4877_s1 + $0x1c8] sm:$0xff]  ;;  %v500_v57 = vld [vmem:[%s4877_s1 + $0x1d8] sm:$0xff] }
 0x299   : > { %2514 = vmatpush1.bf16.msra.mxu0 %v1933_v50  ;;  %2678 = vmatpush1.bf16.msra.mxu1 %v1935_v62  ;;  %v1058_v50 = vunpack.c.l.s8.bf16 %v498_v56  ;;  %v1060_v62 = vunpack.c.l.s8.bf16 %v500_v57 }
 0x29a   : > { %2515 = vmatprep.subr.bf16.mxu0 %v1950_v63  ;;  %2679 = vmatprep.subr.bf16.mxu1 %v1952_v0  ;;  %v497_v63 = vld [vmem:[%s4877_s1 + $0x1c0] sm:$0xff]  ;;  %v499_v0 = vld [vmem:[%s4877_s1 + $0x1d0] sm:$0xff] }
 0x29b   : > { %v1057_v6 = vunpack.c.l.s8.bf16 %v497_v63  ;;  %v1059_v7 = vunpack.c.l.s8.bf16 %v499_v0  ;;  %v1073_v12 = vunpack.c.h.s8.bf16 %v497_v63  ;;  %v1075_v13 = vunpack.c.h.s8.bf16 %v499_v0 }
 0x29d   : > { %2516 = vmatpush1.bf16.msra.mxu0 %v1949_v8  ;;  %2680 = vmatpush1.bf16.msra.mxu1 %v1951_v9  ;;  %v1074_v8 = vunpack.c.h.s8.bf16 %v498_v56  ;;  %v1076_v9 = vunpack.c.h.s8.bf16 %v500_v57 }
 0x29e   : > { %2517 = vmatprep.subr.bf16.mxu0 %v1966_v10  ;;  %2681 = vmatprep.subr.bf16.mxu1 %v1968_v11  ;;  %v514_v10 = vld [vmem:[%s4877_s1 + $0x248] sm:$0xff]  ;;  %v516_v11 = vld [vmem:[%s4877_s1 + $0x258] sm:$0xff] }
 0x2a1   : > { %2518 = vmatpush1.bf16.msra.mxu0 %v1965_v14  ;;  %2682 = vmatpush1.bf16.msra.mxu1 %v1967_v16  ;;  %v1090_v14 = vunpack.c.l.s8.bf16 %v514_v10  ;;  %v1092_v16 = vunpack.c.l.s8.bf16 %v516_v11 }
 0x2a2   : > { %2692 = vmatprep.subr.bf16.mxu0 %v962_v17  ;;  %2856 = vmatprep.subr.bf16.mxu1 %v964_v18  ;;  %v513_v17 = vld [vmem:[%s4877_s1 + $0x240] sm:$0xff]  ;;  %v515_v18 = vld [vmem:[%s4877_s1 + $0x250] sm:$0xff] }
 0x2a3   : > { %v1089_v19 = vunpack.c.l.s8.bf16 %v513_v17  ;;  %v1091_v20 = vunpack.c.l.s8.bf16 %v515_v18  ;;  %v1105_v26 = vunpack.c.h.s8.bf16 %v513_v17  ;;  %v1107_v44 = vunpack.c.h.s8.bf16 %v515_v18 }
 0x2a4   : > { %2520 = vmatmul.mubr.bf16.vlgmr.msra.gmra.mrb[4].mxu0 %v5104_v1  ;;  %2684 = vmatmul.mubr.bf16.vlgmr.msra.gmra.mrb[4].mxu1 %v5104_v1 }
 0x2a5   : > { %2693 = vmatpush1.bf16.msra.mxu0 %v961_v21  ;;  %2857 = vmatpush1.bf16.msra.mxu1 %v963_v24  ;;  %v1106_v21 = vunpack.c.h.s8.bf16 %v514_v10  ;;  %v1108_v24 = vunpack.c.h.s8.bf16 %v516_v11 }
 0x2a6   : > { %2694 = vmatprep.subr.bf16.mxu0 %v978_v23  ;;  %2858 = vmatprep.subr.bf16.mxu1 %v980_v25  ;;  %v530_v23 = vld [vmem:[%s4877_s1 + $0x2c8] sm:$0xff]  ;;  %v532_v25 = vld [vmem:[%s4877_s1 + $0x2d8] sm:$0xff] }
 0x2a7   : > { %2724 = vmatprep.mubr.bf16.mxu0 %v4942_v58  ;;  %2888 = vmatprep.mubr.bf16.mxu1 %v4942_v58 }
 0x2a9   : > { %2695 = vmatpush1.bf16.msra.mxu0 %v977_v27  ;;  %2859 = vmatpush1.bf16.msra.mxu1 %v979_v28  ;;  %v1122_v27 = vunpack.c.l.s8.bf16 %v530_v23  ;;  %v1124_v28 = vunpack.c.l.s8.bf16 %v532_v25 }
 0x2aa   : > { %2696 = vmatprep.subr.bf16.mxu0 %v994_v29  ;;  %2860 = vmatprep.subr.bf16.mxu1 %v996_v30  ;;  %v529_v29 = vld [vmem:[%s4877_s1 + $0x2c0] sm:$0xff]  ;;  %v531_v30 = vld [vmem:[%s4877_s1 + $0x2d0] sm:$0xff] }
 0x2ab   : > { %v1121_v32 = vunpack.c.l.s8.bf16 %v529_v29  ;;  %v1123_v33 = vunpack.c.l.s8.bf16 %v531_v30  ;;  %v1137_v40 = vunpack.c.h.s8.bf16 %v529_v29  ;;  %v1139_v41 = vunpack.c.h.s8.bf16 %v531_v30 }
 0x2ad   : > { %2697 = vmatpush1.bf16.msra.mxu0 %v993_v34  ;;  %2861 = vmatpush1.bf16.msra.mxu1 %v995_v35  ;;  %v1138_v34 = vunpack.c.h.s8.bf16 %v530_v23  ;;  %v1140_v35 = vunpack.c.h.s8.bf16 %v532_v25 }
 0x2ae   : > { %2698 = vmatprep.subr.bf16.mxu0 %v1010_v36  ;;  %2862 = vmatprep.subr.bf16.mxu1 %v1012_v37  ;;  %v546_v36 = vld [vmem:[%s4877_s1 + $0x348] sm:$0xff]  ;;  %v548_v37 = vld [vmem:[%s4877_s1 + $0x358] sm:$0xff] }
 0x2b1   : > { %2699 = vmatpush1.bf16.msra.mxu0 %v1009_v42  ;;  %2863 = vmatpush1.bf16.msra.mxu1 %v1011_v43  ;;  %v1154_v42 = vunpack.c.l.s8.bf16 %v546_v36  ;;  %v1156_v43 = vunpack.c.l.s8.bf16 %v548_v37 }
 0x2b2   : > { %2700 = vmatprep.subr.bf16.mxu0 %v1026_v45  ;;  %2864 = vmatprep.subr.bf16.mxu1 %v1028_v46  ;;  %v545_v45 = vld [vmem:[%s4877_s1 + $0x340] sm:$0xff]  ;;  %v547_v46 = vld [vmem:[%s4877_s1 + $0x350] sm:$0xff] }
 0x2b3   : > { %v1153_v47 = vunpack.c.l.s8.bf16 %v545_v45  ;;  %v1155_v48 = vunpack.c.l.s8.bf16 %v547_v46  ;;  %v1169_v56 = vunpack.c.h.s8.bf16 %v545_v45  ;;  %v1171_v57 = vunpack.c.h.s8.bf16 %v547_v46 }
 0x2b5   : > { %2701 = vmatpush1.bf16.msra.mxu0 %v1025_v51  ;;  %2865 = vmatpush1.bf16.msra.mxu1 %v1027_v52  ;;  %v1170_v51 = vunpack.c.h.s8.bf16 %v546_v36  ;;  %v1172_v52 = vunpack.c.h.s8.bf16 %v548_v37 }
 0x2b6   : > { %2702 = vmatprep.subr.bf16.mxu0 %v1042_v54  ;;  %2866 = vmatprep.subr.bf16.mxu1 %v1044_v55  ;;  %v562_v54 = vld [vmem:[%s4877_s1 + $0x3c8] sm:$0xff]  ;;  %v564_v55 = vld [vmem:[%s4877_s1 + $0x3d8] sm:$0xff] }
 0x2b9   : > { %2703 = vmatpush1.bf16.msra.mxu0 %v1041_v59  ;;  %2867 = vmatpush1.bf16.msra.mxu1 %v1043_v60  ;;  %v1186_v59 = vunpack.c.l.s8.bf16 %v562_v54  ;;  %v1188_v60 = vunpack.c.l.s8.bf16 %v564_v55 }
 0x2ba   : > { %2704 = vmatprep.subr.bf16.mxu0 %v1058_v50  ;;  %2868 = vmatprep.subr.bf16.mxu1 %v1060_v62  ;;  %v561_v50 = vld [vmem:[%s4877_s1 + $0x3c0] sm:$0xff]  ;;  %v563_v62 = vld [vmem:[%s4877_s1 + $0x3d0] sm:$0xff] }
 0x2bb   : > { %v1185_v63 = vunpack.c.l.s8.bf16 %v561_v50  ;;  %v1187_v0 = vunpack.c.l.s8.bf16 %v563_v62  ;;  %v1201_v10 = vunpack.c.h.s8.bf16 %v561_v50  ;;  %v1203_v11 = vunpack.c.h.s8.bf16 %v563_v62 }
 0x2bd   : > { %2705 = vmatpush1.bf16.msra.mxu0 %v1057_v6  ;;  %2869 = vmatpush1.bf16.msra.mxu1 %v1059_v7  ;;  %v1202_v6 = vunpack.c.h.s8.bf16 %v562_v54  ;;  %v1204_v7 = vunpack.c.h.s8.bf16 %v564_v55 }
 0x2be   : > { %2706 = vmatprep.subr.bf16.mxu0 %v1074_v8  ;;  %2870 = vmatprep.subr.bf16.mxu1 %v1076_v9  ;;  %v578_v8 = vld [vmem:[%s4877_s1 + $0x448] sm:$0xff]  ;;  %v580_v9 = vld [vmem:[%s4877_s1 + $0x458] sm:$0xff] }
 0x2c1   : > { %2707 = vmatpush1.bf16.msra.mxu0 %v1073_v12  ;;  %2871 = vmatpush1.bf16.msra.mxu1 %v1075_v13  ;;  %v1218_v12 = vunpack.c.l.s8.bf16 %v578_v8  ;;  %v1220_v13 = vunpack.c.l.s8.bf16 %v580_v9 }
 0x2c2   : > { %2708 = vmatprep.subr.bf16.mxu0 %v1090_v14  ;;  %2872 = vmatprep.subr.bf16.mxu1 %v1092_v16  ;;  %v577_v14 = vld [vmem:[%s4877_s1 + $0x440] sm:$0xff]  ;;  %v579_v16 = vld [vmem:[%s4877_s1 + $0x450] sm:$0xff] }
 0x2c3   : > { %v1217_v17 = vunpack.c.l.s8.bf16 %v577_v14  ;;  %v1219_v18 = vunpack.c.l.s8.bf16 %v579_v16  ;;  %v1233_v23 = vunpack.c.h.s8.bf16 %v577_v14  ;;  %v1235_v25 = vunpack.c.h.s8.bf16 %v579_v16 }
 0x2c5   : > { %2709 = vmatpush1.bf16.msra.mxu0 %v1089_v19  ;;  %2873 = vmatpush1.bf16.msra.mxu1 %v1091_v20  ;;  %v1234_v19 = vunpack.c.h.s8.bf16 %v578_v8  ;;  %v1236_v20 = vunpack.c.h.s8.bf16 %v580_v9 }
 0x2c6   : > { %2710 = vmatprep.subr.bf16.mxu0 %v1106_v21  ;;  %2874 = vmatprep.subr.bf16.mxu1 %v1108_v24  ;;  %v594_v21 = vld [vmem:[%s4877_s1 + $0x4c8] sm:$0xff]  ;;  %v596_v24 = vld [vmem:[%s4877_s1 + $0x4d8] sm:$0xff] }
 0x2c9   : > { %2711 = vmatpush1.bf16.msra.mxu0 %v1105_v26  ;;  %2875 = vmatpush1.bf16.msra.mxu1 %v1107_v44  ;;  %v1250_v26 = vunpack.c.l.s8.bf16 %v594_v21  ;;  %v1252_v44 = vunpack.c.l.s8.bf16 %v596_v24 }
 0x2ca   : > { %2712 = vmatprep.subr.bf16.mxu0 %v1122_v27  ;;  %2876 = vmatprep.subr.bf16.mxu1 %v1124_v28  ;;  %v593_v27 = vld [vmem:[%s4877_s1 + $0x4c0] sm:$0xff]  ;;  %v595_v28 = vld [vmem:[%s4877_s1 + $0x4d0] sm:$0xff] }
 0x2cb   : > { %v1249_v29 = vunpack.c.l.s8.bf16 %v593_v27  ;;  %v1251_v30 = vunpack.c.l.s8.bf16 %v595_v28  ;;  %v1265_v36 = vunpack.c.h.s8.bf16 %v593_v27  ;;  %v1267_v37 = vunpack.c.h.s8.bf16 %v595_v28 }
 0x2cd   : > { %2713 = vmatpush1.bf16.msra.mxu0 %v1121_v32  ;;  %2877 = vmatpush1.bf16.msra.mxu1 %v1123_v33  ;;  %v1266_v32 = vunpack.c.h.s8.bf16 %v594_v21  ;;  %v1268_v33 = vunpack.c.h.s8.bf16 %v596_v24 }
 0x2ce   : > { %2714 = vmatprep.subr.bf16.mxu0 %v1138_v34  ;;  %2878 = vmatprep.subr.bf16.mxu1 %v1140_v35  ;;  %v610_v34 = vld [vmem:[%s4877_s1 + $0x548] sm:$0xff]  ;;  %v612_v35 = vld [vmem:[%s4877_s1 + $0x558] sm:$0xff] }
 0x2d1   : > { %2715 = vmatpush1.bf16.msra.mxu0 %v1137_v40  ;;  %2879 = vmatpush1.bf16.msra.mxu1 %v1139_v41  ;;  %v1282_v40 = vunpack.c.l.s8.bf16 %v610_v34  ;;  %v1284_v41 = vunpack.c.l.s8.bf16 %v612_v35 }
 0x2d2   : > { %2716 = vmatprep.subr.bf16.mxu0 %v1154_v42  ;;  %2880 = vmatprep.subr.bf16.mxu1 %v1156_v43  ;;  %v609_v42 = vld [vmem:[%s4877_s1 + $0x540] sm:$0xff]  ;;  %v611_v43 = vld [vmem:[%s4877_s1 + $0x550] sm:$0xff] }
 0x2d3   : > { %v1281_v45 = vunpack.c.l.s8.bf16 %v609_v42  ;;  %v1283_v46 = vunpack.c.l.s8.bf16 %v611_v43  ;;  %v1297_v54 = vunpack.c.h.s8.bf16 %v609_v42  ;;  %v1299_v55 = vunpack.c.h.s8.bf16 %v611_v43 }
 0x2d5   : > { %2717 = vmatpush1.bf16.msra.mxu0 %v1153_v47  ;;  %2881 = vmatpush1.bf16.msra.mxu1 %v1155_v48  ;;  %v1298_v47 = vunpack.c.h.s8.bf16 %v610_v34  ;;  %v1300_v48 = vunpack.c.h.s8.bf16 %v612_v35 }
 0x2d6   : > { %2718 = vmatprep.subr.bf16.mxu0 %v1170_v51  ;;  %2882 = vmatprep.subr.bf16.mxu1 %v1172_v52  ;;  %v626_v51 = vld [vmem:[%s4877_s1 + $0x5c8] sm:$0xff]  ;;  %v628_v52 = vld [vmem:[%s4877_s1 + $0x5d8] sm:$0xff] }
 0x2d9   : > { %2719 = vmatpush1.bf16.msra.mxu0 %v1169_v56  ;;  %2883 = vmatpush1.bf16.msra.mxu1 %v1171_v57  ;;  %v1314_v56 = vunpack.c.l.s8.bf16 %v626_v51  ;;  %v1316_v57 = vunpack.c.l.s8.bf16 %v628_v52 }
 0x2da   : > { %2720 = vmatprep.subr.bf16.mxu0 %v1186_v59  ;;  %2884 = vmatprep.subr.bf16.mxu1 %v1188_v60  ;;  %v625_v59 = vld [vmem:[%s4877_s1 + $0x5c0] sm:$0xff]  ;;  %v627_v60 = vld [vmem:[%s4877_s1 + $0x5d0] sm:$0xff] }
 0x2db   : > { %v1313_v50 = vunpack.c.l.s8.bf16 %v625_v59  ;;  %v1315_v62 = vunpack.c.l.s8.bf16 %v627_v60  ;;  %v1329_v8 = vunpack.c.h.s8.bf16 %v625_v59  ;;  %v1331_v9 = vunpack.c.h.s8.bf16 %v627_v60 }
 0x2dd   : > { %2721 = vmatpush1.bf16.msra.mxu0 %v1185_v63  ;;  %2885 = vmatpush1.bf16.msra.mxu1 %v1187_v0  ;;  %v1330_v63 = vunpack.c.h.s8.bf16 %v626_v51  ;;  %v1332_v0 = vunpack.c.h.s8.bf16 %v628_v52 }
 0x2de   : > { %2722 = vmatprep.subr.bf16.mxu0 %v1202_v6  ;;  %2886 = vmatprep.subr.bf16.mxu1 %v1204_v7  ;;  %v642_v6 = vld [vmem:[%s4877_s1 + $0x648] sm:$0xff]  ;;  %v644_v7 = vld [vmem:[%s4877_s1 + $0x658] sm:$0xff] }
 0x2e1   : > { %2723 = vmatpush1.bf16.msra.mxu0 %v1201_v10  ;;  %2887 = vmatpush1.bf16.msra.mxu1 %v1203_v11  ;;  %v1346_v10 = vunpack.c.l.s8.bf16 %v642_v6  ;;  %v1348_v11 = vunpack.c.l.s8.bf16 %v644_v7 }
 0x2e2   : > { %2733 = vmatprep.subr.bf16.mxu0 %v1218_v12  ;;  %2897 = vmatprep.subr.bf16.mxu1 %v1220_v13  ;;  %v641_v12 = vld [vmem:[%s4877_s1 + $0x640] sm:$0xff]  ;;  %v643_v13 = vld [vmem:[%s4877_s1 + $0x650] sm:$0xff] }
 0x2e3   : > { %v1345_v14 = vunpack.c.l.s8.bf16 %v641_v12  ;;  %v1347_v16 = vunpack.c.l.s8.bf16 %v643_v13  ;;  %v1361_v21 = vunpack.c.h.s8.bf16 %v641_v12  ;;  %v1363_v24 = vunpack.c.h.s8.bf16 %v643_v13 }
 0x2e4   : > { %2725 = vmatmul.mubr.bf16.vlgmr.msra.gmra.mrb[8].mxu0 %v4966_v53  ;;  %2889 = vmatmul.mubr.bf16.vlgmr.msra.gmra.mrb[8].mxu1 %v4966_v53 }
 0x2e5   : > { %2734 = vmatpush1.bf16.msra.mxu0 %v1217_v17  ;;  %2898 = vmatpush1.bf16.msra.mxu1 %v1219_v18  ;;  %v1362_v17 = vunpack.c.h.s8.bf16 %v642_v6  ;;  %v1364_v18 = vunpack.c.h.s8.bf16 %v644_v7 }
 0x2e6   : > { %2735 = vmatprep.subr.bf16.mxu0 %v1234_v19  ;;  %2899 = vmatprep.subr.bf16.mxu1 %v1236_v20  ;;  %v658_v19 = vld [vmem:[%s4877_s1 + $0x6c8] sm:$0xff]  ;;  %v660_v20 = vld [vmem:[%s4877_s1 + $0x6d8] sm:$0xff] }
 0x2e7   : > { %2765 = vmatprep.mubr.bf16.mxu0 %v4972_v61  ;;  %2929 = vmatprep.mubr.bf16.mxu1 %v4972_v61 }
 0x2e9   : > { %2736 = vmatpush1.bf16.msra.mxu0 %v1233_v23  ;;  %2900 = vmatpush1.bf16.msra.mxu1 %v1235_v25  ;;  %v1378_v23 = vunpack.c.l.s8.bf16 %v658_v19  ;;  %v1380_v25 = vunpack.c.l.s8.bf16 %v660_v20 }
 0x2ea   : > { %2737 = vmatprep.subr.bf16.mxu0 %v1250_v26  ;;  %2901 = vmatprep.subr.bf16.mxu1 %v1252_v44  ;;  %v657_v26 = vld [vmem:[%s4877_s1 + $0x6c0] sm:$0xff]  ;;  %v659_v44 = vld [vmem:[%s4877_s1 + $0x6d0] sm:$0xff] }
 0x2eb   : > { %v1377_v27 = vunpack.c.l.s8.bf16 %v657_v26  ;;  %v1379_v28 = vunpack.c.l.s8.bf16 %v659_v44  ;;  %v1393_v34 = vunpack.c.h.s8.bf16 %v657_v26  ;;  %v1395_v35 = vunpack.c.h.s8.bf16 %v659_v44 }
 0x2ed   : > { %2738 = vmatpush1.bf16.msra.mxu0 %v1249_v29  ;;  %2902 = vmatpush1.bf16.msra.mxu1 %v1251_v30  ;;  %v1394_v29 = vunpack.c.h.s8.bf16 %v658_v19  ;;  %v1396_v30 = vunpack.c.h.s8.bf16 %v660_v20 }
 0x2ee   : > { %2739 = vmatprep.subr.bf16.mxu0 %v1266_v32  ;;  %2903 = vmatprep.subr.bf16.mxu1 %v1268_v33  ;;  %v674_v32 = vld [vmem:[%s4877_s1 + $0x748] sm:$0xff]  ;;  %v676_v33 = vld [vmem:[%s4877_s1 + $0x758] sm:$0xff] }
 0x2f1   : > { %2740 = vmatpush1.bf16.msra.mxu0 %v1265_v36  ;;  %2904 = vmatpush1.bf16.msra.mxu1 %v1267_v37  ;;  %v1410_v36 = vunpack.c.l.s8.bf16 %v674_v32  ;;  %v1412_v37 = vunpack.c.l.s8.bf16 %v676_v33 }
 0x2f2   : > { %2741 = vmatprep.subr.bf16.mxu0 %v1282_v40  ;;  %2905 = vmatprep.subr.bf16.mxu1 %v1284_v41  ;;  %v673_v40 = vld [vmem:[%s4877_s1 + $0x740] sm:$0xff]  ;;  %v675_v41 = vld [vmem:[%s4877_s1 + $0x750] sm:$0xff] }
 0x2f3   : > { %v1409_v42 = vunpack.c.l.s8.bf16 %v673_v40  ;;  %v1411_v43 = vunpack.c.l.s8.bf16 %v675_v41  ;;  %v1425_v51 = vunpack.c.h.s8.bf16 %v673_v40  ;;  %v1427_v52 = vunpack.c.h.s8.bf16 %v675_v41 }
 0x2f5   : > { %2742 = vmatpush1.bf16.msra.mxu0 %v1281_v45  ;;  %2906 = vmatpush1.bf16.msra.mxu1 %v1283_v46  ;;  %v1426_v45 = vunpack.c.h.s8.bf16 %v674_v32  ;;  %v1428_v46 = vunpack.c.h.s8.bf16 %v676_v33 }
 0x2f6   : > { %2743 = vmatprep.subr.bf16.mxu0 %v1298_v47  ;;  %2907 = vmatprep.subr.bf16.mxu1 %v1300_v48  ;;  %v690_v47 = vld [vmem:[%s4877_s1 + $0x7c8] sm:$0xff]  ;;  %v692_v48 = vld [vmem:[%s4877_s1 + $0x7d8] sm:$0xff] }
 0x2f9   : > { %2744 = vmatpush1.bf16.msra.mxu0 %v1297_v54  ;;  %2908 = vmatpush1.bf16.msra.mxu1 %v1299_v55  ;;  %v1442_v54 = vunpack.c.l.s8.bf16 %v690_v47  ;;  %v1444_v55 = vunpack.c.l.s8.bf16 %v692_v48 }
 0x2fa   : > { %2745 = vmatprep.subr.bf16.mxu0 %v1314_v56  ;;  %2909 = vmatprep.subr.bf16.mxu1 %v1316_v57  ;;  %v689_v56 = vld [vmem:[%s4877_s1 + $0x7c0] sm:$0xff]  ;;  %v691_v57 = vld [vmem:[%s4877_s1 + $0x7d0] sm:$0xff] }
 0x2fb   : > { %v1441_v59 = vunpack.c.l.s8.bf16 %v689_v56  ;;  %v1443_v60 = vunpack.c.l.s8.bf16 %v691_v57  ;;  %v1457_v6 = vunpack.c.h.s8.bf16 %v689_v56  ;;  %v1459_v7 = vunpack.c.h.s8.bf16 %v691_v57 }
 0x2fd   : > { %2746 = vmatpush1.bf16.msra.mxu0 %v1313_v50  ;;  %2910 = vmatpush1.bf16.msra.mxu1 %v1315_v62  ;;  %v1458_v50 = vunpack.c.h.s8.bf16 %v690_v47  ;;  %v1460_v62 = vunpack.c.h.s8.bf16 %v692_v48 }
 0x2fe   : > { %2747 = vmatprep.subr.bf16.mxu0 %v1330_v63  ;;  %2911 = vmatprep.subr.bf16.mxu1 %v1332_v0  ;;  %v706_v63 = vld [vmem:[%s4877_s1 + $0x848] sm:$0xff]  ;;  %v708_v0 = vld [vmem:[%s4877_s1 + $0x858] sm:$0xff] }
 0x301   : > { %2748 = vmatpush1.bf16.msra.mxu0 %v1329_v8  ;;  %2912 = vmatpush1.bf16.msra.mxu1 %v1331_v9  ;;  %v1474_v8 = vunpack.c.l.s8.bf16 %v706_v63  ;;  %v1476_v9 = vunpack.c.l.s8.bf16 %v708_v0 }
 0x302   : > { %2749 = vmatprep.subr.bf16.mxu0 %v1346_v10  ;;  %2913 = vmatprep.subr.bf16.mxu1 %v1348_v11  ;;  %v705_v10 = vld [vmem:[%s4877_s1 + $0x840] sm:$0xff]  ;;  %v707_v11 = vld [vmem:[%s4877_s1 + $0x850] sm:$0xff] }
 0x303   : > { %v1473_v12 = vunpack.c.l.s8.bf16 %v705_v10  ;;  %v1475_v13 = vunpack.c.l.s8.bf16 %v707_v11  ;;  %v1489_v19 = vunpack.c.h.s8.bf16 %v705_v10  ;;  %v1491_v20 = vunpack.c.h.s8.bf16 %v707_v11 }
 0x305   : > { %2750 = vmatpush1.bf16.msra.mxu0 %v1345_v14  ;;  %2914 = vmatpush1.bf16.msra.mxu1 %v1347_v16  ;;  %v1490_v14 = vunpack.c.h.s8.bf16 %v706_v63  ;;  %v1492_v16 = vunpack.c.h.s8.bf16 %v708_v0 }
 0x306   : > { %2751 = vmatprep.subr.bf16.mxu0 %v1362_v17  ;;  %2915 = vmatprep.subr.bf16.mxu1 %v1364_v18  ;;  %v722_v17 = vld [vmem:[%s4877_s1 + $0x8c8] sm:$0xff]  ;;  %v724_v18 = vld [vmem:[%s4877_s1 + $0x8d8] sm:$0xff] }
 0x309   : > { %2752 = vmatpush1.bf16.msra.mxu0 %v1361_v21  ;;  %2916 = vmatpush1.bf16.msra.mxu1 %v1363_v24  ;;  %v1506_v21 = vunpack.c.l.s8.bf16 %v722_v17  ;;  %v1508_v24 = vunpack.c.l.s8.bf16 %v724_v18 }
 0x30a   : > { %2753 = vmatprep.subr.bf16.mxu0 %v1378_v23  ;;  %2917 = vmatprep.subr.bf16.mxu1 %v1380_v25  ;;  %v721_v23 = vld [vmem:[%s4877_s1 + $0x8c0] sm:$0xff]  ;;  %v723_v25 = vld [vmem:[%s4877_s1 + $0x8d0] sm:$0xff] }
 0x30b   : > { %v1505_v26 = vunpack.c.l.s8.bf16 %v721_v23  ;;  %v1507_v44 = vunpack.c.l.s8.bf16 %v723_v25  ;;  %v1521_v32 = vunpack.c.h.s8.bf16 %v721_v23  ;;  %v1523_v33 = vunpack.c.h.s8.bf16 %v723_v25 }
 0x30d   : > { %2754 = vmatpush1.bf16.msra.mxu0 %v1377_v27  ;;  %2918 = vmatpush1.bf16.msra.mxu1 %v1379_v28  ;;  %v1522_v27 = vunpack.c.h.s8.bf16 %v722_v17  ;;  %v1524_v28 = vunpack.c.h.s8.bf16 %v724_v18 }
 0x30e   : > { %2755 = vmatprep.subr.bf16.mxu0 %v1394_v29  ;;  %2919 = vmatprep.subr.bf16.mxu1 %v1396_v30  ;;  %v738_v29 = vld [vmem:[%s4877_s1 + $0x948] sm:$0xff]  ;;  %v740_v30 = vld [vmem:[%s4877_s1 + $0x958] sm:$0xff] }
 0x311   : > { %2756 = vmatpush1.bf16.msra.mxu0 %v1393_v34  ;;  %2920 = vmatpush1.bf16.msra.mxu1 %v1395_v35  ;;  %v1538_v34 = vunpack.c.l.s8.bf16 %v738_v29  ;;  %v1540_v35 = vunpack.c.l.s8.bf16 %v740_v30 }
 0x312   : > { %2757 = vmatprep.subr.bf16.mxu0 %v1410_v36  ;;  %2921 = vmatprep.subr.bf16.mxu1 %v1412_v37  ;;  %v737_v36 = vld [vmem:[%s4877_s1 + $0x940] sm:$0xff]  ;;  %v739_v37 = vld [vmem:[%s4877_s1 + $0x950] sm:$0xff] }
 0x313   : > { %v1537_v40 = vunpack.c.l.s8.bf16 %v737_v36  ;;  %v1539_v41 = vunpack.c.l.s8.bf16 %v739_v37  ;;  %v1553_v47 = vunpack.c.h.s8.bf16 %v737_v36  ;;  %v1555_v48 = vunpack.c.h.s8.bf16 %v739_v37 }
 0x315   : > { %2758 = vmatpush1.bf16.msra.mxu0 %v1409_v42  ;;  %2922 = vmatpush1.bf16.msra.mxu1 %v1411_v43  ;;  %v1554_v42 = vunpack.c.h.s8.bf16 %v738_v29  ;;  %v1556_v43 = vunpack.c.h.s8.bf16 %v740_v30 }
 0x316   : > { %2759 = vmatprep.subr.bf16.mxu0 %v1426_v45  ;;  %2923 = vmatprep.subr.bf16.mxu1 %v1428_v46  ;;  %v754_v45 = vld [vmem:[%s4877_s1 + $0x9c8] sm:$0xff]  ;;  %v756_v46 = vld [vmem:[%s4877_s1 + $0x9d8] sm:$0xff] }
 0x319   : > { %2760 = vmatpush1.bf16.msra.mxu0 %v1425_v51  ;;  %2924 = vmatpush1.bf16.msra.mxu1 %v1427_v52  ;;  %v1570_v51 = vunpack.c.l.s8.bf16 %v754_v45  ;;  %v1572_v52 = vunpack.c.l.s8.bf16 %v756_v46 }
 0x31a   : > { %2761 = vmatprep.subr.bf16.mxu0 %v1442_v54  ;;  %2925 = vmatprep.subr.bf16.mxu1 %v1444_v55  ;;  %v753_v54 = vld [vmem:[%s4877_s1 + $0x9c0] sm:$0xff]  ;;  %v755_v55 = vld [vmem:[%s4877_s1 + $0x9d0] sm:$0xff] }
 0x31b   : > { %v1569_v56 = vunpack.c.l.s8.bf16 %v753_v54  ;;  %v1571_v57 = vunpack.c.l.s8.bf16 %v755_v55  ;;  %v1585_v63 = vunpack.c.h.s8.bf16 %v753_v54  ;;  %v1587_v0 = vunpack.c.h.s8.bf16 %v755_v55 }
 0x31d   : > { %2762 = vmatpush1.bf16.msra.mxu0 %v1441_v59  ;;  %2926 = vmatpush1.bf16.msra.mxu1 %v1443_v60  ;;  %v1586_v59 = vunpack.c.h.s8.bf16 %v754_v45  ;;  %v1588_v60 = vunpack.c.h.s8.bf16 %v756_v46 }
 0x31e   : > { %2763 = vmatprep.subr.bf16.mxu0 %v1458_v50  ;;  %2927 = vmatprep.subr.bf16.mxu1 %v1460_v62  ;;  %v770_v50 = vld [vmem:[%s4877_s1 + $0xa48] sm:$0xff]  ;;  %v772_v62 = vld [vmem:[%s4877_s1 + $0xa58] sm:$0xff] }
 0x321   : > { %2764 = vmatpush1.bf16.msra.mxu0 %v1457_v6  ;;  %2928 = vmatpush1.bf16.msra.mxu1 %v1459_v7  ;;  %v1602_v6 = vunpack.c.l.s8.bf16 %v770_v50  ;;  %v1604_v7 = vunpack.c.l.s8.bf16 %v772_v62 }
 0x322   : > { %2774 = vmatprep.subr.bf16.mxu0 %v1474_v8  ;;  %2938 = vmatprep.subr.bf16.mxu1 %v1476_v9  ;;  %v769_v8 = vld [vmem:[%s4877_s1 + $0xa40] sm:$0xff]  ;;  %v771_v9 = vld [vmem:[%s4877_s1 + $0xa50] sm:$0xff] }
 0x323   : > { %v1601_v10 = vunpack.c.l.s8.bf16 %v769_v8  ;;  %v1603_v11 = vunpack.c.l.s8.bf16 %v771_v9  ;;  %v1617_v17 = vunpack.c.h.s8.bf16 %v769_v8  ;;  %v1619_v18 = vunpack.c.h.s8.bf16 %v771_v9 }
 0x324   : > { %2766 = vmatmul.mubr.bf16.vlgmr.msra.gmra.mrb[8].mxu0 %v5017_v31  ;;  %2930 = vmatmul.mubr.bf16.vlgmr.msra.gmra.mrb[8].mxu1 %v5017_v31 }
 0x325   : > { %2775 = vmatpush1.bf16.msra.mxu0 %v1473_v12  ;;  %2939 = vmatpush1.bf16.msra.mxu1 %v1475_v13  ;;  %v1618_v12 = vunpack.c.h.s8.bf16 %v770_v50  ;;  %v1620_v13 = vunpack.c.h.s8.bf16 %v772_v62 }
 0x326   : > { %2776 = vmatprep.subr.bf16.mxu0 %v1490_v14  ;;  %2940 = vmatprep.subr.bf16.mxu1 %v1492_v16  ;;  %v786_v14 = vld [vmem:[%s4877_s1 + $0xac8] sm:$0xff]  ;;  %v788_v16 = vld [vmem:[%s4877_s1 + $0xad8] sm:$0xff] }
 0x327   : > { %2806 = vmatprep.mubr.bf16.mxu0 %v5022_v39  ;;  %2970 = vmatprep.mubr.bf16.mxu1 %v5022_v39 }
 0x329   : > { %2777 = vmatpush1.bf16.msra.mxu0 %v1489_v19  ;;  %2941 = vmatpush1.bf16.msra.mxu1 %v1491_v20  ;;  %v1634_v19 = vunpack.c.l.s8.bf16 %v786_v14  ;;  %v1636_v20 = vunpack.c.l.s8.bf16 %v788_v16 }
 0x32a   : > { %2778 = vmatprep.subr.bf16.mxu0 %v1506_v21  ;;  %2942 = vmatprep.subr.bf16.mxu1 %v1508_v24  ;;  %v785_v21 = vld [vmem:[%s4877_s1 + $0xac0] sm:$0xff]  ;;  %v787_v24 = vld [vmem:[%s4877_s1 + $0xad0] sm:$0xff] }
 0x32b   : > { %v1633_v23 = vunpack.c.l.s8.bf16 %v785_v21  ;;  %v1635_v25 = vunpack.c.l.s8.bf16 %v787_v24  ;;  %v1649_v29 = vunpack.c.h.s8.bf16 %v785_v21  ;;  %v1651_v30 = vunpack.c.h.s8.bf16 %v787_v24 }
 0x32d   : > { %2779 = vmatpush1.bf16.msra.mxu0 %v1505_v26  ;;  %2943 = vmatpush1.bf16.msra.mxu1 %v1507_v44  ;;  %v1650_v26 = vunpack.c.h.s8.bf16 %v786_v14  ;;  %v1652_v44 = vunpack.c.h.s8.bf16 %v788_v16 }
 0x32e   : > { %2780 = vmatprep.subr.bf16.mxu0 %v1522_v27  ;;  %2944 = vmatprep.subr.bf16.mxu1 %v1524_v28  ;;  %v802_v27 = vld [vmem:[%s4877_s1 + $0xb48] sm:$0xff]  ;;  %v804_v28 = vld [vmem:[%s4877_s1 + $0xb58] sm:$0xff] }
 0x331   : > { %2781 = vmatpush1.bf16.msra.mxu0 %v1521_v32  ;;  %2945 = vmatpush1.bf16.msra.mxu1 %v1523_v33  ;;  %v1666_v32 = vunpack.c.l.s8.bf16 %v802_v27  ;;  %v1668_v33 = vunpack.c.l.s8.bf16 %v804_v28 }
 0x332   : > { %2782 = vmatprep.subr.bf16.mxu0 %v1538_v34  ;;  %2946 = vmatprep.subr.bf16.mxu1 %v1540_v35  ;;  %v801_v34 = vld [vmem:[%s4877_s1 + $0xb40] sm:$0xff]  ;;  %v803_v35 = vld [vmem:[%s4877_s1 + $0xb50] sm:$0xff] }
 0x333   : > { %v1665_v36 = vunpack.c.l.s8.bf16 %v801_v34  ;;  %v1667_v37 = vunpack.c.l.s8.bf16 %v803_v35  ;;  %v1681_v45 = vunpack.c.h.s8.bf16 %v801_v34  ;;  %v1683_v46 = vunpack.c.h.s8.bf16 %v803_v35 }
 0x335   : > { %2783 = vmatpush1.bf16.msra.mxu0 %v1537_v40  ;;  %2947 = vmatpush1.bf16.msra.mxu1 %v1539_v41  ;;  %v1682_v40 = vunpack.c.h.s8.bf16 %v802_v27  ;;  %v1684_v41 = vunpack.c.h.s8.bf16 %v804_v28 }
 0x336   : > { %2784 = vmatprep.subr.bf16.mxu0 %v1554_v42  ;;  %2948 = vmatprep.subr.bf16.mxu1 %v1556_v43  ;;  %v818_v42 = vld [vmem:[%s4877_s1 + $0xbc8] sm:$0xff]  ;;  %v820_v43 = vld [vmem:[%s4877_s1 + $0xbd8] sm:$0xff] }
 0x339   : > { %2785 = vmatpush1.bf16.msra.mxu0 %v1553_v47  ;;  %2949 = vmatpush1.bf16.msra.mxu1 %v1555_v48  ;;  %v1698_v47 = vunpack.c.l.s8.bf16 %v818_v42  ;;  %v1700_v48 = vunpack.c.l.s8.bf16 %v820_v43 }
 0x33a   : > { %2786 = vmatprep.subr.bf16.mxu0 %v1570_v51  ;;  %2950 = vmatprep.subr.bf16.mxu1 %v1572_v52  ;;  %v817_v51 = vld [vmem:[%s4877_s1 + $0xbc0] sm:$0xff]  ;;  %v819_v52 = vld [vmem:[%s4877_s1 + $0xbd0] sm:$0xff] }
 0x33b   : > { %v1697_v54 = vunpack.c.l.s8.bf16 %v817_v51  ;;  %v1699_v55 = vunpack.c.l.s8.bf16 %v819_v52  ;;  %v1713_v50 = vunpack.c.h.s8.bf16 %v817_v51  ;;  %v1715_v62 = vunpack.c.h.s8.bf16 %v819_v52 }
 0x33d   : > { %2787 = vmatpush1.bf16.msra.mxu0 %v1569_v56  ;;  %2951 = vmatpush1.bf16.msra.mxu1 %v1571_v57  ;;  %v1714_v56 = vunpack.c.h.s8.bf16 %v818_v42  ;;  %v1716_v57 = vunpack.c.h.s8.bf16 %v820_v43 }
 0x33e   : > { %2788 = vmatprep.subr.bf16.mxu0 %v1586_v59  ;;  %2952 = vmatprep.subr.bf16.mxu1 %v1588_v60  ;;  %v834_v59 = vld [vmem:[%s4877_s1 + $0xc48] sm:$0xff]  ;;  %v836_v60 = vld [vmem:[%s4877_s1 + $0xc58] sm:$0xff] }
 0x341   : > { %2789 = vmatpush1.bf16.msra.mxu0 %v1585_v63  ;;  %2953 = vmatpush1.bf16.msra.mxu1 %v1587_v0  ;;  %v1730_v63 = vunpack.c.l.s8.bf16 %v834_v59  ;;  %v1732_v0 = vunpack.c.l.s8.bf16 %v836_v60 }
 0x342   : > { %2790 = vmatprep.subr.bf16.mxu0 %v1602_v6  ;;  %2954 = vmatprep.subr.bf16.mxu1 %v1604_v7  ;;  %v833_v6 = vld [vmem:[%s4877_s1 + $0xc40] sm:$0xff]  ;;  %v835_v7 = vld [vmem:[%s4877_s1 + $0xc50] sm:$0xff] }
 0x343   : > { %v1729_v8 = vunpack.c.l.s8.bf16 %v833_v6  ;;  %v1731_v9 = vunpack.c.l.s8.bf16 %v835_v7  ;;  %v1745_v14 = vunpack.c.h.s8.bf16 %v833_v6  ;;  %v1747_v16 = vunpack.c.h.s8.bf16 %v835_v7  ;;  %v898_v6 = vld [vmem:[%s4877_s1 + $0xe48] sm:$0xff]  ;;  %v900_v7 = vld [vmem:[%s4877_s1 + $0xe58] sm:$0xff] }
 0x345   : > { %2791 = vmatpush1.bf16.msra.mxu0 %v1601_v10  ;;  %2955 = vmatpush1.bf16.msra.mxu1 %v1603_v11  ;;  %v1746_v10 = vunpack.c.h.s8.bf16 %v834_v59  ;;  %v1748_v11 = vunpack.c.h.s8.bf16 %v836_v60 }
 0x346   : > { %2792 = vmatprep.subr.bf16.mxu0 %v1618_v12  ;;  %2956 = vmatprep.subr.bf16.mxu1 %v1620_v13  ;;  %v850_v12 = vld [vmem:[%s4877_s1 + $0xcc8] sm:$0xff]  ;;  %v852_v13 = vld [vmem:[%s4877_s1 + $0xcd8] sm:$0xff] }
 0x349   : > { %2793 = vmatpush1.bf16.msra.mxu0 %v1617_v17  ;;  %2957 = vmatpush1.bf16.msra.mxu1 %v1619_v18  ;;  %v1762_v17 = vunpack.c.l.s8.bf16 %v850_v12  ;;  %v1764_v18 = vunpack.c.l.s8.bf16 %v852_v13 }
 0x34a   : > { %2794 = vmatprep.subr.bf16.mxu0 %v1634_v19  ;;  %2958 = vmatprep.subr.bf16.mxu1 %v1636_v20  ;;  %v849_v19 = vld [vmem:[%s4877_s1 + $0xcc0] sm:$0xff]  ;;  %v851_v20 = vld [vmem:[%s4877_s1 + $0xcd0] sm:$0xff] }
 0x34b   : > { %v1761_v21 = vunpack.c.l.s8.bf16 %v849_v19  ;;  %v1763_v24 = vunpack.c.l.s8.bf16 %v851_v20  ;;  %v1777_v27 = vunpack.c.h.s8.bf16 %v849_v19  ;;  %v1779_v28 = vunpack.c.h.s8.bf16 %v851_v20  ;;  %v914_v19 = vld [vmem:[%s4877_s1 + $0xec8] sm:$0xff]  ;;  %v916_v20 = vld [vmem:[%s4877_s1 + $0xed8] sm:$0xff] }
 0x34d   : > { %2795 = vmatpush1.bf16.msra.mxu0 %v1633_v23  ;;  %2959 = vmatpush1.bf16.msra.mxu1 %v1635_v25  ;;  %v1778_v23 = vunpack.c.h.s8.bf16 %v850_v12  ;;  %v1780_v25 = vunpack.c.h.s8.bf16 %v852_v13  ;;  %v897_v12 = vld [vmem:[%s4877_s1 + $0xe40] sm:$0xff]  ;;  %v899_v13 = vld [vmem:[%s4877_s1 + $0xe50] sm:$0xff] }
 0x34e   : > { %2796 = vmatprep.subr.bf16.mxu0 %v1650_v26  ;;  %2960 = vmatprep.subr.bf16.mxu1 %v1652_v44  ;;  %v866_v26 = vld [vmem:[%s4877_s1 + $0xd48] sm:$0xff]  ;;  %v868_v44 = vld [vmem:[%s4877_s1 + $0xd58] sm:$0xff] }
 0x351   : > { %2797 = vmatpush1.bf16.msra.mxu0 %v1649_v29  ;;  %2961 = vmatpush1.bf16.msra.mxu1 %v1651_v30  ;;  %v1794_v29 = vunpack.c.l.s8.bf16 %v866_v26  ;;  %v1796_v30 = vunpack.c.l.s8.bf16 %v868_v44 }
 0x352   : > { %2798 = vmatprep.subr.bf16.mxu0 %v1666_v32  ;;  %2962 = vmatprep.subr.bf16.mxu1 %v1668_v33  ;;  %v865_v32 = vld [vmem:[%s4877_s1 + $0xd40] sm:$0xff]  ;;  %v867_v33 = vld [vmem:[%s4877_s1 + $0xd50] sm:$0xff] }
 0x353   : > { %v1793_v34 = vunpack.c.l.s8.bf16 %v865_v32  ;;  %v1795_v35 = vunpack.c.l.s8.bf16 %v867_v33  ;;  %v1809_v42 = vunpack.c.h.s8.bf16 %v865_v32  ;;  %v1811_v43 = vunpack.c.h.s8.bf16 %v867_v33  ;;  %v930_v32 = vld [vmem:[%s4877_s1 + $0xf48] sm:$0xff]  ;;  %v932_v33 = vld [vmem:[%s4877_s1 + $0xf58] sm:$0xff] }
 0x355   : > { %2799 = vmatpush1.bf16.msra.mxu0 %v1665_v36  ;;  %2963 = vmatpush1.bf16.msra.mxu1 %v1667_v37  ;;  %v1810_v36 = vunpack.c.h.s8.bf16 %v866_v26  ;;  %v1812_v37 = vunpack.c.h.s8.bf16 %v868_v44  ;;  %v913_v26 = vld [vmem:[%s4877_s1 + $0xec0] sm:$0xff]  ;;  %v915_v44 = vld [vmem:[%s4877_s1 + $0xed0] sm:$0xff] }
 0x356   : > { %2800 = vmatprep.subr.bf16.mxu0 %v1682_v40  ;;  %2964 = vmatprep.subr.bf16.mxu1 %v1684_v41  ;;  %v882_v40 = vld [vmem:[%s4877_s1 + $0xdc8] sm:$0xff]  ;;  %v884_v41 = vld [vmem:[%s4877_s1 + $0xdd8] sm:$0xff] }
 0x359   : > { %2801 = vmatpush1.bf16.msra.mxu0 %v1681_v45  ;;  %2965 = vmatpush1.bf16.msra.mxu1 %v1683_v46  ;;  %v1826_v45 = vunpack.c.l.s8.bf16 %v882_v40  ;;  %v1828_v46 = vunpack.c.l.s8.bf16 %v884_v41 }
 0x35a   : > { %2802 = vmatprep.subr.bf16.mxu0 %v1698_v47  ;;  %2966 = vmatprep.subr.bf16.mxu1 %v1700_v48  ;;  %v881_v47 = vld [vmem:[%s4877_s1 + $0xdc0] sm:$0xff]  ;;  %v883_v48 = vld [vmem:[%s4877_s1 + $0xdd0] sm:$0xff] }
 0x35b   : > { %v1825_v59 = vunpack.c.l.s8.bf16 %v881_v47  ;;  %v1827_v60 = vunpack.c.l.s8.bf16 %v883_v48 }
 0x35d   : > { %2803 = vmatpush1.bf16.msra.mxu0 %v1697_v54  ;;  %2967 = vmatpush1.bf16.msra.mxu1 %v1699_v55 }
 0x35e   : > { %2804 = vmatprep.subr.bf16.mxu0 %v1714_v56  ;;  %2968 = vmatprep.subr.bf16.mxu1 %v1716_v57 }
 0x361   : > { %2805 = vmatpush1.bf16.msra.mxu0 %v1713_v50  ;;  %2969 = vmatpush1.bf16.msra.mxu1 %v1715_v62 }
 0x362   : > { %2815 = vmatprep.subr.bf16.mxu0 %v1730_v63  ;;  %2979 = vmatprep.subr.bf16.mxu1 %v1732_v0  ;;  %v1842_v63 = vunpack.c.h.s8.bf16 %v882_v40  ;;  %v1844_v0 = vunpack.c.h.s8.bf16 %v884_v41  ;;  %v929_v40 = vld [vmem:[%s4877_s1 + $0xf40] sm:$0xff]  ;;  %v931_v41 = vld [vmem:[%s4877_s1 + $0xf50] sm:$0xff] }
 0x364   : > { %2807 = vmatmul.mubr.bf16.vlgmr.msra.gmra.mrb[8].mxu0 %v5060_v15  ;;  %2971 = vmatmul.mubr.bf16.vlgmr.msra.gmra.mrb[8].mxu1 %v5060_v15 }
 0x365   : > { %2816 = vmatpush1.bf16.msra.mxu0 %v1729_v8  ;;  %2980 = vmatpush1.bf16.msra.mxu1 %v1731_v9  ;;  %v1841_v8 = vunpack.c.h.s8.bf16 %v881_v47  ;;  %v1843_v9 = vunpack.c.h.s8.bf16 %v883_v48  ;;  %v946_v47 = vld [vmem:[%s4877_s1 + $0xfc8] sm:$0xff]  ;;  %v948_v48 = vld [vmem:[%s4877_s1 + $0xfd8] sm:$0xff] }
 0x366   : > { %2817 = vmatprep.subr.bf16.mxu0 %v1746_v10  ;;  %2981 = vmatprep.subr.bf16.mxu1 %v1748_v11  ;;  %v1858_v10 = vunpack.c.l.s8.bf16 %v898_v6  ;;  %v1860_v11 = vunpack.c.l.s8.bf16 %v900_v7 }
 0x367   : > { %2847 = vmatprep.mubr.bf16.mxu0 %v5066_v22  ;;  %3011 = vmatprep.mubr.bf16.mxu1 %v5066_v22 }
 0x369   : > { %2818 = vmatpush1.bf16.msra.mxu0 %v1745_v14  ;;  %2982 = vmatpush1.bf16.msra.mxu1 %v1747_v16  ;;  %v1857_v14 = vunpack.c.l.s8.bf16 %v897_v12  ;;  %v1859_v16 = vunpack.c.l.s8.bf16 %v899_v13 }
 0x36a   : > { %2819 = vmatprep.subr.bf16.mxu0 %v1762_v17  ;;  %2983 = vmatprep.subr.bf16.mxu1 %v1764_v18  ;;  %v1874_v17 = vunpack.c.h.s8.bf16 %v898_v6  ;;  %v1876_v18 = vunpack.c.h.s8.bf16 %v900_v7  ;;  %v1970_v6 = vunpack.c.h.s8.bf16 %v946_v47  ;;  %v1972_v7 = vunpack.c.h.s8.bf16 %v948_v48 }
 0x36d   : > { %2820 = vmatpush1.bf16.msra.mxu0 %v1761_v21  ;;  %2984 = vmatpush1.bf16.msra.mxu1 %v1763_v24  ;;  %v1873_v21 = vunpack.c.h.s8.bf16 %v897_v12  ;;  %v1875_v24 = vunpack.c.h.s8.bf16 %v899_v13 }
 0x36e   : > { %2821 = vmatprep.subr.bf16.mxu0 %v1778_v23  ;;  %2985 = vmatprep.subr.bf16.mxu1 %v1780_v25  ;;  %v1890_v23 = vunpack.c.l.s8.bf16 %v914_v19  ;;  %v1892_v25 = vunpack.c.l.s8.bf16 %v916_v20 }
 0x371   : > { %2822 = vmatpush1.bf16.msra.mxu0 %v1777_v27  ;;  %2986 = vmatpush1.bf16.msra.mxu1 %v1779_v28  ;;  %v1889_v27 = vunpack.c.l.s8.bf16 %v913_v26  ;;  %v1891_v28 = vunpack.c.l.s8.bf16 %v915_v44 }
 0x372   : > { %2823 = vmatprep.subr.bf16.mxu0 %v1794_v29  ;;  %2987 = vmatprep.subr.bf16.mxu1 %v1796_v30  ;;  %v1906_v29 = vunpack.c.h.s8.bf16 %v914_v19  ;;  %v1908_v30 = vunpack.c.h.s8.bf16 %v916_v20 }
 0x375   : > { %2824 = vmatpush1.bf16.msra.mxu0 %v1793_v34  ;;  %2988 = vmatpush1.bf16.msra.mxu1 %v1795_v35  ;;  %v1905_v34 = vunpack.c.h.s8.bf16 %v913_v26  ;;  %v1907_v35 = vunpack.c.h.s8.bf16 %v915_v44 }
 0x376   : > { %2825 = vmatprep.subr.bf16.mxu0 %v1810_v36  ;;  %2989 = vmatprep.subr.bf16.mxu1 %v1812_v37  ;;  %v1922_v36 = vunpack.c.l.s8.bf16 %v930_v32  ;;  %v1924_v37 = vunpack.c.l.s8.bf16 %v932_v33 }
 0x377   : > { %v5382_v51 = vpop.f32.mrb[4].mxu0  ;;  %v5384_v52 = vpop.f32.mrb[4].mxu1 }
 0x378   : > { %v5386_v54 = vpop.f32.mrb[5].mxu0  ;;  %v5388_v55 = vpop.f32.mrb[5].mxu1 }
 0x379   : > { %v2525_v56 = vpop.f32.mrb[6].mxu0  ;;  %v2689_v57 = vpop.f32.mrb[6].mxu1  ;;  %2826 = vmatpush1.bf16.msra.mxu0 %v1809_v42  ;;  %2990 = vmatpush1.bf16.msra.mxu1 %v1811_v43  ;;  %v1921_v42 = vunpack.c.l.s8.bf16 %v929_v40  ;;  %v1923_v43 = vunpack.c.l.s8.bf16 %v931_v41 }
 0x37a   : > { %v2526_v50 = vpop.f32.mrb[7].mxu0  ;;  %v2690_v62 = vpop.f32.mrb[7].mxu1  ;;  %2827 = vmatprep.subr.bf16.mxu0 %v1826_v45  ;;  %2991 = vmatprep.subr.bf16.mxu1 %v1828_v46  ;;  %v1938_v45 = vunpack.c.h.s8.bf16 %v930_v32  ;;  %v1940_v46 = vunpack.c.h.s8.bf16 %v932_v33  ;;  %v1937_v56 = vunpack.c.h.s8.bf16 %v929_v40  ;;  %v1939_v57 = vunpack.c.h.s8.bf16 %v931_v41  ;;  %v485_v41 = vld [vmem:[%s4877_s1 + $0x160] sm:$0xff] }
 0x37b   : > { %v945_v50 = vld [vmem:[%s4877_s1 + $0xfc0] sm:$0xff]  ;;  %v947_v62 = vld [vmem:[%s4877_s1 + $0xfd0] sm:$0xff] }
 0x37d   : > { %2828 = vmatpush1.bf16.msra.mxu0 %v1825_v59  ;;  %2992 = vmatpush1.bf16.msra.mxu1 %v1827_v60  ;;  %v1954_v59 = vunpack.c.l.s8.bf16 %v946_v47  ;;  %v1956_v60 = vunpack.c.l.s8.bf16 %v948_v48  ;;  %v502_v48 = vld [vmem:[%s4877_s1 + $0x1e8] sm:$0xff] }
 0x37e   : > { %2829 = vmatprep.subr.bf16.mxu0 %v1842_v63  ;;  %2993 = vmatprep.subr.bf16.mxu1 %v1844_v0  ;;  %v1953_v63 = vunpack.c.l.s8.bf16 %v945_v50  ;;  %v1955_v0 = vunpack.c.l.s8.bf16 %v947_v62 }
 0x381   : > { %2830 = vmatpush1.bf16.msra.mxu0 %v1841_v8  ;;  %2994 = vmatpush1.bf16.msra.mxu1 %v1843_v9  ;;  %v454_v8 = vld [vmem:[%s4877_s1 + $0x68] sm:$0xff]  ;;  %v456_v9 = vld [vmem:[%s4877_s1 + $0x78] sm:$0xff] }
 0x382   : > { %2831 = vmatprep.subr.bf16.mxu0 %v1858_v10  ;;  %2995 = vmatprep.subr.bf16.mxu1 %v1860_v11  ;;  %v1969_v10 = vunpack.c.h.s8.bf16 %v945_v50  ;;  %v1971_v11 = vunpack.c.h.s8.bf16 %v947_v62  ;;  %v966_v12 = vunpack.c.l.s8.bf16 %v454_v8  ;;  %v968_v13 = vunpack.c.l.s8.bf16 %v456_v9  ;;  %v501_v62 = vld [vmem:[%s4877_s1 + $0x1e0] sm:$0xff] }
 0x383   : > { %v982_v19 = vunpack.c.h.s8.bf16 %v454_v8  ;;  %v984_v20 = vunpack.c.h.s8.bf16 %v456_v9  ;;  %v518_v9 = vld [vmem:[%s4877_s1 + $0x268] sm:$0xff] }
 0x385   : > { %2832 = vmatpush1.bf16.msra.mxu0 %v1857_v14  ;;  %2996 = vmatpush1.bf16.msra.mxu1 %v1859_v16  ;;  %v453_v14 = vld [vmem:[%s4877_s1 + $0x60] sm:$0xff]  ;;  %v455_v16 = vld [vmem:[%s4877_s1 + $0x70] sm:$0xff] }
 0x386   : > { %2833 = vmatprep.subr.bf16.mxu0 %v1874_v17  ;;  %2997 = vmatprep.subr.bf16.mxu1 %v1876_v18  ;;  %v965_v17 = vunpack.c.l.s8.bf16 %v453_v14  ;;  %v967_v18 = vunpack.c.l.s8.bf16 %v455_v16 }
 0x389   : > { %2834 = vmatpush1.bf16.msra.mxu0 %v1873_v21  ;;  %2998 = vmatpush1.bf16.msra.mxu1 %v1875_v24  ;;  %v470_v21 = vld [vmem:[%s4877_s1 + $0xe8] sm:$0xff]  ;;  %v472_v24 = vld [vmem:[%s4877_s1 + $0xf8] sm:$0xff] }
 0x38a   : > { %2835 = vmatprep.subr.bf16.mxu0 %v1890_v23  ;;  %2999 = vmatprep.subr.bf16.mxu1 %v1892_v25  ;;  %v981_v23 = vunpack.c.h.s8.bf16 %v453_v14  ;;  %v983_v25 = vunpack.c.h.s8.bf16 %v455_v16  ;;  %v998_v26 = vunpack.c.l.s8.bf16 %v470_v21  ;;  %v1000_v44 = vunpack.c.l.s8.bf16 %v472_v24  ;;  %v517_v16 = vld [vmem:[%s4877_s1 + $0x260] sm:$0xff] }
 0x38b   : > { %v1014_v32 = vunpack.c.h.s8.bf16 %v470_v21  ;;  %v1016_v33 = vunpack.c.h.s8.bf16 %v472_v24  ;;  %v534_v24 = vld [vmem:[%s4877_s1 + $0x2e8] sm:$0xff] }
 0x38d   : > { %2836 = vmatpush1.bf16.msra.mxu0 %v1889_v27  ;;  %3000 = vmatpush1.bf16.msra.mxu1 %v1891_v28  ;;  %v469_v27 = vld [vmem:[%s4877_s1 + $0xe0] sm:$0xff]  ;;  %v471_v28 = vld [vmem:[%s4877_s1 + $0xf0] sm:$0xff] }
 0x38e   : > { %2837 = vmatprep.subr.bf16.mxu0 %v1906_v29  ;;  %3001 = vmatprep.subr.bf16.mxu1 %v1908_v30  ;;  %v997_v29 = vunpack.c.l.s8.bf16 %v469_v27  ;;  %v999_v30 = vunpack.c.l.s8.bf16 %v471_v28 }
 0x391   : > { %2838 = vmatpush1.bf16.msra.mxu0 %v1905_v34  ;;  %3002 = vmatpush1.bf16.msra.mxu1 %v1907_v35  ;;  %v486_v34 = vld [vmem:[%s4877_s1 + $0x168] sm:$0xff]  ;;  %v488_v35 = vld [vmem:[%s4877_s1 + $0x178] sm:$0xff] }
 0x392   : > { %2839 = vmatprep.subr.bf16.mxu0 %v1922_v36  ;;  %3003 = vmatprep.subr.bf16.mxu1 %v1924_v37  ;;  %v1013_v36 = vunpack.c.h.s8.bf16 %v469_v27  ;;  %v1015_v37 = vunpack.c.h.s8.bf16 %v471_v28  ;;  %v1032_v40 = vunpack.c.l.s8.bf16 %v488_v35  ;;  %v1048_v47 = vunpack.c.h.s8.bf16 %v488_v35  ;;  %v533_v28 = vld [vmem:[%s4877_s1 + $0x2e0] sm:$0xff]  ;;  %v550_v35 = vld [vmem:[%s4877_s1 + $0x368] sm:$0xff] }
 0x395   : > { %2840 = vmatpush1.bf16.msra.mxu0 %v1921_v42  ;;  %3004 = vmatpush1.bf16.msra.mxu1 %v1923_v43  ;;  %v487_v42 = vld [vmem:[%s4877_s1 + $0x170] sm:$0xff]  ;;  %v1029_v43 = vunpack.c.l.s8.bf16 %v485_v41 }
 0x396   : > { %2841 = vmatprep.subr.bf16.mxu0 %v1938_v45  ;;  %3005 = vmatprep.subr.bf16.mxu1 %v1940_v46  ;;  %v1031_v45 = vunpack.c.l.s8.bf16 %v487_v42  ;;  %v1046_v46 = vunpack.c.h.s8.bf16 %v486_v34 }
 0x399   : > { %2842 = vmatpush1.bf16.msra.mxu0 %v1937_v56  ;;  %3006 = vmatpush1.bf16.msra.mxu1 %v1939_v57  ;;  %v504_v56 = vld [vmem:[%s4877_s1 + $0x1f8] sm:$0xff]  ;;  %v1045_v57 = vunpack.c.h.s8.bf16 %v485_v41 }
 0x39a   : > { %2843 = vmatprep.subr.bf16.mxu0 %v1954_v59  ;;  %3007 = vmatprep.subr.bf16.mxu1 %v1956_v60  ;;  %v1047_v59 = vunpack.c.h.s8.bf16 %v487_v42  ;;  %v1062_v60 = vunpack.c.l.s8.bf16 %v502_v48  ;;  %v1064_v50 = vunpack.c.l.s8.bf16 %v504_v56  ;;  %v1080_v8 = vunpack.c.h.s8.bf16 %v504_v56  ;;  %v549_v42 = vld [vmem:[%s4877_s1 + $0x360] sm:$0xff]  ;;  %v566_v56 = vld [vmem:[%s4877_s1 + $0x3e8] sm:$0xff] }
 0x39d   : > { %2844 = vmatpush1.bf16.msra.mxu0 %v1953_v63  ;;  %3008 = vmatpush1.bf16.msra.mxu1 %v1955_v0  ;;  %v503_v63 = vld [vmem:[%s4877_s1 + $0x1f0] sm:$0xff]  ;;  %v1061_v0 = vunpack.c.l.s8.bf16 %v501_v62 }
 0x39e   : > { %2845 = vmatprep.subr.bf16.mxu0 %v1970_v6  ;;  %3009 = vmatprep.subr.bf16.mxu1 %v1972_v7  ;;  %v1063_v6 = vunpack.c.l.s8.bf16 %v503_v63  ;;  %v1078_v7 = vunpack.c.h.s8.bf16 %v502_v48 }
 0x3a1   : > { %2846 = vmatpush1.bf16.msra.mxu0 %v1969_v10  ;;  %3010 = vmatpush1.bf16.msra.mxu1 %v1971_v11  ;;  %v520_v10 = vld [vmem:[%s4877_s1 + $0x278] sm:$0xff]  ;;  %v1077_v11 = vunpack.c.h.s8.bf16 %v501_v62 }
 0x3a2   : > { %3020 = vmatprep.subr.bf16.mxu0 %v966_v12  ;;  %3184 = vmatprep.subr.bf16.mxu1 %v968_v13  ;;  %v1079_v12 = vunpack.c.h.s8.bf16 %v503_v63  ;;  %v1094_v13 = vunpack.c.l.s8.bf16 %v518_v9  ;;  %v1096_v14 = vunpack.c.l.s8.bf16 %v520_v10  ;;  %v1112_v21 = vunpack.c.h.s8.bf16 %v520_v10  ;;  %v565_v63 = vld [vmem:[%s4877_s1 + $0x3e0] sm:$0xff]  ;;  %v582_v10 = vld [vmem:[%s4877_s1 + $0x468] sm:$0xff] }
 0x3a4   : > { %2848 = vmatmul.mubr.bf16.vlgmr.msra.gmra.mrb[8].mxu0 %v5104_v1  ;;  %3012 = vmatmul.mubr.bf16.vlgmr.msra.gmra.mrb[8].mxu1 %v5104_v1 }
 0x3a5   : > { %3021 = vmatpush1.bf16.msra.mxu0 %v965_v17  ;;  %3185 = vmatpush1.bf16.msra.mxu1 %v967_v18  ;;  %v519_v17 = vld [vmem:[%s4877_s1 + $0x270] sm:$0xff]  ;;  %v1093_v18 = vunpack.c.l.s8.bf16 %v517_v16 }
 0x3a6   : > { %3022 = vmatprep.subr.bf16.mxu0 %v982_v19  ;;  %3186 = vmatprep.subr.bf16.mxu1 %v984_v20  ;;  %v1095_v19 = vunpack.c.l.s8.bf16 %v519_v17  ;;  %v1110_v20 = vunpack.c.h.s8.bf16 %v518_v9 }
 0x3a7   : > { %3052 = vmatprep.mubr.bf16.mxu0 %v4942_v58  ;;  %3216 = vmatprep.mubr.bf16.mxu1 %v4942_v58  ;;  %v1030_v58 = vunpack.c.l.s8.bf16 %v486_v34 }
 0x3a9   : > { %3023 = vmatpush1.bf16.msra.mxu0 %v981_v23  ;;  %3187 = vmatpush1.bf16.msra.mxu1 %v983_v25  ;;  %v536_v23 = vld [vmem:[%s4877_s1 + $0x2f8] sm:$0xff]  ;;  %v1109_v25 = vunpack.c.h.s8.bf16 %v517_v16 }
 0x3aa   : > { %3024 = vmatprep.subr.bf16.mxu0 %v998_v26  ;;  %3188 = vmatprep.subr.bf16.mxu1 %v1000_v44  ;;  %v1111_v26 = vunpack.c.h.s8.bf16 %v519_v17  ;;  %v1126_v44 = vunpack.c.l.s8.bf16 %v534_v24  ;;  %v1128_v27 = vunpack.c.l.s8.bf16 %v536_v23  ;;  %v1144_v34 = vunpack.c.h.s8.bf16 %v536_v23  ;;  %v581_v17 = vld [vmem:[%s4877_s1 + $0x460] sm:$0xff]  ;;  %v598_v23 = vld [vmem:[%s4877_s1 + $0x4e8] sm:$0xff] }
 0x3ad   : > { %3025 = vmatpush1.bf16.msra.mxu0 %v997_v29  ;;  %3189 = vmatpush1.bf16.msra.mxu1 %v999_v30  ;;  %v535_v29 = vld [vmem:[%s4877_s1 + $0x2f0] sm:$0xff]  ;;  %v1125_v30 = vunpack.c.l.s8.bf16 %v533_v28 }
 0x3ae   : > { %3026 = vmatprep.subr.bf16.mxu0 %v1014_v32  ;;  %3190 = vmatprep.subr.bf16.mxu1 %v1016_v33  ;;  %v1127_v32 = vunpack.c.l.s8.bf16 %v535_v29  ;;  %v1142_v33 = vunpack.c.h.s8.bf16 %v534_v24 }
 0x3b1   : > { %3027 = vmatpush1.bf16.msra.mxu0 %v1013_v36  ;;  %3191 = vmatpush1.bf16.msra.mxu1 %v1015_v37  ;;  %v552_v36 = vld [vmem:[%s4877_s1 + $0x378] sm:$0xff]  ;;  %v1141_v37 = vunpack.c.h.s8.bf16 %v533_v28 }
 0x3b2   : > { %3028 = vmatprep.subr.bf16.mxu0 %v1030_v58  ;;  %3192 = vmatprep.subr.bf16.mxu1 %v1032_v40  ;;  %v1143_v58 = vunpack.c.h.s8.bf16 %v535_v29  ;;  %v1158_v40 = vunpack.c.l.s8.bf16 %v550_v35  ;;  %v1160_v41 = vunpack.c.l.s8.bf16 %v552_v36  ;;  %v1176_v48 = vunpack.c.h.s8.bf16 %v552_v36  ;;  %v597_v29 = vld [vmem:[%s4877_s1 + $0x4e0] sm:$0xff]  ;;  %v616_v36 = vld [vmem:[%s4877_s1 + $0x578] sm:$0xff] }
 0x3b5   : > { %3029 = vmatpush1.bf16.msra.mxu0 %v1029_v43  ;;  %3193 = vmatpush1.bf16.msra.mxu1 %v1031_v45  ;;  %v551_v43 = vld [vmem:[%s4877_s1 + $0x370] sm:$0xff]  ;;  %v1157_v45 = vunpack.c.l.s8.bf16 %v549_v42 }
 0x3b6   : > { %3030 = vmatprep.subr.bf16.mxu0 %v1046_v46  ;;  %3194 = vmatprep.subr.bf16.mxu1 %v1048_v47  ;;  %v1159_v46 = vunpack.c.l.s8.bf16 %v551_v43  ;;  %v1174_v47 = vunpack.c.h.s8.bf16 %v550_v35  ;;  %v614_v35 = vld [vmem:[%s4877_s1 + $0x568] sm:$0xff] }
 0x3b9   : > { %3031 = vmatpush1.bf16.msra.mxu0 %v1045_v57  ;;  %3195 = vmatpush1.bf16.msra.mxu1 %v1047_v59  ;;  %v568_v57 = vld [vmem:[%s4877_s1 + $0x3f8] sm:$0xff]  ;;  %v1173_v59 = vunpack.c.h.s8.bf16 %v549_v42  ;;  %v615_v42 = vld [vmem:[%s4877_s1 + $0x570] sm:$0xff] }
 0x3ba   : > { %3032 = vmatprep.subr.bf16.mxu0 %v1062_v60  ;;  %3196 = vmatprep.subr.bf16.mxu1 %v1064_v50  ;;  %v1175_v60 = vunpack.c.h.s8.bf16 %v551_v43  ;;  %v1190_v50 = vunpack.c.l.s8.bf16 %v566_v56  ;;  %v1192_v62 = vunpack.c.l.s8.bf16 %v568_v57  ;;  %v1208_v9 = vunpack.c.h.s8.bf16 %v568_v57 }
 0x3bd   : > { %3033 = vmatpush1.bf16.msra.mxu0 %v1061_v0  ;;  %3197 = vmatpush1.bf16.msra.mxu1 %v1063_v6  ;;  %v567_v0 = vld [vmem:[%s4877_s1 + $0x3f0] sm:$0xff]  ;;  %v1189_v6 = vunpack.c.l.s8.bf16 %v565_v63 }
 0x3be   : > { %3034 = vmatprep.subr.bf16.mxu0 %v1078_v7  ;;  %3198 = vmatprep.subr.bf16.mxu1 %v1080_v8  ;;  %v1191_v7 = vunpack.c.l.s8.bf16 %v567_v0  ;;  %v1206_v8 = vunpack.c.h.s8.bf16 %v566_v56  ;;  %v632_v56 = vld [vmem:[%s4877_s1 + $0x5f8] sm:$0xff] }
 0x3c1   : > { %3035 = vmatpush1.bf16.msra.mxu0 %v1077_v11  ;;  %3199 = vmatpush1.bf16.msra.mxu1 %v1079_v12  ;;  %v584_v11 = vld [vmem:[%s4877_s1 + $0x478] sm:$0xff]  ;;  %v1205_v12 = vunpack.c.h.s8.bf16 %v565_v63  ;;  %v631_v63 = vld [vmem:[%s4877_s1 + $0x5f0] sm:$0xff] }
 0x3c2   : > { %3036 = vmatprep.subr.bf16.mxu0 %v1094_v13  ;;  %3200 = vmatprep.subr.bf16.mxu1 %v1096_v14  ;;  %v1207_v13 = vunpack.c.h.s8.bf16 %v567_v0  ;;  %v1222_v14 = vunpack.c.l.s8.bf16 %v582_v10  ;;  %v1224_v16 = vunpack.c.l.s8.bf16 %v584_v11  ;;  %v1240_v24 = vunpack.c.h.s8.bf16 %v584_v11 }
 0x3c5   : > { %3037 = vmatpush1.bf16.msra.mxu0 %v1093_v18  ;;  %3201 = vmatpush1.bf16.msra.mxu1 %v1095_v19  ;;  %v583_v18 = vld [vmem:[%s4877_s1 + $0x470] sm:$0xff]  ;;  %v1221_v19 = vunpack.c.l.s8.bf16 %v581_v17 }
 0x3c6   : > { %3038 = vmatprep.subr.bf16.mxu0 %v1110_v20  ;;  %3202 = vmatprep.subr.bf16.mxu1 %v1112_v21  ;;  %v1223_v20 = vunpack.c.l.s8.bf16 %v583_v18  ;;  %v1238_v21 = vunpack.c.h.s8.bf16 %v582_v10  ;;  %v648_v10 = vld [vmem:[%s4877_s1 + $0x678] sm:$0xff] }
 0x3c9   : > { %3039 = vmatpush1.bf16.msra.mxu0 %v1109_v25  ;;  %3203 = vmatpush1.bf16.msra.mxu1 %v1111_v26  ;;  %v600_v25 = vld [vmem:[%s4877_s1 + $0x4f8] sm:$0xff]  ;;  %v1237_v26 = vunpack.c.h.s8.bf16 %v581_v17  ;;  %v647_v17 = vld [vmem:[%s4877_s1 + $0x670] sm:$0xff] }
 0x3ca   : > { %3040 = vmatprep.subr.bf16.mxu0 %v1126_v44  ;;  %3204 = vmatprep.subr.bf16.mxu1 %v1128_v27  ;;  %v1239_v44 = vunpack.c.h.s8.bf16 %v583_v18  ;;  %v1254_v27 = vunpack.c.l.s8.bf16 %v598_v23  ;;  %v1256_v28 = vunpack.c.l.s8.bf16 %v600_v25 }
 0x3cd   : > { %3041 = vmatpush1.bf16.msra.mxu0 %v1125_v30  ;;  %3205 = vmatpush1.bf16.msra.mxu1 %v1127_v32  ;;  %v599_v30 = vld [vmem:[%s4877_s1 + $0x4f0] sm:$0xff]  ;;  %v1253_v32 = vunpack.c.l.s8.bf16 %v597_v29 }
 0x3ce   : > { %3042 = vmatprep.subr.bf16.mxu0 %v1142_v33  ;;  %3206 = vmatprep.subr.bf16.mxu1 %v1144_v34  ;;  %v1270_v33 = vunpack.c.h.s8.bf16 %v598_v23  ;;  %v1272_v34 = vunpack.c.h.s8.bf16 %v600_v25  ;;  %v664_v23 = vld [vmem:[%s4877_s1 + $0x6f8] sm:$0xff] }
 0x3d1   : > { %3043 = vmatpush1.bf16.msra.mxu0 %v1141_v37  ;;  %3207 = vmatpush1.bf16.msra.mxu1 %v1143_v58  ;;  %v1269_v37 = vunpack.c.h.s8.bf16 %v597_v29  ;;  %v1271_v58 = vunpack.c.h.s8.bf16 %v599_v30  ;;  %v663_v29 = vld [vmem:[%s4877_s1 + $0x6f0] sm:$0xff] }
 0x3d2   : > { %3044 = vmatprep.subr.bf16.mxu0 %v1158_v40  ;;  %3208 = vmatprep.subr.bf16.mxu1 %v1160_v41  ;;  %v1288_v40 = vunpack.c.l.s8.bf16 %v616_v36  ;;  %v613_v41 = vld [vmem:[%s4877_s1 + $0x560] sm:$0xff] }
 0x3d3   : > { %v1285_v43 = vunpack.c.l.s8.bf16 %v613_v41  ;;  %v1301_v57 = vunpack.c.h.s8.bf16 %v613_v41  ;;  %v679_v41 = vld [vmem:[%s4877_s1 + $0x770] sm:$0xff] }
 0x3d5   : > { %3045 = vmatpush1.bf16.msra.mxu0 %v1157_v45  ;;  %3209 = vmatpush1.bf16.msra.mxu1 %v1159_v46  ;;  %v1287_v45 = vunpack.c.l.s8.bf16 %v615_v42  ;;  %v1302_v46 = vunpack.c.h.s8.bf16 %v614_v35 }
 0x3d6   : > { %3046 = vmatprep.subr.bf16.mxu0 %v1174_v47  ;;  %3210 = vmatprep.subr.bf16.mxu1 %v1176_v48  ;;  %v1304_v47 = vunpack.c.h.s8.bf16 %v616_v36  ;;  %v630_v48 = vld [vmem:[%s4877_s1 + $0x5e8] sm:$0xff] }
 0x3d9   : > { %3047 = vmatpush1.bf16.msra.mxu0 %v1173_v59  ;;  %3211 = vmatpush1.bf16.msra.mxu1 %v1175_v60  ;;  %v1303_v59 = vunpack.c.h.s8.bf16 %v615_v42  ;;  %v1318_v60 = vunpack.c.l.s8.bf16 %v630_v48 }
 0x3da   : > { %3048 = vmatprep.subr.bf16.mxu0 %v1190_v50  ;;  %3212 = vmatprep.subr.bf16.mxu1 %v1192_v62  ;;  %v1320_v50 = vunpack.c.l.s8.bf16 %v632_v56  ;;  %v629_v62 = vld [vmem:[%s4877_s1 + $0x5e0] sm:$0xff] }
 0x3db   : > { %v1317_v0 = vunpack.c.l.s8.bf16 %v629_v62  ;;  %v1333_v11 = vunpack.c.h.s8.bf16 %v629_v62  ;;  %v695_v62 = vld [vmem:[%s4877_s1 + $0x7f0] sm:$0xff] }
 0x3dd   : > { %3049 = vmatpush1.bf16.msra.mxu0 %v1189_v6  ;;  %3213 = vmatpush1.bf16.msra.mxu1 %v1191_v7  ;;  %v1319_v6 = vunpack.c.l.s8.bf16 %v631_v63  ;;  %v1334_v7 = vunpack.c.h.s8.bf16 %v630_v48  ;;  %v696_v48 = vld [vmem:[%s4877_s1 + $0x7f8] sm:$0xff] }
 0x3de   : > { %3050 = vmatprep.subr.bf16.mxu0 %v1206_v8  ;;  %3214 = vmatprep.subr.bf16.mxu1 %v1208_v9  ;;  %v1336_v8 = vunpack.c.h.s8.bf16 %v632_v56  ;;  %v646_v9 = vld [vmem:[%s4877_s1 + $0x668] sm:$0xff] }
 0x3e1   : > { %3051 = vmatpush1.bf16.msra.mxu0 %v1205_v12  ;;  %3215 = vmatpush1.bf16.msra.mxu1 %v1207_v13  ;;  %v1335_v12 = vunpack.c.h.s8.bf16 %v631_v63  ;;  %v1350_v13 = vunpack.c.l.s8.bf16 %v646_v9 }
 0x3e2   : > { %3061 = vmatprep.subr.bf16.mxu0 %v1222_v14  ;;  %3225 = vmatprep.subr.bf16.mxu1 %v1224_v16  ;;  %v1352_v14 = vunpack.c.l.s8.bf16 %v648_v10  ;;  %v645_v16 = vld [vmem:[%s4877_s1 + $0x660] sm:$0xff] }
 0x3e3   : > { %v1349_v18 = vunpack.c.l.s8.bf16 %v645_v16  ;;  %v1365_v25 = vunpack.c.h.s8.bf16 %v645_v16  ;;  %v711_v16 = vld [vmem:[%s4877_s1 + $0x870] sm:$0xff] }
 0x3e4   : > { %3053 = vmatmul.mubr.bf16.vlgmr.msra.gmra.mrb[12].mxu0 %v4966_v53  ;;  %3217 = vmatmul.mubr.bf16.vlgmr.msra.gmra.mrb[12].mxu1 %v4966_v53  ;;  %v1255_v53 = vunpack.c.l.s8.bf16 %v599_v30 }
 0x3e5   : > { %3062 = vmatpush1.bf16.msra.mxu0 %v1221_v19  ;;  %3226 = vmatpush1.bf16.msra.mxu1 %v1223_v20  ;;  %v1351_v19 = vunpack.c.l.s8.bf16 %v647_v17  ;;  %v1366_v20 = vunpack.c.h.s8.bf16 %v646_v9  ;;  %v712_v9 = vld [vmem:[%s4877_s1 + $0x878] sm:$0xff] }
 0x3e6   : > { %3063 = vmatprep.subr.bf16.mxu0 %v1238_v21  ;;  %3227 = vmatprep.subr.bf16.mxu1 %v1240_v24  ;;  %v1368_v21 = vunpack.c.h.s8.bf16 %v648_v10  ;;  %v662_v24 = vld [vmem:[%s4877_s1 + $0x6e8] sm:$0xff] }
 0x3e7   : > { %3093 = vmatprep.mubr.bf16.mxu0 %v4972_v61  ;;  %3257 = vmatprep.mubr.bf16.mxu1 %v4972_v61  ;;  %v1286_v61 = vunpack.c.l.s8.bf16 %v614_v35  ;;  %v680_v35 = vld [vmem:[%s4877_s1 + $0x778] sm:$0xff] }
 0x3e9   : > { %3064 = vmatpush1.bf16.msra.mxu0 %v1237_v26  ;;  %3228 = vmatpush1.bf16.msra.mxu1 %v1239_v44  ;;  %v1367_v26 = vunpack.c.h.s8.bf16 %v647_v17  ;;  %v1382_v44 = vunpack.c.l.s8.bf16 %v662_v24 }
 0x3ea   : > { %3065 = vmatprep.subr.bf16.mxu0 %v1254_v27  ;;  %3229 = vmatprep.subr.bf16.mxu1 %v1256_v28  ;;  %v1384_v27 = vunpack.c.l.s8.bf16 %v664_v23  ;;  %v661_v28 = vld [vmem:[%s4877_s1 + $0x6e0] sm:$0xff] }
 0x3eb   : > { %v1381_v30 = vunpack.c.l.s8.bf16 %v661_v28  ;;  %v1397_v36 = vunpack.c.h.s8.bf16 %v661_v28  ;;  %v727_v28 = vld [vmem:[%s4877_s1 + $0x8f0] sm:$0xff] }
 0x3ed   : > { %3066 = vmatpush1.bf16.msra.mxu0 %v1253_v32  ;;  %3230 = vmatpush1.bf16.msra.mxu1 %v1255_v53  ;;  %v1383_v32 = vunpack.c.l.s8.bf16 %v663_v29  ;;  %v1398_v53 = vunpack.c.h.s8.bf16 %v662_v24  ;;  %v728_v24 = vld [vmem:[%s4877_s1 + $0x8f8] sm:$0xff] }
 0x3ee   : > { %3067 = vmatprep.subr.bf16.mxu0 %v1270_v33  ;;  %3231 = vmatprep.subr.bf16.mxu1 %v1272_v34  ;;  %v1400_v33 = vunpack.c.h.s8.bf16 %v664_v23  ;;  %v678_v34 = vld [vmem:[%s4877_s1 + $0x768] sm:$0xff] }
 0x3f1   : > { %3068 = vmatpush1.bf16.msra.mxu0 %v1269_v37  ;;  %3232 = vmatpush1.bf16.msra.mxu1 %v1271_v58  ;;  %v1399_v37 = vunpack.c.h.s8.bf16 %v663_v29  ;;  %v1414_v58 = vunpack.c.l.s8.bf16 %v678_v34 }
 0x3f2   : > { %3069 = vmatprep.subr.bf16.mxu0 %v1286_v61  ;;  %3233 = vmatprep.subr.bf16.mxu1 %v1288_v40  ;;  %v1416_v61 = vunpack.c.l.s8.bf16 %v680_v35  ;;  %v677_v40 = vld [vmem:[%s4877_s1 + $0x760] sm:$0xff] }
 0x3f3   : > { %v1413_v42 = vunpack.c.l.s8.bf16 %v677_v40  ;;  %v1429_v56 = vunpack.c.h.s8.bf16 %v677_v40 }
 0x3f5   : > { %3070 = vmatpush1.bf16.msra.mxu0 %v1285_v43  ;;  %3234 = vmatpush1.bf16.msra.mxu1 %v1287_v45  ;;  %v1415_v43 = vunpack.c.l.s8.bf16 %v679_v41  ;;  %v1430_v45 = vunpack.c.h.s8.bf16 %v678_v34 }
 0x3f6   : > { %3071 = vmatprep.subr.bf16.mxu0 %v1302_v46  ;;  %3235 = vmatprep.subr.bf16.mxu1 %v1304_v47  ;;  %v1432_v46 = vunpack.c.h.s8.bf16 %v680_v35  ;;  %v694_v47 = vld [vmem:[%s4877_s1 + $0x7e8] sm:$0xff]  ;;  %v1527_v35 = vunpack.c.h.s8.bf16 %v727_v28 }
 0x3f9   : > { %3072 = vmatpush1.bf16.msra.mxu0 %v1301_v57  ;;  %3236 = vmatpush1.bf16.msra.mxu1 %v1303_v59  ;;  %v1431_v57 = vunpack.c.h.s8.bf16 %v679_v41  ;;  %v1446_v59 = vunpack.c.l.s8.bf16 %v694_v47 }
 0x3fa   : > { %3073 = vmatprep.subr.bf16.mxu0 %v1318_v60  ;;  %3237 = vmatprep.subr.bf16.mxu1 %v1320_v50  ;;  %v1448_v60 = vunpack.c.l.s8.bf16 %v696_v48  ;;  %v693_v50 = vld [vmem:[%s4877_s1 + $0x7e0] sm:$0xff] }
 0x3fb   : > { %v1445_v63 = vunpack.c.l.s8.bf16 %v693_v50  ;;  %v1461_v10 = vunpack.c.h.s8.bf16 %v693_v50 }
 0x3fd   : > { %3074 = vmatpush1.bf16.msra.mxu0 %v1317_v0  ;;  %3238 = vmatpush1.bf16.msra.mxu1 %v1319_v6  ;;  %v1447_v0 = vunpack.c.l.s8.bf16 %v695_v62  ;;  %v1462_v6 = vunpack.c.h.s8.bf16 %v694_v47 }
 0x3fe   : > { %3075 = vmatprep.subr.bf16.mxu0 %v1334_v7  ;;  %3239 = vmatprep.subr.bf16.mxu1 %v1336_v8  ;;  %v1464_v7 = vunpack.c.h.s8.bf16 %v696_v48  ;;  %v710_v8 = vld [vmem:[%s4877_s1 + $0x868] sm:$0xff] }
 0x401   : > { %3076 = vmatpush1.bf16.msra.mxu0 %v1333_v11  ;;  %3240 = vmatpush1.bf16.msra.mxu1 %v1335_v12  ;;  %v1463_v11 = vunpack.c.h.s8.bf16 %v695_v62  ;;  %v1478_v12 = vunpack.c.l.s8.bf16 %v710_v8 }
 0x402   : > { %3077 = vmatprep.subr.bf16.mxu0 %v1350_v13  ;;  %3241 = vmatprep.subr.bf16.mxu1 %v1352_v14  ;;  %v1480_v13 = vunpack.c.l.s8.bf16 %v712_v9  ;;  %v709_v14 = vld [vmem:[%s4877_s1 + $0x860] sm:$0xff] }
 0x403   : > { %v1477_v17 = vunpack.c.l.s8.bf16 %v709_v14  ;;  %v1493_v23 = vunpack.c.h.s8.bf16 %v709_v14 }
 0x405   : > { %3078 = vmatpush1.bf16.msra.mxu0 %v1349_v18  ;;  %3242 = vmatpush1.bf16.msra.mxu1 %v1351_v19  ;;  %v1479_v18 = vunpack.c.l.s8.bf16 %v711_v16  ;;  %v1494_v19 = vunpack.c.h.s8.bf16 %v710_v8 }
 0x406   : > { %3079 = vmatprep.subr.bf16.mxu0 %v1366_v20  ;;  %3243 = vmatprep.subr.bf16.mxu1 %v1368_v21  ;;  %v1496_v20 = vunpack.c.h.s8.bf16 %v712_v9  ;;  %v726_v21 = vld [vmem:[%s4877_s1 + $0x8e8] sm:$0xff] }
 0x409   : > { %3080 = vmatpush1.bf16.msra.mxu0 %v1365_v25  ;;  %3244 = vmatpush1.bf16.msra.mxu1 %v1367_v26  ;;  %v1495_v25 = vunpack.c.h.s8.bf16 %v711_v16  ;;  %v1510_v26 = vunpack.c.l.s8.bf16 %v726_v21 }
 0x40a   : > { %3081 = vmatprep.subr.bf16.mxu0 %v1382_v44  ;;  %3245 = vmatprep.subr.bf16.mxu1 %v1384_v27  ;;  %v1512_v44 = vunpack.c.l.s8.bf16 %v728_v24  ;;  %v725_v27 = vld [vmem:[%s4877_s1 + $0x8e0] sm:$0xff] }
 0x40b   : > { %v1509_v29 = vunpack.c.l.s8.bf16 %v725_v27  ;;  %v1525_v34 = vunpack.c.h.s8.bf16 %v725_v27 }
 0x40d   : > { %3082 = vmatpush1.bf16.msra.mxu0 %v1381_v30  ;;  %3246 = vmatpush1.bf16.msra.mxu1 %v1383_v32  ;;  %v1526_v30 = vunpack.c.h.s8.bf16 %v726_v21  ;;  %v1528_v32 = vunpack.c.h.s8.bf16 %v728_v24 }
 0x40e   : > { %3083 = vmatprep.subr.bf16.mxu0 %v1398_v53  ;;  %3247 = vmatprep.subr.bf16.mxu1 %v1400_v33  ;;  %v742_v53 = vld [vmem:[%s4877_s1 + $0x968] sm:$0xff]  ;;  %v744_v33 = vld [vmem:[%s4877_s1 + $0x978] sm:$0xff] }
 0x40f   : > { %v1558_v41 = vunpack.c.h.s8.bf16 %v742_v53 }
 0x411   : > { %3084 = vmatpush1.bf16.msra.mxu0 %v1397_v36  ;;  %3248 = vmatpush1.bf16.msra.mxu1 %v1399_v37  ;;  %v1544_v36 = vunpack.c.l.s8.bf16 %v744_v33  ;;  %v741_v37 = vld [vmem:[%s4877_s1 + $0x960] sm:$0xff] }
 0x412   : > { %3085 = vmatprep.subr.bf16.mxu0 %v1414_v58  ;;  %3249 = vmatprep.subr.bf16.mxu1 %v1416_v61  ;;  %v743_v58 = vld [vmem:[%s4877_s1 + $0x970] sm:$0xff]  ;;  %v1541_v61 = vunpack.c.l.s8.bf16 %v741_v37 }
 0x413   : > { %v1543_v40 = vunpack.c.l.s8.bf16 %v743_v58  ;;  %v1559_v47 = vunpack.c.h.s8.bf16 %v743_v58 }
 0x415   : > { %3086 = vmatpush1.bf16.msra.mxu0 %v1413_v42  ;;  %3250 = vmatpush1.bf16.msra.mxu1 %v1415_v43  ;;  %v1560_v42 = vunpack.c.h.s8.bf16 %v744_v33  ;;  %v758_v43 = vld [vmem:[%s4877_s1 + $0x9e8] sm:$0xff] }
 0x416   : > { %3087 = vmatprep.subr.bf16.mxu0 %v1430_v45  ;;  %3251 = vmatprep.subr.bf16.mxu1 %v1432_v46  ;;  %v760_v45 = vld [vmem:[%s4877_s1 + $0x9f8] sm:$0xff]  ;;  %v1557_v46 = vunpack.c.h.s8.bf16 %v741_v37  ;;  %v1574_v48 = vunpack.c.l.s8.bf16 %v758_v43  ;;  %v1590_v62 = vunpack.c.h.s8.bf16 %v758_v43 }
 0x419   : > { %3088 = vmatpush1.bf16.msra.mxu0 %v1429_v56  ;;  %3252 = vmatpush1.bf16.msra.mxu1 %v1431_v57  ;;  %v1576_v56 = vunpack.c.l.s8.bf16 %v760_v45  ;;  %v757_v57 = vld [vmem:[%s4877_s1 + $0x9e0] sm:$0xff] }
 0x41a   : > { %3089 = vmatprep.subr.bf16.mxu0 %v1446_v59  ;;  %3253 = vmatprep.subr.bf16.mxu1 %v1448_v60  ;;  %v759_v59 = vld [vmem:[%s4877_s1 + $0x9f0] sm:$0xff]  ;;  %v1573_v60 = vunpack.c.l.s8.bf16 %v757_v57 }
 0x41b   : > { %v1575_v50 = vunpack.c.l.s8.bf16 %v759_v59  ;;  %v1591_v8 = vunpack.c.h.s8.bf16 %v759_v59 }
 0x41d   : > { %3090 = vmatpush1.bf16.msra.mxu0 %v1445_v63  ;;  %3254 = vmatpush1.bf16.msra.mxu1 %v1447_v0  ;;  %v1592_v63 = vunpack.c.h.s8.bf16 %v760_v45  ;;  %v774_v0 = vld [vmem:[%s4877_s1 + $0xa68] sm:$0xff] }
 0x41e   : > { %3091 = vmatprep.subr.bf16.mxu0 %v1462_v6  ;;  %3255 = vmatprep.subr.bf16.mxu1 %v1464_v7  ;;  %v776_v6 = vld [vmem:[%s4877_s1 + $0xa78] sm:$0xff]  ;;  %v1589_v7 = vunpack.c.h.s8.bf16 %v757_v57  ;;  %v1606_v9 = vunpack.c.l.s8.bf16 %v774_v0  ;;  %v1622_v16 = vunpack.c.h.s8.bf16 %v774_v0 }
 0x421   : > { %3092 = vmatpush1.bf16.msra.mxu0 %v1461_v10  ;;  %3256 = vmatpush1.bf16.msra.mxu1 %v1463_v11  ;;  %v1608_v10 = vunpack.c.l.s8.bf16 %v776_v6  ;;  %v773_v11 = vld [vmem:[%s4877_s1 + $0xa60] sm:$0xff] }
 0x422   : > { %3102 = vmatprep.subr.bf16.mxu0 %v1478_v12  ;;  %3266 = vmatprep.subr.bf16.mxu1 %v1480_v13  ;;  %v775_v12 = vld [vmem:[%s4877_s1 + $0xa70] sm:$0xff]  ;;  %v1605_v13 = vunpack.c.l.s8.bf16 %v773_v11 }
 0x423   : > { %v1607_v14 = vunpack.c.l.s8.bf16 %v775_v12  ;;  %v1623_v21 = vunpack.c.h.s8.bf16 %v775_v12 }
 0x424   : > { %3094 = vmatmul.mubr.bf16.vlgmr.msra.gmra.mrb[12].mxu0 %v5017_v31  ;;  %3258 = vmatmul.mubr.bf16.vlgmr.msra.gmra.mrb[12].mxu1 %v5017_v31  ;;  %v1511_v31 = vunpack.c.l.s8.bf16 %v727_v28 }
 0x425   : > { %3103 = vmatpush1.bf16.msra.mxu0 %v1477_v17  ;;  %3267 = vmatpush1.bf16.msra.mxu1 %v1479_v18  ;;  %v1624_v17 = vunpack.c.h.s8.bf16 %v776_v6  ;;  %v790_v18 = vld [vmem:[%s4877_s1 + $0xae8] sm:$0xff] }
 0x426   : > { %3104 = vmatprep.subr.bf16.mxu0 %v1494_v19  ;;  %3268 = vmatprep.subr.bf16.mxu1 %v1496_v20  ;;  %v792_v19 = vld [vmem:[%s4877_s1 + $0xaf8] sm:$0xff]  ;;  %v1621_v20 = vunpack.c.h.s8.bf16 %v773_v11  ;;  %v1638_v24 = vunpack.c.l.s8.bf16 %v790_v18  ;;  %v1654_v28 = vunpack.c.h.s8.bf16 %v790_v18 }
 0x427   : > { %3134 = vmatprep.mubr.bf16.mxu0 %v5022_v39  ;;  %3298 = vmatprep.mubr.bf16.mxu1 %v5022_v39  ;;  %v1542_v39 = vunpack.c.l.s8.bf16 %v742_v53 }
 0x429   : > { %3105 = vmatpush1.bf16.msra.mxu0 %v1493_v23  ;;  %3269 = vmatpush1.bf16.msra.mxu1 %v1495_v25  ;;  %v1640_v23 = vunpack.c.l.s8.bf16 %v792_v19  ;;  %v789_v25 = vld [vmem:[%s4877_s1 + $0xae0] sm:$0xff] }
 0x42a   : > { %3106 = vmatprep.subr.bf16.mxu0 %v1510_v26  ;;  %3270 = vmatprep.subr.bf16.mxu1 %v1512_v44  ;;  %v791_v26 = vld [vmem:[%s4877_s1 + $0xaf0] sm:$0xff]  ;;  %v1637_v44 = vunpack.c.l.s8.bf16 %v789_v25 }
 0x42b   : > { %v1639_v27 = vunpack.c.l.s8.bf16 %v791_v26  ;;  %v1655_v53 = vunpack.c.h.s8.bf16 %v791_v26 }
 0x42d   : > { %3107 = vmatpush1.bf16.msra.mxu0 %v1509_v29  ;;  %3271 = vmatpush1.bf16.msra.mxu1 %v1511_v31  ;;  %v1656_v29 = vunpack.c.h.s8.bf16 %v792_v19  ;;  %v806_v31 = vld [vmem:[%s4877_s1 + $0xb68] sm:$0xff] }
 0x42e   : > { %3108 = vmatprep.subr.bf16.mxu0 %v1526_v30  ;;  %3272 = vmatprep.subr.bf16.mxu1 %v1528_v32  ;;  %v808_v30 = vld [vmem:[%s4877_s1 + $0xb78] sm:$0xff]  ;;  %v1653_v32 = vunpack.c.h.s8.bf16 %v789_v25  ;;  %v1670_v33 = vunpack.c.l.s8.bf16 %v806_v31  ;;  %v1686_v58 = vunpack.c.h.s8.bf16 %v806_v31 }
 0x431   : > { %3109 = vmatpush1.bf16.msra.mxu0 %v1525_v34  ;;  %3273 = vmatpush1.bf16.msra.mxu1 %v1527_v35  ;;  %v1672_v34 = vunpack.c.l.s8.bf16 %v808_v30  ;;  %v805_v35 = vld [vmem:[%s4877_s1 + $0xb60] sm:$0xff] }
 0x432   : > { %3110 = vmatprep.subr.bf16.mxu0 %v1542_v39  ;;  %3274 = vmatprep.subr.bf16.mxu1 %v1544_v36  ;;  %v807_v39 = vld [vmem:[%s4877_s1 + $0xb70] sm:$0xff]  ;;  %v1669_v36 = vunpack.c.l.s8.bf16 %v805_v35 }
 0x433   : > { %v1671_v37 = vunpack.c.l.s8.bf16 %v807_v39  ;;  %v1687_v43 = vunpack.c.h.s8.bf16 %v807_v39  ;;  %v886_v39 = vld [vmem:[%s4877_s1 + $0xde8] sm:$0xff] }
 0x435   : > { %3111 = vmatpush1.bf16.msra.mxu0 %v1541_v61  ;;  %3275 = vmatpush1.bf16.msra.mxu1 %v1543_v40  ;;  %v1688_v61 = vunpack.c.h.s8.bf16 %v808_v30  ;;  %v822_v40 = vld [vmem:[%s4877_s1 + $0xbe8] sm:$0xff]  ;;  %v869_v30 = vld [vmem:[%s4877_s1 + $0xd60] sm:$0xff] }
 0x436   : > { %3112 = vmatprep.subr.bf16.mxu0 %v1558_v41  ;;  %3276 = vmatprep.subr.bf16.mxu1 %v1560_v42  ;;  %v824_v41 = vld [vmem:[%s4877_s1 + $0xbf8] sm:$0xff]  ;;  %v1685_v42 = vunpack.c.h.s8.bf16 %v805_v35  ;;  %v1702_v45 = vunpack.c.l.s8.bf16 %v822_v40  ;;  %v1718_v59 = vunpack.c.h.s8.bf16 %v822_v40 }
 0x439   : > { %3113 = vmatpush1.bf16.msra.mxu0 %v1557_v46  ;;  %3277 = vmatpush1.bf16.msra.mxu1 %v1559_v47  ;;  %v1704_v46 = vunpack.c.l.s8.bf16 %v824_v41  ;;  %v821_v47 = vld [vmem:[%s4877_s1 + $0xbe0] sm:$0xff] }
 0x43a   : > { %3114 = vmatprep.subr.bf16.mxu0 %v1574_v48  ;;  %3278 = vmatprep.subr.bf16.mxu1 %v1576_v56  ;;  %v823_v48 = vld [vmem:[%s4877_s1 + $0xbf0] sm:$0xff]  ;;  %v1701_v56 = vunpack.c.l.s8.bf16 %v821_v47 }
 0x43b   : > { %v1703_v57 = vunpack.c.l.s8.bf16 %v823_v48  ;;  %v1719_v0 = vunpack.c.h.s8.bf16 %v823_v48 }
 0x43d   : > { %3115 = vmatpush1.bf16.msra.mxu0 %v1573_v60  ;;  %3279 = vmatpush1.bf16.msra.mxu1 %v1575_v50  ;;  %v1720_v60 = vunpack.c.h.s8.bf16 %v824_v41  ;;  %v838_v50 = vld [vmem:[%s4877_s1 + $0xc68] sm:$0xff]  ;;  %v885_v41 = vld [vmem:[%s4877_s1 + $0xde0] sm:$0xff] }
 0x43e   : > { %3116 = vmatprep.subr.bf16.mxu0 %v1590_v62  ;;  %3280 = vmatprep.subr.bf16.mxu1 %v1592_v63  ;;  %v840_v62 = vld [vmem:[%s4877_s1 + $0xc78] sm:$0xff]  ;;  %v1717_v63 = vunpack.c.h.s8.bf16 %v821_v47  ;;  %v1734_v6 = vunpack.c.l.s8.bf16 %v838_v50  ;;  %v1750_v12 = vunpack.c.h.s8.bf16 %v838_v50 }
 0x441   : > { %3117 = vmatpush1.bf16.msra.mxu0 %v1589_v7  ;;  %3281 = vmatpush1.bf16.msra.mxu1 %v1591_v8  ;;  %v1736_v7 = vunpack.c.l.s8.bf16 %v840_v62  ;;  %v837_v8 = vld [vmem:[%s4877_s1 + $0xc60] sm:$0xff] }
 0x442   : > { %3118 = vmatprep.subr.bf16.mxu0 %v1606_v9  ;;  %3282 = vmatprep.subr.bf16.mxu1 %v1608_v10  ;;  %v839_v9 = vld [vmem:[%s4877_s1 + $0xc70] sm:$0xff]  ;;  %v1733_v10 = vunpack.c.l.s8.bf16 %v837_v8 }
 0x443   : > { %v1735_v11 = vunpack.c.l.s8.bf16 %v839_v9  ;;  %v1751_v18 = vunpack.c.h.s8.bf16 %v839_v9 }
 0x445   : > { %3119 = vmatpush1.bf16.msra.mxu0 %v1605_v13  ;;  %3283 = vmatpush1.bf16.msra.mxu1 %v1607_v14  ;;  %v1752_v13 = vunpack.c.h.s8.bf16 %v840_v62  ;;  %v854_v14 = vld [vmem:[%s4877_s1 + $0xce8] sm:$0xff]  ;;  %v1846_v62 = vunpack.c.h.s8.bf16 %v886_v39 }
 0x446   : > { %3120 = vmatprep.subr.bf16.mxu0 %v1622_v16  ;;  %3284 = vmatprep.subr.bf16.mxu1 %v1624_v17  ;;  %v856_v16 = vld [vmem:[%s4877_s1 + $0xcf8] sm:$0xff]  ;;  %v1749_v17 = vunpack.c.h.s8.bf16 %v837_v8  ;;  %v1766_v19 = vunpack.c.l.s8.bf16 %v854_v14  ;;  %v1782_v25 = vunpack.c.h.s8.bf16 %v854_v14 }
 0x447   : > { %v1784_v26 = vunpack.c.h.s8.bf16 %v856_v16 }
 0x449   : > { %3121 = vmatpush1.bf16.msra.mxu0 %v1621_v20  ;;  %3285 = vmatpush1.bf16.msra.mxu1 %v1623_v21  ;;  %v1768_v20 = vunpack.c.l.s8.bf16 %v856_v16  ;;  %v853_v21 = vld [vmem:[%s4877_s1 + $0xce0] sm:$0xff] }
 0x44a   : > { %3122 = vmatprep.subr.bf16.mxu0 %v1638_v24  ;;  %3286 = vmatprep.subr.bf16.mxu1 %v1640_v23  ;;  %v855_v24 = vld [vmem:[%s4877_s1 + $0xcf0] sm:$0xff]  ;;  %v1765_v23 = vunpack.c.l.s8.bf16 %v853_v21 }
 0x44d   : > { %3123 = vmatpush1.bf16.msra.mxu0 %v1637_v44  ;;  %3287 = vmatpush1.bf16.msra.mxu1 %v1639_v27  ;;  %v870_v44 = vld [vmem:[%s4877_s1 + $0xd68] sm:$0xff]  ;;  %v872_v27 = vld [vmem:[%s4877_s1 + $0xd78] sm:$0xff] }
 0x44e   : > { %3124 = vmatprep.subr.bf16.mxu0 %v1654_v28  ;;  %3288 = vmatprep.subr.bf16.mxu1 %v1656_v29  ;;  %v1781_v28 = vunpack.c.h.s8.bf16 %v853_v21  ;;  %v1783_v29 = vunpack.c.h.s8.bf16 %v855_v24  ;;  %v1800_v31 = vunpack.c.l.s8.bf16 %v872_v27  ;;  %v1816_v35 = vunpack.c.h.s8.bf16 %v872_v27 }
 0x451   : > { %3125 = vmatpush1.bf16.msra.mxu0 %v1653_v32  ;;  %3289 = vmatpush1.bf16.msra.mxu1 %v1655_v53  ;;  %v871_v32 = vld [vmem:[%s4877_s1 + $0xd70] sm:$0xff]  ;;  %v1797_v53 = vunpack.c.l.s8.bf16 %v869_v30 }
 0x452   : > { %3126 = vmatprep.subr.bf16.mxu0 %v1670_v33  ;;  %3290 = vmatprep.subr.bf16.mxu1 %v1672_v34  ;;  %v1799_v33 = vunpack.c.l.s8.bf16 %v871_v32  ;;  %v1814_v34 = vunpack.c.h.s8.bf16 %v870_v44 }
 0x455   : > { %3127 = vmatpush1.bf16.msra.mxu0 %v1669_v36  ;;  %3291 = vmatpush1.bf16.msra.mxu1 %v1671_v37  ;;  %v888_v36 = vld [vmem:[%s4877_s1 + $0xdf8] sm:$0xff]  ;;  %v1813_v37 = vunpack.c.h.s8.bf16 %v869_v30 }
 0x456   : > { %3128 = vmatprep.subr.bf16.mxu0 %v1686_v58  ;;  %3292 = vmatprep.subr.bf16.mxu1 %v1688_v61  ;;  %v1815_v58 = vunpack.c.h.s8.bf16 %v871_v32  ;;  %v1830_v61 = vunpack.c.l.s8.bf16 %v886_v39  ;;  %v1832_v40 = vunpack.c.l.s8.bf16 %v888_v36  ;;  %v5558_v39 = vsub.s32 3, %v4919_v38 }
 0x459   : > { %3129 = vmatpush1.bf16.msra.mxu0 %v1685_v42  ;;  %3293 = vmatpush1.bf16.msra.mxu1 %v1687_v43  ;;  %v887_v42 = vld [vmem:[%s4877_s1 + $0xdf0] sm:$0xff] }
 0x45a   : > { %3130 = vmatprep.subr.bf16.mxu0 %v1702_v45  ;;  %3294 = vmatprep.subr.bf16.mxu1 %v1704_v46  ;;  %v1847_v8 = vunpack.c.h.s8.bf16 %v887_v42 }
 0x45d   : > { %3131 = vmatpush1.bf16.msra.mxu0 %v1701_v56  ;;  %3295 = vmatpush1.bf16.msra.mxu1 %v1703_v57  ;;  %v1829_v57 = vunpack.c.l.s8.bf16 %v885_v41 }
 0x45e   : > { %3132 = vmatprep.subr.bf16.mxu0 %v1718_v59  ;;  %3296 = vmatprep.subr.bf16.mxu1 %v1720_v60  ;;  %v1831_v59 = vunpack.c.l.s8.bf16 %v887_v42 }
 0x461   : > { %3133 = vmatpush1.bf16.msra.mxu0 %v1717_v63  ;;  %3297 = vmatpush1.bf16.msra.mxu1 %v1719_v0  ;;  %v1848_v63 = vunpack.c.h.s8.bf16 %v888_v36  ;;  %v902_v0 = vld [vmem:[%s4877_s1 + $0xe68] sm:$0xff]  ;;  %v3580_v36 = vld [vmem:[%s363_s18] sm:$0xff] }
 0x462   : > { %3143 = vmatprep.subr.bf16.mxu0 %v1734_v6  ;;  %3307 = vmatprep.subr.bf16.mxu1 %v1736_v7  ;;  %v904_v6 = vld [vmem:[%s4877_s1 + $0xe78] sm:$0xff]  ;;  %v1845_v7 = vunpack.c.h.s8.bf16 %v885_v41  ;;  %v1862_v9 = vunpack.c.l.s8.bf16 %v902_v0  ;;  %v1878_v16 = vunpack.c.h.s8.bf16 %v902_v0  ;;  %v3591_v42 = vrot.slane %v3580_v36, %v4931_v49 }
 0x464   : > { %3135 = vmatmul.mubr.bf16.vlgmr.msra.gmra.mrb[12].mxu0 %v5060_v15  ;;  %3299 = vmatmul.mubr.bf16.vlgmr.msra.gmra.mrb[12].mxu1 %v5060_v15  ;;  %v1767_v15 = vunpack.c.l.s8.bf16 %v855_v24 }
 0x465   : > { %3144 = vmatpush1.bf16.msra.mxu0 %v1733_v10  ;;  %3308 = vmatpush1.bf16.msra.mxu1 %v1735_v11  ;;  %v1864_v10 = vunpack.c.l.s8.bf16 %v904_v6  ;;  %v901_v11 = vld [vmem:[%s4877_s1 + $0xe60] sm:$0xff] }
 0x466   : > { %3145 = vmatprep.subr.bf16.mxu0 %v1750_v12  ;;  %3309 = vmatprep.subr.bf16.mxu1 %v1752_v13  ;;  %v903_v12 = vld [vmem:[%s4877_s1 + $0xe70] sm:$0xff]  ;;  %v1861_v13 = vunpack.c.l.s8.bf16 %v901_v11 }
 0x467   : > { %3175 = vmatprep.mubr.bf16.mxu0 %v5066_v22  ;;  %3339 = vmatprep.mubr.bf16.mxu1 %v5066_v22  ;;  %v1798_v22 = vunpack.c.l.s8.bf16 %v870_v44  ;;  %v1863_v14 = vunpack.c.l.s8.bf16 %v903_v12  ;;  %v1879_v21 = vunpack.c.h.s8.bf16 %v903_v12 }
 0x469   : > { %3146 = vmatpush1.bf16.msra.mxu0 %v1749_v17  ;;  %3310 = vmatpush1.bf16.msra.mxu1 %v1751_v18  ;;  %v1880_v17 = vunpack.c.h.s8.bf16 %v904_v6  ;;  %v918_v18 = vld [vmem:[%s4877_s1 + $0xee8] sm:$0xff] }
 0x46a   : > { %3147 = vmatprep.subr.bf16.mxu0 %v1766_v19  ;;  %3311 = vmatprep.subr.bf16.mxu1 %v1768_v20  ;;  %v920_v19 = vld [vmem:[%s4877_s1 + $0xef8] sm:$0xff]  ;;  %v1877_v20 = vunpack.c.h.s8.bf16 %v901_v11  ;;  %v1894_v24 = vunpack.c.l.s8.bf16 %v918_v18  ;;  %v1910_v27 = vunpack.c.h.s8.bf16 %v918_v18  ;;  %v5589_v18 = vsub.s32 2, %v4919_v38 }
 0x46d   : > { %3148 = vmatpush1.bf16.msra.mxu0 %v1765_v23  ;;  %3312 = vmatpush1.bf16.msra.mxu1 %v1767_v15  ;;  %v1896_v23 = vunpack.c.l.s8.bf16 %v920_v19  ;;  %v917_v15 = vld [vmem:[%s4877_s1 + $0xee0] sm:$0xff] }
 0x46e   : > { %3149 = vmatprep.subr.bf16.mxu0 %v1782_v25  ;;  %3313 = vmatprep.subr.bf16.mxu1 %v1784_v26  ;;  %v919_v25 = vld [vmem:[%s4877_s1 + $0xef0] sm:$0xff]  ;;  %v1893_v26 = vunpack.c.l.s8.bf16 %v917_v15 }
 0x46f   : > { %v1895_v44 = vunpack.c.l.s8.bf16 %v919_v25  ;;  %v1911_v30 = vunpack.c.h.s8.bf16 %v919_v25 }
 0x471   : > { %3150 = vmatpush1.bf16.msra.mxu0 %v1781_v28  ;;  %3314 = vmatpush1.bf16.msra.mxu1 %v1783_v29  ;;  %v1912_v28 = vunpack.c.h.s8.bf16 %v920_v19  ;;  %v934_v29 = vld [vmem:[%s4877_s1 + $0xf68] sm:$0xff] }
 0x472   : > { %3151 = vmatprep.subr.bf16.mxu0 %v1798_v22  ;;  %3315 = vmatprep.subr.bf16.mxu1 %v1800_v31  ;;  %v936_v22 = vld [vmem:[%s4877_s1 + $0xf78] sm:$0xff]  ;;  %v1909_v31 = vunpack.c.h.s8.bf16 %v917_v15  ;;  %v1926_v32 = vunpack.c.l.s8.bf16 %v934_v29  ;;  %v5597_v15 = vsub.s32 7, %v4919_v38 }
 0x473   : > { %v1944_v41 = vunpack.c.h.s8.bf16 %v936_v22 }
 0x475   : > { %3152 = vmatpush1.bf16.msra.mxu0 %v1797_v53  ;;  %3316 = vmatpush1.bf16.msra.mxu1 %v1799_v33  ;;  %v1928_v53 = vunpack.c.l.s8.bf16 %v936_v22  ;;  %v933_v33 = vld [vmem:[%s4877_s1 + $0xf60] sm:$0xff] }
 0x476   : > { %3153 = vmatprep.subr.bf16.mxu0 %v1814_v34  ;;  %3317 = vmatprep.subr.bf16.mxu1 %v1816_v35  ;;  %v935_v34 = vld [vmem:[%s4877_s1 + $0xf70] sm:$0xff]  ;;  %v5555_v35 = vsub.s32 1, %v4919_v38 }
 0x477   : > { %v5534_v43 = vpop.f32.mrb[8].mxu0  ;;  %v5536_v45 = vpop.f32.mrb[8].mxu1 }
 0x478   : > { %v5538_v46 = vpop.f32.mrb[9].mxu0  ;;  %v5540_v47 = vpop.f32.mrb[9].mxu1 }
 0x479   : > { %v2853_v48 = vpop.f32.mrb[10].mxu0  ;;  %v3017_v56 = vpop.f32.mrb[10].mxu1  ;;  %3154 = vmatpush1.bf16.msra.mxu0 %v1813_v37  ;;  %3318 = vmatpush1.bf16.msra.mxu1 %v1815_v58  ;;  %v5564_v37 = vld [vmem:[%s345_s12] sm:$0xff]  ;;  %v1925_v58 = vunpack.c.l.s8.bf16 %v933_v33 }
 0x47a   : > { %v2854_v60 = vpop.f32.mrb[11].mxu0  ;;  %v3018_v50 = vpop.f32.mrb[11].mxu1  ;;  %3155 = vmatprep.subr.bf16.mxu0 %v1830_v61  ;;  %3319 = vmatprep.subr.bf16.mxu1 %v1832_v40  ;;  %v1927_v61 = vunpack.c.l.s8.bf16 %v935_v34  ;;  %v1942_v40 = vunpack.c.h.s8.bf16 %v934_v29  ;;  %v5569_v48 = vld [vmem:[%s354_s27] sm:$0xff]  ;;  %v3359_v56 = vrot.slane %v5564_v37, %v5555_v35 }
 0x47b   : > { %v952_v60 = vld [vmem:[%s4877_s1 + $0xff8] sm:$0xff]  ;;  %v1941_v50 = vunpack.c.h.s8.bf16 %v933_v33  ;;  %v3467_v12 = vrot.slane %v5569_v48, %v5558_v39  ;;  %v3383_v33 = vrot.slane %v5564_v37, %v5597_v15 }
 0x47c   : > { %v1960_v6 = vunpack.c.l.s8.bf16 %v952_v60 }
 0x47d   : > { %3156 = vmatpush1.bf16.msra.mxu0 %v1829_v57  ;;  %3320 = vmatpush1.bf16.msra.mxu1 %v1831_v59  ;;  %v3367_v57 = vrot.slane %v5564_v37, %v5558_v39  ;;  %v950_v59 = vld [vmem:[%s4877_s1 + $0xfe8] sm:$0xff] }
 0x47e   : > { %3157 = vmatprep.subr.bf16.mxu0 %v1846_v62  ;;  %3321 = vmatprep.subr.bf16.mxu1 %v1848_v63  ;;  %v1943_v62 = vunpack.c.h.s8.bf16 %v935_v34  ;;  %v3459_v63 = vrot.slane %v5569_v48, %v5555_v35  ;;  %v1958_v0 = vunpack.c.l.s8.bf16 %v950_v59  ;;  %v1974_v19 = vunpack.c.h.s8.bf16 %v950_v59  ;;  %v5613_v34 = vld [vmem:[%s363_s18 + $0x8] sm:$0xff] }
 0x47f   : > { %v3435_v11 = vmul.f32 %v3367_v57, %v5236_v5  ;;  %v5623_v59 = vsub.s32 6, %v4919_v38 }
 0x481   : > { %3158 = vmatpush1.bf16.msra.mxu0 %v1845_v7  ;;  %3322 = vmatpush1.bf16.msra.mxu1 %v1847_v8  ;;  %v949_v7 = vld [vmem:[%s4877_s1 + $0xfe0] sm:$0xff]  ;;  %v951_v8 = vld [vmem:[%s4877_s1 + $0xff0] sm:$0xff] }
 0x482   : > { %3159 = vmatprep.subr.bf16.mxu0 %v1862_v9  ;;  %3323 = vmatprep.subr.bf16.mxu1 %v1864_v10  ;;  %v3599_v9 = vcombine.high %v3591_v42, %v3591_v42  ;;  %v3433_v10 = vmul.f32 %v3359_v56, %v5234_v4  ;;  %v1976_v4 = vunpack.c.h.s8.bf16 %v952_v60  ;;  %v1973_v25 = vunpack.c.h.s8.bf16 %v949_v7 }
 0x483   : > { %v5619_v56 = vsub.s32 4, %v4919_v38 }
 0x484   : > { %v3621_v5 = vrot.slane %v3599_v9, %v4931_v49 }
 0x485   : > { %3160 = vmatpush1.bf16.msra.mxu0 %v1861_v13  ;;  %3324 = vmatpush1.bf16.msra.mxu1 %v1863_v14  ;;  %v3584_v13 = vcombine.high %v3580_v36, %v3580_v36  ;;  %v5586_v14 = vsub.s32 0, %v4919_v38 }
 0x486   : > { %3161 = vmatprep.subr.bf16.mxu0 %v1878_v16  ;;  %3325 = vmatprep.subr.bf16.mxu1 %v1880_v17  ;;  %v1957_v16 = vunpack.c.l.s8.bf16 %v949_v7  ;;  %v1959_v17 = vunpack.c.l.s8.bf16 %v951_v8 }
 0x489   : > { %3162 = vmatpush1.bf16.msra.mxu0 %v1877_v20  ;;  %3326 = vmatpush1.bf16.msra.mxu1 %v1879_v21  ;;  %v3533_v20 = vadd.f32 %v3459_v63, %v3433_v10  ;;  %v3535_v21 = vadd.f32 %v3467_v12, %v3435_v11  ;;  %v5647_v11 = vld [vmem:[%s354_s27 + $0x8] sm:$0xff] }
 0x48a   : > { %3163 = vmatprep.subr.bf16.mxu0 %v1894_v24  ;;  %3327 = vmatprep.subr.bf16.mxu1 %v1896_v23  ;;  %v3598_v24 = vrot.slane %v3584_v13, %v4931_v49  ;;  %v5594_v23 = vsub.s32 5, %v4919_v38 }
 0x48b   : > { %v3549_v29 = vmax.f32 %v3533_v20, 0.0  ;;  %v3551_v22 = vmax.f32 %v3535_v21, 0.0 }
 0x48d   : > { %3164 = vmatpush1.bf16.msra.mxu0 %v1893_v26  ;;  %3328 = vmatpush1.bf16.msra.mxu1 %v1895_v44  ;;  %v1975_v26 = vunpack.c.h.s8.bf16 %v951_v8  ;;  %v3355_v44 = vrot.slane %v5564_v37, %v5586_v14 }
 0x48e   : > { %3165 = vmatprep.subr.bf16.mxu0 %v1910_v27  ;;  %3329 = vmatprep.subr.bf16.mxu1 %v1912_v28  ;;  %v3363_v27 = vrot.slane %v5564_v37, %v5589_v18  ;;  %v3631_v28 = vcombine.high %v3621_v5, %v3621_v5 }
 0x48f   : > { %v3432_v36 = vmul.f32 %v3355_v44, %v5230_v2  ;;  %v3475_v2 = vrot.slane %v5569_v48, %v5594_v23 }
 0x491   : > { %3166 = vmatpush1.bf16.msra.mxu0 %v1909_v31  ;;  %3330 = vmatpush1.bf16.msra.mxu1 %v1911_v30  ;;  %v3600_v31 = vcombine.high %v3598_v24, %v3598_v24  ;;  %v3375_v30 = vrot.slane %v5564_v37, %v5594_v23 }
 0x492   : > { %3167 = vmatprep.subr.bf16.mxu0 %v1926_v32  ;;  %3331 = vmatprep.subr.bf16.mxu1 %v1928_v53  ;;  %v3455_v32 = vrot.slane %v5569_v48, %v5586_v14  ;;  %v3463_v53 = vrot.slane %v5569_v48, %v5589_v18 }
 0x493   : > { %v3628_v57 = vrot.slane %v3600_v31, %v4931_v49  ;;  %v3437_v60 = vmul.f32 %v3375_v30, %v5386_v54  ;;  %v5637_v54 = vld [vmem:[%s345_s12 + $0x8] sm:$0xff] }
 0x494   : > { %v3532_v38 = vadd.f32 %v3455_v32, %v3432_v36  ;;  %v3391_v9 = vrot.slane %v5637_v54, %v5555_v35  ;;  %v3399_v12 = vrot.slane %v5637_v54, %v5558_v39 }
 0x495   : > { %3168 = vmatpush1.bf16.msra.mxu0 %v1925_v58  ;;  %3332 = vmatpush1.bf16.msra.mxu1 %v1927_v61  ;;  %v3434_v58 = vmul.f32 %v3363_v27, %v5232_v3  ;;  %v3607_v61 = vrot.slane %v3591_v42, %v4931_v49  ;;  %v3640_v3 = vrot.slane %v5613_v34, %v4931_v49 }
 0x496   : > { %3169 = vmatprep.subr.bf16.mxu0 %v1942_v40  ;;  %3333 = vmatprep.subr.bf16.mxu1 %v1944_v41  ;;  %v3565_v40 = vpack.c.bf16 %v3549_v29, %v3549_v29  ;;  %v3567_v41 = vpack.c.bf16 %v3551_v22, %v3551_v22  ;;  %v3439_v42 = vmul.f32 %v3383_v33, %v5388_v55  ;;  %v3548_v10 = vmax.f32 %v3532_v38, 0.0 }
 0x497   : > { %v3534_v63 = vadd.f32 %v3463_v53, %v3434_v58  ;;  %v3537_v55 = vadd.f32 %v3475_v2, %v3437_v60  ;;  %v3648_v7 = vcombine.high %v3640_v3, %v3640_v3  ;;  %v3443_v44 = vmul.f32 %v3399_v12, %v5540_v47 }
 0x498   : > { %v3487_v53 = vrot.slane %v5647_v11, %v5586_v14  ;;  %v3656_v33 = vrot.slane %v3640_v3, %v4931_v49  ;;  %v3511_v12 = vrot.slane %v5647_v11, %v5623_v59 }
 0x499   : > { %3170 = vmatpush1.bf16.msra.mxu0 %v1941_v50  ;;  %3334 = vmatpush1.bf16.msra.mxu1 %v1943_v62  ;;  %v3483_v50 = vrot.slane %v5569_v48, %v5597_v15  ;;  %v3629_v62 = vcombine.high %v3607_v61, %v3607_v61  ;;  %v3550_v13 = vmax.f32 %v3534_v63, 0.0  ;;  %v3670_v20 = vrot.slane %v3648_v7, %v4931_v49 }
 0x49a   : > { %3171 = vmatprep.subr.bf16.mxu0 %v1958_v0  ;;  %3335 = vmatprep.subr.bf16.mxu1 %v1960_v6  ;;  %v3632_v0 = vcombine.high %v3628_v57, %v3628_v57  ;;  %v3379_v6 = vrot.slane %v5564_v37, %v5623_v59 }
 0x49b   : > { %v3539_v8 = vadd.f32 %v3483_v50, %v3439_v42  ;;  %v3566_v27 = vpack.c.bf16 %v3550_v13, %v3550_v13  ;;  %v3680_v31 = vcombine.high %v3670_v20, %v3670_v20 }
 0x49d   : > { %3172 = vmatpush1.bf16.msra.mxu0 %v1957_v16  ;;  %3336 = vmatpush1.bf16.msra.mxu1 %v1959_v17  ;;  %v3614_v17 = vrot.slane %v3598_v24, %v4931_v49  ;;  %v3555_v21 = vmax.f32 %v3539_v8, 0.0  ;;  %v3499_v24 = vrot.slane %v5647_v11, %v5558_v39  ;;  %v3403_v8 = vrot.slane %v5637_v54, %v5619_v56 }
 0x49e   : > { %3173 = vmatprep.subr.bf16.mxu0 %v1974_v19  ;;  %3337 = vmatprep.subr.bf16.mxu1 %v1976_v4  ;;  %v3438_v19 = vmul.f32 %v3379_v6, %v5384_v52  ;;  %v3479_v4 = vrot.slane %v5569_v48, %v5623_v59 }
 0x49f   : > { %v3571_v30 = vpack.c.bf16 %v3555_v21, %v3555_v21  ;;  %v3543_v47 = vadd.f32 %v3499_v24, %v3443_v44 }
 0x4a0   : > { %v3538_v29 = vadd.f32 %v3479_v4, %v3438_v19 }
 0x4a1   : > { %3174 = vmatpush1.bf16.msra.mxu0 %v1973_v25  ;;  %3338 = vmatpush1.bf16.msra.mxu1 %v1975_v26  ;;  %v3441_v25 = vmul.f32 %v3391_v9, %v5538_v46  ;;  %v3564_v26 = vpack.c.bf16 %v3548_v10, %v3548_v10  ;;  %v3395_v46 = vrot.slane %v5637_v54, %v5589_v18 }
 0x4a2   : > { %3698 = vmatprep.subr.bf16.mxu0 %v3621_v5  ;;  %3738 = vmatprep.subr.bf16.mxu1 %v3631_v28  ;;  %v3553_v5 = vmax.f32 %v3537_v55, 0.0  ;;  %v3630_v28 = vcombine.high %v3614_v17, %v3614_v17  ;;  %v3554_v36 = vmax.f32 %v3538_v29, 0.0  ;;  %v3411_v9 = vrot.slane %v5637_v54, %v5623_v59 }
 0x4a3   : > { %v3442_v58 = vmul.f32 %v3395_v46, %v5536_v45  ;;  %v3415_v10 = vrot.slane %v5637_v54, %v5597_v15 }
 0x4a4   : > { %3176 = vmatmul.mubr.bf16.vlgmr.msra.gmra.mrb[12].mxu0 %v5104_v1  ;;  %3340 = vmatmul.mubr.bf16.vlgmr.msra.gmra.mrb[12].mxu1 %v5104_v1  ;;  %v3371_v1 = vrot.slane %v5564_v37, %v5619_v56  ;;  %v3471_v37 = vrot.slane %v5569_v48, %v5619_v56  ;;  %v3387_v48 = vrot.slane %v5637_v54, %v5586_v14 }
 0x4a5   : > { %3730 = vmatprep.mubr.bf16.mxu0 %v3565_v40  ;;  %3770 = vmatprep.mubr.bf16.mxu1 %v3567_v41  ;;  %v3569_v22 = vpack.c.bf16 %v3553_v5, %v3553_v5  ;;  %v3559_v41 = vmax.f32 %v3543_v47, 0.0  ;;  %v3570_v2 = vpack.c.bf16 %v3554_v36, %v3554_v36 }
 0x4a6   : > { %v3436_v16 = vmul.f32 %v3371_v1, %v5382_v51  ;;  %v3491_v51 = vrot.slane %v5647_v11, %v5555_v35  ;;  %v3440_v32 = vmul.f32 %v3387_v48, %v5534_v43  ;;  %v3678_v43 = vcombine.high %v3656_v33, %v3656_v33 }
 0x4a7   : > { %v3575_v50 = vpack.c.bf16 %v3559_v41, %v3559_v41 }
 0x4a8   : > { %v3536_v52 = vadd.f32 %v3471_v37, %v3436_v16  ;;  %v3541_v35 = vadd.f32 %v3491_v51, %v3441_v25  ;;  %v3540_v60 = vadd.f32 %v3487_v53, %v3440_v32  ;;  %v3507_v37 = vrot.slane %v5647_v11, %v5594_v23 }
 0x4aa   : > { %3699 = vmatpush1.bf16.xpose.msra.mxu0 %v3607_v61  ;;  %3739 = vmatpush1.bf16.xpose.msra.mxu1 %v3629_v62  ;;  %v3552_v39 = vmax.f32 %v3536_v52, 0.0  ;;  %v3495_v61 = vrot.slane %v5647_v11, %v5589_v18  ;;  %v3557_v40 = vmax.f32 %v3541_v35, 0.0  ;;  %v3556_v3 = vmax.f32 %v3540_v60, 0.0 }
 0x4ab   : > { %3778 = vmatprep.subr.bf16.mxu0 %v3628_v57  ;;  %3818 = vmatprep.subr.bf16.mxu1 %v3632_v0  ;;  %v3633_v62 = vcombine.high %v5613_v34, %v5613_v34  ;;  %v3407_v34 = vrot.slane %v5637_v54, %v5594_v23 }
 0x4ac   : > { %v3568_v57 = vpack.c.bf16 %v3552_v39, %v3552_v39  ;;  %v3542_v42 = vadd.f32 %v3495_v61, %v3442_v58  ;;  %v3573_v14 = vpack.c.bf16 %v3557_v40, %v3557_v40  ;;  %v3572_v18 = vpack.c.bf16 %v3556_v3, %v3556_v3 }
 0x4ad   : > { %v3647_v63 = vrot.slane %v3633_v62, %v4931_v49 }
 0x4ae   : > { %v3558_v45 = vmax.f32 %v3542_v42, 0.0 }
 0x4af   : > { %v3649_v1 = vcombine.high %v3647_v63, %v3647_v63  ;;  %v3663_v6 = vrot.slane %v3647_v63, %v4931_v49 }
 0x4b0   : > { %v3574_v38 = vpack.c.bf16 %v3558_v45, %v3558_v45 }
 0x4b1   : > { %3731 = vmatmul.mubr.bf16.vlgmr.msra.gmra.mrb[16].mxu0 %v3564_v26  ;;  %3771 = vmatmul.mubr.bf16.vlgmr.msra.gmra.mrb[16].mxu1 %v3566_v27  ;;  %v3677_v0 = vrot.slane %v3649_v1, %v4931_v49  ;;  %v3679_v7 = vcombine.high %v3663_v6, %v3663_v6  ;;  %v3503_v49 = vrot.slane %v5647_v11, %v5619_v56 }
 0x4b2   : > { %3779 = vmatpush1.bf16.xpose.msra.mxu0 %v3614_v17  ;;  %3810 = vmatprep.mubr.bf16.mxu0 %v3569_v22  ;;  %v3515_v17 = vrot.slane %v5647_v11, %v5597_v15 }
 0x4b3   : > { %3819 = vmatpush1.bf16.xpose.msra.mxu1 %v3630_v28  ;;  %3850 = vmatprep.mubr.bf16.mxu1 %v3571_v30  ;;  %v3681_v55 = vcombine.high %v3677_v0, %v3677_v0 }
 0x4b4   : > { %3858 = vmatprep.subr.bf16.mxu0 %v3670_v20  ;;  %3898 = vmatprep.subr.bf16.mxu1 %v3680_v31 }
 0x4b9   : > { %3811 = vmatmul.mubr.bf16.vlgmr.msra.gmra.mrb[20].mxu0 %v3568_v57 }
 0x4ba   : > { %3851 = vmatmul.mubr.bf16.vlgmr.msra.gmra.mrb[20].mxu1 %v3570_v2  ;;  %3859 = vmatpush1.bf16.xpose.msra.mxu0 %v3656_v33 }
 0x4bb   : > { %3890 = vmatprep.mubr.bf16.mxu0 %v3573_v14  ;;  %3899 = vmatpush1.bf16.xpose.msra.mxu1 %v3678_v43 }
 0x4bc   : > { %3930 = vmatprep.mubr.bf16.mxu1 %v3575_v50  ;;  %3938 = vmatprep.subr.bf16.mxu0 %v3677_v0 }
 0x4bd   : > { %3978 = vmatprep.subr.bf16.mxu1 %v3681_v55 }
 0x4c1   : > { %3891 = vmatmul.mubr.bf16.vlgmr.msra.gmra.mrb[24].mxu0 %v3572_v18 }
 0x4c2   : > { %3931 = vmatmul.mubr.bf16.vlgmr.msra.gmra.mrb[24].mxu1 %v3574_v38  ;;  %3939 = vmatpush1.bf16.xpose.msra.mxu0 %v3663_v6 }
 0x4c3   : > { %3979 = vmatpush1.bf16.xpose.msra.mxu1 %v3679_v7 }
 0x577   : > { %v3177_v13 = vpop.f32.mrb[12].mxu0  ;;  %v3341_v16 = vpop.f32.mrb[12].mxu1 }
 0x578   : > { %v3444_v19 = vmul.f32 %v3403_v8, %v3177_v13  ;;  %v3446_v4 = vmul.f32 %v3411_v9, %v3341_v16  ;;  %v3179_v5 = vpop.f32.mrb[13].mxu0  ;;  %v3343_v20 = vpop.f32.mrb[13].mxu1 }
 0x579   : > { %v3445_v21 = vmul.f32 %v3407_v34, %v3179_v5  ;;  %v3447_v54 = vmul.f32 %v3415_v10, %v3343_v20  ;;  %v3181_v25 = vpop.f32.mrb[14].mxu0  ;;  %v3345_v51 = vpop.f32.mrb[14].mxu1  ;;  %v4018_v34 = vld [vmem:[%s4903_s2] sm:$0x3] }
 0x57a   : > { %v3544_v56 = vadd.f32 %v3503_v49, %v3444_v19  ;;  %v3546_v26 = vadd.f32 %v3511_v12, %v3446_v4  ;;  %v3182_v44 = vpop.f32.mrb[15].mxu0  ;;  %v3346_v59 = vpop.f32.mrb[15].mxu1 }
 0x57b   : > { %v3545_v24 = vadd.f32 %v3507_v37, %v3445_v21  ;;  %v3547_v27 = vadd.f32 %v3515_v17, %v3447_v54 }
 0x57c   : > { %v3560_v52 = vmax.f32 %v3544_v56, 0.0  ;;  %v3562_v48 = vmax.f32 %v3546_v26, 0.0 }
 0x57d   : > { %v3561_v23 = vmax.f32 %v3545_v24, 0.0  ;;  %v3563_v28 = vmax.f32 %v3547_v27, 0.0 }
 0x57e   : > { %v3576_v11 = vpack.c.bf16 %v3560_v52, %v3560_v52  ;;  %v3578_v22 = vpack.c.bf16 %v3562_v48, %v3562_v48 }
 0x57f   : > { %v3577_v29 = vpack.c.bf16 %v3561_v23, %v3561_v23  ;;  %v3579_v15 = vpack.c.bf16 %v3563_v28, %v3563_v28 }
 0x581   : > { %3970 = vmatprep.mubr.bf16.mxu0 %v3577_v29  ;;  %4010 = vmatprep.mubr.bf16.mxu1 %v3579_v15 }
 0x582   : > { %3971 = vmatmul.mubr.bf16.vlgmr.msra.gmra.mrb[28].mxu0 %v3576_v11  ;;  %4011 = vmatmul.mubr.bf16.vlgmr.msra.gmra.mrb[28].mxu1 %v3578_v22 }
 0x584   : > { %v3732_v46 = vpop.f32.mrb[16].mxu0  ;;  %v3772_v31 = vpop.f32.mrb[16].mxu1 }
 0x585   : > { %v3773_v30 = vadd.f32 %v3772_v31, %v3732_v46  ;;  %v3734_v35 = vpop.f32.mrb[17].mxu0  ;;  %v3774_v47 = vpop.f32.mrb[17].mxu1 }
 0x586   : > { %v3735_v39 = vpop.f32.mrb[18].mxu0  ;;  %v3775_v32 = vpop.f32.mrb[18].mxu1 }
 0x587   : > { %v3736_v53 = vpop.f32.mrb[19].mxu0  ;;  %v3776_v33 = vpop.f32.mrb[19].mxu1 }
 0x58c   : > { %v3812_v36 = vpop.f32.mrb[20].mxu0 }
 0x58d   : > { %v3813_v58 = vadd.f32 %v3812_v36, %v3773_v30  ;;  %v3852_v61 = vpop.f32.mrb[20].mxu1  ;;  %v3814_v40 = vpop.f32.mrb[21].mxu0 }
 0x58e   : > { %v3854_v41 = vpop.f32.mrb[21].mxu1  ;;  %v3815_v57 = vpop.f32.mrb[22].mxu0 }
 0x58f   : > { %v3853_v60 = vadd.f32 %v3852_v61, %v3813_v58  ;;  %v3855_v43 = vpop.f32.mrb[22].mxu1  ;;  %v3816_v2 = vpop.f32.mrb[23].mxu0 }
 0x590   : > { %v3856_v42 = vpop.f32.mrb[23].mxu1 }
 0x594   : > { %v3892_v14 = vpop.f32.mrb[24].mxu0 }
 0x595   : > { %v3893_v50 = vadd.f32 %v3892_v14, %v3853_v60  ;;  %v3932_v3 = vpop.f32.mrb[24].mxu1  ;;  %v3894_v45 = vpop.f32.mrb[25].mxu0 }
 0x596   : > { %v3934_v18 = vpop.f32.mrb[25].mxu1  ;;  %v3895_v38 = vpop.f32.mrb[26].mxu0 }
 0x597   : > { %v3933_v62 = vadd.f32 %v3932_v3, %v3893_v50  ;;  %v3935_v63 = vpop.f32.mrb[26].mxu1  ;;  %v3896_v1 = vpop.f32.mrb[27].mxu0 }
 0x598   : > { %v3936_v0 = vpop.f32.mrb[27].mxu1 }
 0x655   : > { %v3972_v6 = vpop.f32.mrb[28].mxu0  ;;  %v4012_v55 = vpop.f32.mrb[28].mxu1 }
 0x656   : > { %v3973_v7 = vadd.f32 %v3972_v6, %v3933_v62  ;;  %v3974_v8 = vpop.f32.mrb[29].mxu0  ;;  %v4014_v9 = vpop.f32.mrb[29].mxu1 }
 0x657   : > { %v3975_v10 = vpop.f32.mrb[30].mxu0  ;;  %v4015_v49 = vpop.f32.mrb[30].mxu1 }
 0x658   : > { %v4013_v12 = vadd.f32 %v4012_v55, %v3973_v7  ;;  %v3976_v13 = vpop.f32.mrb[31].mxu0  ;;  %v4016_v16 = vpop.f32.mrb[31].mxu1 }
 0x65a   : > { %v4019_v37 = vadd.f32 %v4018_v34, %v4013_v12 }
 0x65c   : > { %4021 = vst.msk [vmem:[%s4903_s2] sm:$0x3] %vm4020_vm1, %v4019_v37 }
 0x65d PF: > { %s24_s25 = sadd.s32 1, %s4626_s25   ;;  %s5756_s7 = sld [smem:[#allocation16_spill]] }
 0x65e   : > { %p21_p5 = scmp.ge.s32.totalorder %s24_s25, 6   ;;  %s5757_s21 = sld [smem:[#allocation12_spill]] }
 0x65f   : > { %s5758_s22 = sld [smem:[#allocation13_spill]]  ;;  %s5759_s23 = sld [smem:[#allocation14_spill]] }
 0x660   : > { %s5760_s24 = sld [smem:[#allocation15_spill]]  ;;  %s5761_s18 = smov %s4602_s19 }
 0x661   : > { %s5762_s19 = smov %s4606_s20  ;;  %23 = sbr.rel (!%p21_p5) target bundleno = 12 (0xc), region = 124 }
 0x663   : > { %s5763_s20 = smov %s5756_s7 }
 0x668   :  { %4047 = vsyncpa [#allocation3], 1 }
 0x669   :  { %4049 = vsyncpa [#allocation3 + $0x1], 1 }
 0x66a   :  { %4050 = vsyncpa [#allocation5], 1 }
 0x66b   :  { %4052 = vsyncpa [#allocation5 + $0x1], 1 }
 0x66c   :  { %4053 = vsyncpa [#allocation8], 1 }
 0x66d   :  { %4055 = vsyncpa [#allocation8 + $0x1], 1 }

</bundles_post_ra>
